<compile_context>
chip_gen: v5e
topology: v5e:2x2
jax: 0.10.0
libtpu: 0.0.40
codegen_flags: <defaults>
</compile_context>

<pallas_src>
import functools

import jax
import jax.numpy as jnp
import numpy as np
from jax.experimental import pallas as pl
from jax.experimental.pallas import tpu as pltpu

BATCH_TILE = 512          # lane-dense batch columns per grid step (multiple of 256)
SMALL_K_MAX = 8           # in_dim below this -> VPU broadcast-FMA contraction
VMEM_BUDGET = 24 << 20    # stay below v7x's 32 MiB scoped-VMEM default


# ----------------------------------------------------------------------------
# Activations (match torch defaults: Softplus(beta=1, threshold=20), ELU(1.0))
# ----------------------------------------------------------------------------
def _apply_out_activation(y, name):
    if name is None or name == "none":
        return y
    if name == "softplus":
        return jnp.where(y > 20.0, y, jnp.log1p(jnp.exp(jnp.minimum(y, 20.0))))
    if name == "relu":
        return jnp.maximum(y, 0.0)
    if name == "elu":
        return jnp.where(y > 0.0, y, jnp.exp(jnp.minimum(y, 0.0)) - 1.0)
    raise ValueError("unknown out_activation:" + str(name))


# ----------------------------------------------------------------------------
# Pallas kernel (batch-on-lanes: tensors are (features, batch_tile))
# ----------------------------------------------------------------------------
def sinres_kernel(x_ref, w_in_ref, w2_ref, b_ref, o_ref, *,
                  out_dim, has_proj, out_activation):
    """SinRes forward for one (features, BATCH_TILE) batch tile.

    x_ref   : (in_dim, TN)                 input columns
    w_in_ref: (2*out_dim or out_dim, in_dim)  packed [Wp ; alpha*W1] (or alpha*W1)
    w2_ref  : (out_dim, out_dim)           linear2s weight
    b_ref   : (out_dim, 1)                 fused bias (bp+b2, or b2)
    o_ref   : (out_dim, TN)                output columns (f32)
    """
    in_dim = x_ref.shape[0]
    x = x_ref[...]                                           # (in_dim, TN)

    if in_dim < SMALL_K_MAX:
        # Tiny contraction: unrolled VPU broadcast-FMAs.  Keeps the work in
        # otherwise-idle VALU slots instead of a near-empty MXU pass.
        xf = x.astype(jnp.float32)
        w = w_in_ref[...].astype(jnp.float32)                # (rows, in_dim)
        z = w[:, 0:1] * xf[0:1, :]
        for k in range(1, in_dim):
            z = z + w[:, k:k + 1] * xf[k:k + 1, :]
    else:
        # Single MXU contraction over in_dim covering process_x + process_x1
        # (packed); f32 accumulation regardless of operand dtype.
        z = jnp.dot(w_in_ref[...], x, preferred_element_type=jnp.float32)

    if has_proj:
        # out_dim is a multiple of 8, so this split stays sublane-aligned
        # (free register views, no per-step VMEM copies).
        y_old = z[:out_dim, :]                               # (out_dim, TN)
        x1 = z[out_dim:, :]
    else:
        y_old = x.astype(jnp.float32)                        # Identity branch
        x1 = z

    s = jnp.sin(x1)                                          # f32 elementwise
    y_new = jnp.dot(w2_ref[...], s.astype(w2_ref.dtype),
                    preferred_element_type=jnp.float32)

    # Single fused bias (bp + b2 pre-added host-side when has_proj).
    y = _apply_out_activation(y_old + y_new + b_ref[...], out_activation)
    o_ref[...] = y.astype(o_ref.dtype)


# ----------------------------------------------------------------------------
# Feature-major wrapper (the layout MatNet layers should chain in)
# ----------------------------------------------------------------------------
def sinres_apply(x_fm, kparams, *, out_dim, has_proj, out_activation,
                 batch_tile=BATCH_TILE, matmul_dtype=jnp.float32):
    """Feature-major SinRes: x_fm (in_dim, N) -> (out_dim, N), f32 output.

    In a MatNet stack, chain calls directly in this layout and transpose only
    once at model entry/exit (no per-layer HBM transpose round-trips).
    """
    assert x_fm.ndim == 2
    in_dim, n = x_fm.shape
    w_in, w2, b = kparams
    assert out_dim % 8 == 0, \
        "out_dim must be a multiple of 8 to keep the packed-z split sublane-aligned"
    # TODO(synk): pad the packed w_in rows / w2 / bias when out_dim % 8 != 0.

    tn = batch_tile
    n_pad = pl.cdiv(n, tn) * tn
    if n_pad != n:                        # ragged batch: zero-pad tail tile
        x_fm = jnp.pad(x_fm, ((0, 0), (0, n_pad - n)))

    # Matmul operand dtype (bf16 recommended on v6e/v7x at production dims);
    # accumulation, bias, elementwise math and output stay f32.
    x_fm = x_fm.astype(matmul_dtype)
    w_in = w_in.astype(matmul_dtype)
    w2 = w2.astype(matmul_dtype)
    b = b.astype(jnp.float32)

    # Re-derive the VMEM footprint for this tile (v7x only has 64 MiB physical
    # VMEM / 32 MiB scoped default): streamed blocks are double-buffered,
    # resident params are tiny but counted at 2 buffers to be safe.
    x_bytes = jnp.dtype(matmul_dtype).itemsize
    streamed = 2 * tn * (in_dim * x_bytes + out_dim * 4)
    resident = 2 * (w_in.size * x_bytes + w2.size * x_bytes + b.size * 4)
    assert streamed + resident <= VMEM_BUDGET, \
        "tile too large for VMEM budget: shrink batch_tile or raise vmem_limit_bytes"

    def resident_spec(p):
        nd = p.ndim                       # default-arg capture (no late binding)
        return pl.BlockSpec(p.shape, lambda i, nd=nd: (0,) * nd)

    kernel = functools.partial(
        sinres_kernel, out_dim=out_dim, has_proj=has_proj,
        out_activation=out_activation)

    out_fm = pl.pallas_call(
        kernel,
        out_shape=jax.ShapeDtypeStruct((out_dim, n_pad), jnp.float32),
        grid_spec=pltpu.PrefetchScalarGridSpec(
            num_scalar_prefetch=0,
            grid=(n_pad // tn,),
            in_specs=[pl.BlockSpec((in_dim, tn), lambda i: (0, i)),
                      resident_spec(w_in), resident_spec(w2), resident_spec(b)],
            out_specs=pl.BlockSpec((out_dim, tn), lambda i: (0, i)),
        ),
        compiler_params=pltpu.CompilerParams(
            # "parallel" lets the batch axis shard across v7x's two TensorCores.
            dimension_semantics=("parallel",)),
    )(x_fm, w_in, w2, b)

    return out_fm[:, :n] if n_pad != n else out_fm


def sinres_forward(x, kparams, **kw):
    """PyTorch-layout convenience wrapper: x (N, in_dim) -> (N, out_dim).
    Transposes once at entry/exit; for stacked layers call sinres_apply."""
    return sinres_apply(x.T, kparams, **kw).T


# ----------------------------------------------------------------------------
# Deterministic parameter construction (mirrors the PyTorch module's init)
# ----------------------------------------------------------------------------
def make_sinres_params(key, in_dim, out_dim, alpha, is_first):
    """Returns (raw, kparams, has_proj).

    raw     : PyTorch-layout tensors, used by the pure-JAX reference.
    kparams : kernel-layout tensors (packed w_in with alpha folded, w2,
              single fused (out_dim,1) bias column).
    """
    ks = jax.random.split(key, 5)

    def uni(k, shape, lim):
        return jax.random.uniform(k, shape, minval=-lim, maxval=lim,
                                  dtype=jnp.float32)

    raw = {}
    has_proj = in_dim != out_dim
    if has_proj:                                   # nn.Linear default init
        lim = 1.0 / np.sqrt(in_dim)
        raw["wp"] = uni(ks[0], (out_dim, in_dim), lim)
        raw["bp"] = uni(ks[1], (out_dim,), lim)

    # process_x1 weight: init_weight(linear, alpha, is_first)
    lim1 = (1.0 / in_dim) if is_first else (np.sqrt(6.0 / in_dim) / alpha)
    raw["w1"] = uni(ks[2], (out_dim, in_dim), lim1)

    # linear2s: nn.Linear default init
    lim2 = 1.0 / np.sqrt(out_dim)
    raw["w2"] = uni(ks[3], (out_dim, out_dim), lim2)
    raw["b2"] = uni(ks[4], (out_dim,), lim2)

    # Kernel layout: fold alpha into W1 once (W1 @ (alpha*x) == (alpha*W1) @ x,
    # bit-exact for power-of-two alpha), pack the two in_dim-contraction
    # weights, and pre-add the two biases into one (out_dim, 1) column.
    w1_scaled = jnp.asarray(alpha, jnp.float32) * raw["w1"]
    if has_proj:
        w_in = jnp.concatenate([raw["wp"], w1_scaled], axis=0)   # (2*out, in)
        b = (raw["bp"] + raw["b2"]).reshape(out_dim, 1)
    else:
        w_in = w1_scaled
        b = raw["b2"].reshape(out_dim, 1)
    return raw, (w_in, raw["w2"], b), has_proj


# ----------------------------------------------------------------------------
# Pure-JAX reference (PyTorch layout / op order)
# ----------------------------------------------------------------------------
def sinres_reference(x, raw, *, alpha, has_proj, out_activation):
    y_old = (x @ raw["wp"].T + raw["bp"]) if has_proj else x
    x1 = (alpha * x) @ raw["w1"].T
    y_new = jnp.sin(x1) @ raw["w2"].T + raw["b2"]
    return _apply_out_activation(y_old + y_new, out_activation)


# ----------------------------------------------------------------------------
if __name__ == "__main__":
    key = jax.random.PRNGKey(0)
    k1, k2, k3, kx, kx3 = jax.random.split(key, 5)

    # f32 path: headroom for MXU/VPU vs XLA pass-ordering differences.
    ATOL_F32 = RTOL_F32 = 1e-3
    # bf16 matmul operands (f32 accumulation): looser tolerance.
    ATOL_BF16, RTOL_BF16 = 1e-1, 5e-2

    BATCH = 1024        # 2 lane-dense tiles of 512 -> 2 "parallel" grid steps
    ALPHA = 2.0         # power-of-two so the host-side alpha fold is exact

    # Two stacked SinRes layers chained in feature-major layout (one transpose
    # pair for the whole stack instead of per layer):
    #   layer 1: 4 -> 32, projection branch, softplus, f32 (tiny-K VPU path)
    #   layer 2: 32 -> 32, Identity branch, no activation, bf16 MXU operands
    raw1, kp1, proj1 = make_sinres_params(k1, 4, 32, ALPHA, is_first=True)
    raw2, kp2, proj2 = make_sinres_params(k2, 32, 32, ALPHA, is_first=False)

    x = jax.random.normal(kx, (BATCH, 4), dtype=jnp.float32)

    x_fm = x.T                                            # model entry transpose
    y1_fm = sinres_apply(x_fm, kp1, out_dim=32, has_proj=proj1,
                         out_activation="softplus")
    y2_fm = sinres_apply(y1_fm, kp2, out_dim=32, has_proj=proj2,
                         out_activation="none", matmul_dtype=jnp.bfloat16)
    y1 = jax.block_until_ready(y1_fm.T)                   # model exit transpose
    y2 = jax.block_until_ready(y2_fm.T)

    y1_ref = sinres_reference(x, raw1, alpha=ALPHA, has_proj=proj1,
                              out_activation="softplus")
    y2_ref = sinres_reference(y1_ref, raw2, alpha=ALPHA, has_proj=proj2,
                              out_activation="none")
    assert y1.shape == (BATCH, 32)
    assert jnp.allclose(y1, y1_ref, atol=ATOL_F32, rtol=RTOL_F32), \
        "mismatch vs reference: layer 1 (projection / softplus / f32)"
    assert y2.shape == (BATCH, 32)
    assert jnp.allclose(y2, y2_ref, atol=ATOL_BF16, rtol=RTOL_BF16), \
        "mismatch vs reference: layer 2 (identity / none / bf16 matmul)"

    # Ragged batch (not a multiple of the tile) exercises the zero-padded tail,
    # plus the MXU path at K=8 and the ELU activation, via the PyTorch-layout
    # convenience wrapper.
    raw3, kp3, proj3 = make_sinres_params(k3, 8, 16, ALPHA, is_first=False)
    x3 = jax.random.normal(kx3, (200, 8), dtype=jnp.float32)
    y3 = jax.block_until_ready(
        sinres_forward(x3, kp3, out_dim=16, has_proj=proj3,
                       out_activation="elu"))
    y3_ref = sinres_reference(x3, raw3, alpha=ALPHA, has_proj=proj3,
                              out_activation="elu")
    assert y3.shape == (200, 16)
    assert jnp.allclose(y3, y3_ref, atol=ATOL_F32, rtol=RTOL_F32), \
        "mismatch vs reference: layer 3 (projection / elu / ragged batch)"

    print("KERNEL_OK")
</pallas_src>

<mosaic_0001>
module attributes {stable_mosaic.version = 11 : i64} {
  func.func @sinres_kernel(%arg0: i32, %arg1: memref<4x512xf32, #tpu.memory_space<vmem>>, %arg2: memref<64x4xf32, #tpu.memory_space<vmem>>, %arg3: memref<32x32xf32, #tpu.memory_space<vmem>>, %arg4: memref<32x1xf32, #tpu.memory_space<vmem>>, %arg5: memref<32x512xf32, #tpu.memory_space<vmem>>) attributes {dimension_semantics = [#tpu.dimension_semantics<parallel>], iteration_bounds = array<i64: 2>, scalar_prefetch = 0 : i64, scratch_operands = 0 : i64, tpu.core_type = #tpu.core_type<tc>, window_params = [{transform_indices = @transform_0, window_bounds = array<i64: 4, 512>}, {pipeline_mode = #tpu.pipeline_mode<synchronous>, transform_indices = @transform_1, window_bounds = array<i64: 64, 4>}, {pipeline_mode = #tpu.pipeline_mode<synchronous>, transform_indices = @transform_2, window_bounds = array<i64: 32, 32>}, {pipeline_mode = #tpu.pipeline_mode<synchronous>, transform_indices = @transform_3, window_bounds = array<i64: 32, 1>}, {transform_indices = @transform_4, window_bounds = array<i64: 32, 512>}]} {
    %c0 = arith.constant 0 : index
    %c0_0 = arith.constant 0 : index
    %0 = vector.load %arg1[%c0, %c0_0] : memref<4x512xf32, #tpu.memory_space<vmem>>, vector<4x512xf32>
    %c0_1 = arith.constant 0 : index
    %c0_2 = arith.constant 0 : index
    %1 = vector.load %arg2[%c0_1, %c0_2] : memref<64x4xf32, #tpu.memory_space<vmem>>, vector<64x4xf32>
    %2 = vector.extract_strided_slice %1 {offsets = [0, 0], sizes = [64, 1], strides = [1, 1]} : vector<64x4xf32> to vector<64x1xf32>
    %3 = vector.extract_strided_slice %0 {offsets = [0, 0], sizes = [1, 512], strides = [1, 1]} : vector<4x512xf32> to vector<1x512xf32>
    %4 = vector.broadcast %2 : vector<64x1xf32> to vector<64x512xf32>
    %5 = vector.broadcast %3 : vector<1x512xf32> to vector<64x512xf32>
    %6 = arith.mulf %4, %5 : vector<64x512xf32>
    %7 = vector.extract_strided_slice %1 {offsets = [0, 1], sizes = [64, 1], strides = [1, 1]} : vector<64x4xf32> to vector<64x1xf32>
    %8 = vector.extract_strided_slice %0 {offsets = [1, 0], sizes = [1, 512], strides = [1, 1]} : vector<4x512xf32> to vector<1x512xf32>
    %9 = vector.broadcast %7 : vector<64x1xf32> to vector<64x512xf32>
    %10 = vector.broadcast %8 : vector<1x512xf32> to vector<64x512xf32>
    %11 = arith.mulf %9, %10 : vector<64x512xf32>
    %12 = arith.addf %6, %11 : vector<64x512xf32>
    %13 = vector.extract_strided_slice %1 {offsets = [0, 2], sizes = [64, 1], strides = [1, 1]} : vector<64x4xf32> to vector<64x1xf32>
    %14 = vector.extract_strided_slice %0 {offsets = [2, 0], sizes = [1, 512], strides = [1, 1]} : vector<4x512xf32> to vector<1x512xf32>
    %15 = vector.broadcast %13 : vector<64x1xf32> to vector<64x512xf32>
    %16 = vector.broadcast %14 : vector<1x512xf32> to vector<64x512xf32>
    %17 = arith.mulf %15, %16 : vector<64x512xf32>
    %18 = arith.addf %12, %17 : vector<64x512xf32>
    %19 = vector.extract_strided_slice %1 {offsets = [0, 3], sizes = [64, 1], strides = [1, 1]} : vector<64x4xf32> to vector<64x1xf32>
    %20 = vector.extract_strided_slice %0 {offsets = [3, 0], sizes = [1, 512], strides = [1, 1]} : vector<4x512xf32> to vector<1x512xf32>
    %21 = vector.broadcast %19 : vector<64x1xf32> to vector<64x512xf32>
    %22 = vector.broadcast %20 : vector<1x512xf32> to vector<64x512xf32>
    %23 = arith.mulf %21, %22 : vector<64x512xf32>
    %24 = arith.addf %18, %23 : vector<64x512xf32>
    %25 = vector.extract_strided_slice %24 {offsets = [0, 0], sizes = [32, 512], strides = [1, 1]} : vector<64x512xf32> to vector<32x512xf32>
    %26 = vector.extract_strided_slice %24 {offsets = [32, 0], sizes = [32, 512], strides = [1, 1]} : vector<64x512xf32> to vector<32x512xf32>
    %27 = math.sin %26 : vector<32x512xf32>
    %c0_3 = arith.constant 0 : index
    %c0_4 = arith.constant 0 : index
    %28 = vector.load %arg3[%c0_3, %c0_4] : memref<32x32xf32, #tpu.memory_space<vmem>>, vector<32x32xf32>
    %cst = arith.constant dense<0.000000e+00> : vector<32x512xf32>
    %29 = tpu.matmul %28, %27, %cst {dimension_numbers = #tpu.dot_dimension_numbers<[1], [0], [0], [1], [0, 0, 1, 1], [], []>} : vector<32x32xf32>, vector<32x512xf32>, vector<32x512xf32> -> vector<32x512xf32>
    %30 = arith.addf %25, %29 : vector<32x512xf32>
    %c0_5 = arith.constant 0 : index
    %c0_6 = arith.constant 0 : index
    %31 = vector.load %arg4[%c0_5, %c0_6] : memref<32x1xf32, #tpu.memory_space<vmem>>, vector<32x1xf32>
    %32 = vector.broadcast %31 : vector<32x1xf32> to vector<32x512xf32>
    %33 = arith.addf %30, %32 : vector<32x512xf32>
    %cst_7 = arith.constant 2.000000e+01 : f32
    %34 = vector.broadcast %cst_7 : f32 to vector<32x512xf32>
    %35 = arith.cmpf ogt, %33, %34 : vector<32x512xf32>
    %cst_8 = arith.constant 2.000000e+01 : f32
    %36 = vector.broadcast %cst_8 : f32 to vector<32x512xf32>
    %37 = arith.minimumf %33, %36 : vector<32x512xf32>
    %38 = math.exp %37 : vector<32x512xf32>
    %39 = math.log1p %38 : vector<32x512xf32>
    %40 = arith.select %35, %33, %39 : vector<32x512xi1>, vector<32x512xf32>
    %c0_9 = arith.constant 0 : index
    %c0_10 = arith.constant 0 : index
    %41 = vector.load %arg5[%c0_9, %c0_10] : memref<32x512xf32, #tpu.memory_space<vmem>>, vector<32x512xf32>
    tpu.vector_store %arg5[%c0_9, %c0_10], %40 {strides = array<i32>} : memref<32x512xf32, #tpu.memory_space<vmem>>, vector<32x512xf32>,
    return
  }
  func.func @transform_0(%arg0: i32) -> (i32, i32) {
    %c0_i32 = arith.constant 0 : i32
    %c0_i32_0 = arith.constant 0 : i32
    return %c0_i32, %arg0 : i32, i32
  }
  func.func @transform_1(%arg0: i32) -> (i32, i32) {
    %c0_i32 = arith.constant 0 : i32
    %c0_i32_0 = arith.constant 0 : i32
    %c0_i32_1 = arith.constant 0 : i32
    return %c0_i32, %c0_i32_0 : i32, i32
  }
  func.func @transform_2(%arg0: i32) -> (i32, i32) {
    %c0_i32 = arith.constant 0 : i32
    %c0_i32_0 = arith.constant 0 : i32
    %c0_i32_1 = arith.constant 0 : i32
    return %c0_i32, %c0_i32_0 : i32, i32
  }
  func.func @transform_3(%arg0: i32) -> (i32, i32) {
    %c0_i32 = arith.constant 0 : i32
    %c0_i32_0 = arith.constant 0 : i32
    %c0_i32_1 = arith.constant 0 : i32
    return %c0_i32, %c0_i32_0 : i32, i32
  }
  func.func @transform_4(%arg0: i32) -> (i32, i32) {
    %c0_i32 = arith.constant 0 : i32
    %c0_i32_0 = arith.constant 0 : i32
    return %c0_i32, %arg0 : i32, i32
  }
}

</mosaic_0001>

<bundles_post_ra>
// kernel: tpu_custom_call.1
= control target key start
LH: loop header
LB: loop body
LE: loop exit
PB: predicated region body
PF: predicated region fallthrough
CT: control target
= control target key end

     0   :  { %9 = vsyncpa [#allocation3], 0  ;;  %s6969_s0 = inlined_call_operand.vmem [shape: f32[4,1024], index: 0, kind: input, shape index: {}]   ;;  %s6970_s1 = inlined_call_operand.vmem [shape: f32[64,4], index: 1, kind: input, shape index: {}]   ;;  %s6971_s2 = inlined_call_operand.vmem [shape: f32[32,32], index: 2, kind: input, shape index: {}]   ;;  %s6972_s3 = inlined_call_operand.vmem [shape: f32[32,1], index: 3, kind: input, shape index: {}]   ;;  %s6973_s4 = inlined_call_operand.hbm [shape: f32[32,1024], index: 4, kind: output, shape index: {}]  }
   0x1   :  { %11 = vsyncpa [#allocation3 + $0x1], 0  ;;  %s3929_s15 = smov 0   ;;  %s3931_s16 = smov 0  }
   0x2   :  { %s3933_s17 = smov 0   ;;  %s3935_s18 = smov 0  }
   0x3 LB: > { %s3950_s19 = sadd.s32 4294967295, %s3889_s18   ;;  %s3606_s20 = sadd.s32 4294967294, %s3889_s18   ;;  %s3889_s18 = sphi %s3935_s18, %s7194_s18   ;;  %s3885_s17 = sphi %s3933_s17, %s7193_s17   ;;  %s3881_s16 = sphi %s3931_s16, %s7192_s16   ;;  %s3877_s15 = sphi %s3929_s15, %s7191_s15  }
   0x4   : > { %s3954_s21 = sadd.s32 1, %s3889_s18   ;;  %s113_s22 = sadd.s32 1, %s3885_s17 }
   0x5   : > { %s110_s23 = ssub.s32 %s3889_s18, %s3954_s21  ;;  %p123_p0 = scmp.ne.s32.totalorder %s3885_s17, %s3881_s16 }
   0x6   : > { %p111_p1 = scmp.eq.s32.totalorder %s110_s23, 0  ;;  %p124_p2 = scmp.eq.s32.totalorder %s3950_s19, 1 }
   0x7   : > { %p129_p3 = scmp.ne.s32.totalorder %s3881_s16, %s3877_s15  ;;  %p130_p4 = scmp.eq.s32.totalorder %s3606_s20, 1 }
   0x8   : > { %s3965_s24 = scalar_select %p111_p1, %s3885_s17, %s113_s22  }
   0x9   : > { %p3967_p5 = por %p124_p2, %p123_p0  ;;  %p3971_p6 = por %p130_p4, %p129_p3 }
   0xa   : > { %p3609_p7 = scmp.ge.s32.totalorder %s3889_s18, 1  ;;  %p166_p8 = scmp.lt.s32.totalorder %s3889_s18, 3 }
   0xc   : > { %p167_p9 = pnand %p3609_p7, %p166_p8 }
   0xe   : > { %170 = sbr.rel (%p167_p9) target bundleno = 1008 (0x3f0), region = 36 }
  0x13   : > { %v208_v0 = vld [vmem:[%s6970_s1 + $0x38] sm:$0xff]  ;;  %v207_v1 = vld [vmem:[%s6970_s1 + $0x30] sm:$0xff]  ;;  %v6974_v2 = vmov 0   ;;  %v6978_v3 = vmov 2   ;;  %v3893_v4 = vmov 1   ;;  %v206_v5 = vld [vmem:[%s6970_s1 + $0x28] sm:$0xff] }
  0x14   : > { %3737 = vset.pattern.permute.xlu1 %v6974_v2  ;;  %3735 = vset.pattern.permute.xlu0 %v6974_v2  ;;  %v6976_v6 = vmov 3   ;;  %v205_v7 = vld [vmem:[%s6970_s1 + $0x20] sm:$0xff]  ;;  %s3611_s9 = sshll.u32 %s3950_s19, 2  ;;  %s189_s30 = sand.u32 1, %s3881_s16  }
  0x15   : > { %3739 = vset.pattern.permute.xlu2 %v6978_v3  ;;  %246 = vperm.xlu0 %3735, %v208_v0   ;;  %p193_p10 = scmp.lt.s32.totalorder %s3611_s9, 7  ;;  %s3610_s5 = sshll.u32 %s189_s30, 7 }
  0x16   : > { %241 = vperm.xlu1 %3737, %v207_v1   ;;  %432 = vperm.xlu2 %3739, %v208_v0   ;;  %s6736_s6 = scalar_lea.vmem [#allocation2], %s3610_s5  ;;  %s3682_s7 = sshll.u32 %s3950_s19, 5 }
  0x17   : > { %s7196_s9 = smov (!%p193_p10, %s3611_s9), 7  ;;  %s3541_s11 = sshll.u32 %s6736_s6, 4  ;;  %s3542_s11 = int_to_ptr.vmem [resolvable:$true] %s3541_s11 }
  0x18   : > { %s3612_s10 = sshll.u32 %s7196_s9, 2  ;;  %s3529_s19 = scalar_lea.sflag [#allocation3], %s189_s30 }
  0x19   : > { %s196_s13 = scalar_lea.vmem %s6969_s0, %s3612_s10  ;;  %s3540_s10 = scalar_lea.hbm %s6973_s4, %s3682_s7 }
  0x1a   : > { %v200_v11 = vld [vmem:[%s196_s13 + $0x8] sm:$0xff]  ;;  %v4022_v21 = vld [vmem:[%s196_s13] sm:$0xff]  ;;  %s3543_s12 = sshll.u32 %s3540_s10, 4  ;;  %s3847_s23 = scalar_lea.hbm %s6973_s4, 256  ;;  %s3544_s12 = int_to_ptr.hbm [resolvable:$true] %s3543_s12 }
  0x1b   : > { %v253_v14 = vperm.slane %v200_v11, 0  ;;  %v254_v15 = vperm.slane %v200_v11, 4  ;;  %v329_v16 = vperm.slane %v200_v11, 1  ;;  %v330_v17 = vperm.slane %v200_v11, 5  ;;  %s3841_s13 = sshra.s32 %s3544_s12, 4  ;;  %s3842_s13 = int_to_ptr.hbm [resolvable:$true] %s3841_s13 }
  0x1c   : > { %v437_v18 = vperm.slane %v200_v11, 2  ;;  %v438_v19 = vperm.slane %v200_v11, 6  ;;  %v545_v22 = vperm.slane %v200_v11, 3  ;;  %v546_v23 = vperm.slane %v200_v11, 7  ;;  %s3843_s14 = scalar_lea.hbm %s3842_s13, 128  ;;  %p3848_p0 = scmp.lt.s32.totalorder %s3842_s13, %s6973_s4 }
  0x1d   : > { %3736 = vset.pattern.permute.xlu0 %v3893_v4  ;;  %v4024_v24 = vperm.slane %v253_v14, 0  ;;  %v4026_v25 = vperm.slane %v254_v15, 0  ;;  %v4028_v26 = vperm.slane %v329_v16, 1  ;;  %v4030_v27 = vperm.slane %v330_v17, 1  ;;  %p3844_p11 = scmp.ne.s32.totalorder %s3842_s13, %s3843_s14  ;;  %p3849_p1 = scmp.lt.s32.totalorder %s3847_s23, %s3843_s14 }
  0x1e   : > { %3738 = vset.pattern.permute.xlu1 %v3893_v4  ;;  %3740 = vset.pattern.permute.xlu2 %v6974_v2  ;;  %v4032_v28 = vperm.slane %v437_v18, 2  ;;  %v4034_v29 = vperm.slane %v438_v19, 2  ;;  %v251_v30 = vperm.slane %v4022_v21, 0  ;;  %v327_v33 = vperm.slane %v4022_v21, 1 }
  0x1f   : > { %324 = vperm.xlu0 %3736, %v208_v0   ;;  %320 = vperm.xlu1 %3738, %v207_v1   ;;  %7059 = vst [vmem:[#allocation5_spill] sm:$0xff] %v4024_v24  ;;  %v328_v34 = vperm.slane %v4022_v21, 5  ;;  %v4043_v37 = vperm.slane %v545_v22, 3  ;;  %v4045_v38 = vperm.slane %v546_v23, 3  ;;  %v252_v47 = vperm.slane %v4022_v21, 4  ;;  %p3845_p12 = pnand %p3844_p11, %p3967_p5  ;;  %p3850_p2 = por %p3849_p1, %p3848_p0 }
  0x20   : > { %236 = vperm.xlu2 %3740, %v206_v5   ;;  %7060 = vst [vmem:[#allocation6_spill] sm:$0xff] %v4026_v25  ;;  %v435_v50 = vperm.slane %v4022_v21, 2  ;;  %v4063_v51 = vperm.slane %v327_v33, 1  ;;  %v436_v59 = vperm.slane %v4022_v21, 6  ;;  %v4072_v60 = vperm.slane %v251_v30, 0 }
  0x21   : > { %7061 = vst [vmem:[#allocation7_spill] sm:$0xff] %v4028_v26  ;;  %v4067_v56 = vperm.slane %v328_v34, 1  ;;  %v4074_v63 = vperm.slane %v252_v47, 0  ;;  %p3846_p13 = pneg %p3845_p12 }
  0x22   : > { %7062 = vst [vmem:[#allocation8_spill] sm:$0xff] %v4030_v27  ;;  %v4094_v22 = vperm.slane %v435_v50, 2  ;;  %v4096_v23 = vperm.slane %v436_v59, 2 }
  0x23   : > { %7063 = vst [vmem:[#allocation9_spill] sm:$0xff] %v4032_v28  ;;  %p3851_p3 = pnand %p3850_p2, %p3846_p13 }
  0x24   : > { %7064 = vst [vmem:[#allocation10_spill] sm:$0xff] %v4034_v29 }
  0x25   : > { %7065 = vst [vmem:[#allocation11_spill] sm:$0xff] %v4043_v37 }
  0x26   : > { %7066 = vst [vmem:[#allocation12_spill] sm:$0xff] %v4045_v38 }
  0x27   : > { %3742 = vset.pattern.permute.xlu0 %v6976_v6  ;;  %316 = vperm.xlu1 %3738, %v206_v5   ;;  %7067 = vst [vmem:[#allocation13_spill] sm:$0xff] %v4063_v51 }
  0x28   : > { %540 = vperm.xlu0 %3742, %v208_v0   ;;  %3741 = vset.pattern.permute.xlu2 %v6978_v3  ;;  %7068 = vst [vmem:[#allocation14_spill] sm:$0xff] %v4067_v56  ;;  %v543_v0 = vperm.slane %v4022_v21, 3 }
  0x29   : > { %428 = vperm.xlu2 %3741, %v207_v1   ;;  %7069 = vst [vmem:[#allocation15_spill] sm:$0xff] %v4072_v60 }
  0x2a   : > { %7070 = vst [vmem:[#allocation16_spill] sm:$0xff] %v4074_v63 }
  0x2b   : > { %7073 = vst [vmem:[#allocation19_spill] sm:$0xff] %v4094_v22 }
  0x2c   : > { %7074 = vst [vmem:[#allocation20_spill] sm:$0xff] %v4096_v23 }
  0x2f   : > { %3743 = vset.pattern.permute.xlu1 %v6974_v2 }
  0x30   : > { %231 = vperm.xlu1 %3743, %v205_v7   ;;  %3747 = vset.pattern.permute.xlu0 %v6978_v3 }
  0x31   : > { %3744 = vset.pattern.permute.xlu2 %v3893_v4  ;;  %420 = vperm.xlu0 %3747, %v205_v7  }
  0x32   : > { %312 = vperm.xlu2 %3744, %v205_v7  }
  0x38   : > { %3745 = vset.pattern.permute.xlu1 %v6978_v3 }
  0x39   : > { %424 = vperm.xlu1 %3745, %v206_v5   ;;  %3751 = vset.pattern.permute.xlu0 %v6974_v2 }
  0x3a   : > { %3746 = vset.pattern.permute.xlu2 %v6976_v6 }
  0x3b   : > { %536 = vperm.xlu2 %3746, %v207_v1   ;;  %v544_v1 = vperm.slane %v4022_v21, 7 }
  0x41   : > { %3748 = vset.pattern.permute.xlu1 %v6976_v6 }
  0x42   : > { %532 = vperm.xlu1 %3748, %v206_v5  }
  0x43   : > { %528 = vperm.xlu2 %3746, %v205_v7  }
  0x4a   : > { %3749 = vset.pattern.permute.xlu1 %v6974_v2 }
  0x4b   : > { %3750 = vset.pattern.permute.xlu2 %v6974_v2 }
  0x70   : > { %v4006_v8 = vpop.permute.xlu2 %432 }
  0x71   : > { %v478_v55 = vmul.f32 %v4034_v29, %v4006_v8  ;;  %v476_v59 = vmul.f32 %v4096_v23, %v4006_v8 }
  0x7a   : > { %v4009_v9 = vpop.permute.xlu2 %236 }
  0x7b   : > { %v285_v7 = vmul.f32 %v4024_v24, %v4009_v9  ;;  %v286_v11 = vmul.f32 %v4026_v25, %v4009_v9 }
  0x83   : > { %v4011_v10 = vpop.permute.xlu2 %428 }
  0x84   : > { %v473_v39 = vmul.f32 %v4032_v28, %v4011_v10  ;;  %v474_v40 = vmul.f32 %v4034_v29, %v4011_v10 }
  0x87   : > { %v4016_v12 = vpop.permute.xlu0 %246 }
  0x88   : > { %v4018_v13 = vpop.permute.xlu1 %241  ;;  %v293_v31 = vmul.f32 %v4024_v24, %v4016_v12  ;;  %v294_v32 = vmul.f32 %v4026_v25, %v4016_v12  ;;  %v292_v47 = vmul.f32 %v4074_v63, %v4016_v12 }
  0x89   : > { %v289_v43 = vmul.f32 %v4024_v24, %v4018_v13  ;;  %v290_v44 = vmul.f32 %v4026_v25, %v4018_v13 }
  0x8c   : > { %v4020_v20 = vpop.permute.xlu2 %312 }
  0x91   : > { %v325_v35 = vpop.permute.xlu0 %324  ;;  %v321_v36 = vpop.permute.xlu1 %320 }
  0x92   : > { %v369_v41 = vmul.f32 %v4028_v26, %v325_v35  ;;  %v370_v42 = vmul.f32 %v4030_v27, %v325_v35  ;;  %v365_v45 = vmul.f32 %v4028_v26, %v321_v36  ;;  %v366_v46 = vmul.f32 %v4030_v27, %v321_v36 }
  0x93   : > { %v363_v17 = vmul.f32 %v4063_v51, %v321_v36  ;;  %v364_v18 = vmul.f32 %v4067_v56, %v321_v36  ;;  %v471_v36 = vmul.f32 %v4094_v22, %v4011_v10 }
  0x94   : > { %v4060_v48 = vadd.f32 %v369_v41, %v293_v31  ;;  %v402_v49 = vadd.f32 %v370_v42, %v294_v32  ;;  %v397_v52 = vadd.f32 %v365_v45, %v289_v43  ;;  %v398_v53 = vadd.f32 %v366_v46, %v290_v44 }
  0x95   : > { %v537_v54 = vpop.permute.xlu2 %536  ;;  %v287_v31 = vmul.f32 %v4072_v60, %v4018_v13  ;;  %v288_v32 = vmul.f32 %v4074_v63, %v4018_v13  ;;  %v472_v41 = vmul.f32 %v4096_v23, %v4011_v10  ;;  %v291_v13 = vmul.f32 %v4072_v60, %v4016_v12 }
  0x96   : > { %v581_v57 = vmul.f32 %v4043_v37, %v537_v54  ;;  %v582_v58 = vmul.f32 %v4045_v38, %v537_v54  ;;  %v505_v61 = vadd.f32 %v473_v39, %v397_v52  ;;  %v506_v62 = vadd.f32 %v474_v40, %v398_v53 }
  0x97   : > { %v510_v5 = vadd.f32 %v478_v55, %v402_v49  ;;  %v4108_v39 = vperm.slane %v543_v0, 3  ;;  %v4110_v40 = vperm.slane %v544_v1, 3  ;;  %v395_v42 = vadd.f32 %v363_v17, %v287_v31 }
  0x98   : > { %v4082_v14 = vadd.f32 %v581_v57, %v505_v61  ;;  %v4084_v15 = vadd.f32 %v582_v58, %v506_v62  ;;  %v396_v43 = vadd.f32 %v364_v18, %v288_v32  ;;  %v367_v45 = vmul.f32 %v4063_v51, %v325_v35 }
  0x99   : > { %v4086_v16 = vpop.permute.xlu1 %316  ;;  %7075 = vst [vmem:[#allocation21_spill] sm:$0xff] %v4108_v39  ;;  %v368_v49 = vmul.f32 %v4067_v56, %v325_v35  ;;  %v503_v50 = vadd.f32 %v471_v36, %v395_v42  ;;  %v579_v10 = vmul.f32 %v4108_v39, %v537_v54  ;;  %v580_v53 = vmul.f32 %v4110_v40, %v537_v54 }
  0x9a   : > { %7071 = vst [vmem:[#allocation17_spill] sm:$0xff] %v4082_v14  ;;  %v361_v19 = vmul.f32 %v4028_v26, %v4086_v16  ;;  %v362_v21 = vmul.f32 %v4030_v27, %v4086_v16  ;;  %v541_v30 = vpop.permute.xlu0 %540  ;;  %v504_v52 = vadd.f32 %v472_v41, %v396_v43  ;;  %v399_v55 = vadd.f32 %v367_v45, %v291_v13 }
  0x9b   : > { %7072 = vst [vmem:[#allocation18_spill] sm:$0xff] %v4084_v15  ;;  %v586_v44 = vmul.f32 %v4045_v38, %v541_v30  ;;  %v475_v57 = vmul.f32 %v4094_v22, %v4006_v8  ;;  %v400_v58 = vadd.f32 %v368_v49, %v292_v47  ;;  %v477_v61 = vmul.f32 %v4032_v28, %v4006_v8 }
  0x9c   : > { %v4102_v33 = vadd.f32 %v361_v19, %v285_v7  ;;  %v4104_v34 = vadd.f32 %v362_v21, %v286_v11  ;;  %7076 = vst [vmem:[#allocation22_spill] sm:$0xff] %v4110_v40  ;;  %v4131_v12 = vadd.f32 %v579_v10, %v503_v50  ;;  %v4133_v35 = vadd.f32 %v580_v53, %v504_v52 }
  0x9d   : > { %v4118_v46 = vadd.f32 %v586_v44, %v510_v5  ;;  %v355_v0 = vmul.f32 %v4063_v51, %v4020_v20  ;;  %v356_v54 = vmul.f32 %v4067_v56, %v4020_v20  ;;  %v357_v1 = vmul.f32 %v4028_v26, %v4020_v20 }
  0x9e   : > { %7077 = vst [vmem:[#allocation23_spill] sm:$0xff] %v4133_v35  ;;  %v583_v5 = vmul.f32 %v4108_v39, %v541_v30  ;;  %v358_v7 = vmul.f32 %v4030_v27, %v4020_v20  ;;  %v507_v8 = vadd.f32 %v475_v57, %v399_v55  ;;  %v584_v11 = vmul.f32 %v4110_v40, %v541_v30 }
  0x9f   : > { %v585_v17 = vmul.f32 %v4043_v37, %v541_v30  ;;  %v508_v18 = vadd.f32 %v476_v59, %v400_v58  ;;  %v509_v19 = vadd.f32 %v477_v61, %v4060_v48  ;;  %v1862_v32 = vand.u32 2139095040, %v4131_v12  ;;  %v4175_v58 = vld [vmem:[%s6970_s1] sm:$0xff]  ;;  %v4180_v59 = vld [vmem:[%s6970_s1 + $0x8] sm:$0xff] }
  0xa0   : > { %v2017_v36 = vand.u32 2139095040, %v4133_v35  ;;  %v2172_v42 = vand.u32 2139095040, %v4082_v14  ;;  %v4154_v43 = vadd.f32 %v583_v5, %v507_v8  ;;  %v2327_v49 = vand.u32 2139095040, %v4084_v15  ;;  %211 = vperm.xlu1 %3749, %v4175_v58   ;;  %216 = vperm.xlu2 %3750, %v4180_v59  }
  0xa1   : > { %v4160_v48 = vadd.f32 %v584_v11, %v508_v18  ;;  %v4162_v13 = vadd.f32 %v585_v17, %v509_v19  ;;  %v1863_v50 = vshrl.u32 %v1862_v32, 23  ;;  %v4200_v32 = vld [vmem:[%s6970_s1 + $0x18] sm:$0xff] }
  0xa2   : > { %v232_v62 = vpop.permute.xlu1 %231  ;;  %v2018_v52 = vshrl.u32 %v2017_v36, 23  ;;  %v2482_v10 = vand.u32 2139095040, %v4154_v43  ;;  %v2173_v53 = vshrl.u32 %v2172_v42, 23  ;;  %v2328_v61 = vshrl.u32 %v2327_v49, 23 }
  0xa3   : > { %v279_v21 = vmul.f32 %v4072_v60, %v232_v62  ;;  %v280_v31 = vmul.f32 %v4074_v63, %v232_v62  ;;  %v281_v41 = vmul.f32 %v4024_v24, %v232_v62  ;;  %v282_v20 = vmul.f32 %v4026_v25, %v232_v62 }
  0xa4   : > { %v2637_v55 = vand.u32 2139095040, %v4160_v48  ;;  %v2792_v57 = vand.u32 2139095040, %v4162_v13  ;;  %v2947_v62 = vand.u32 2139095040, %v4118_v46  ;;  %v3640_v5 = vadd.s32 4294967169, %v2018_v52 }
  0xa5   : > { %v4156_v30 = vadd.f32 %v355_v0, %v279_v21  ;;  %v4158_v44 = vadd.f32 %v356_v54, %v280_v31  ;;  %v4164_v45 = vadd.f32 %v357_v1, %v281_v41  ;;  %v4166_v47 = vadd.f32 %v358_v7, %v282_v20  ;;  %v4187_v0 = vld [vmem:[%s6970_s1 + $0x10] sm:$0xff] }
  0xa6   : > { %221 = vperm.xlu0 %3751, %v4187_v0   ;;  %v3637_v1 = vadd.s32 4294967169, %v1863_v50  ;;  %v2483_v7 = vshrl.u32 %v2482_v10, 23  ;;  %v3643_v8 = vadd.s32 4294967169, %v2173_v53  ;;  %v2638_v11 = vshrl.u32 %v2637_v55, 23 }
  0xa7   : > { %v2793_v17 = vshrl.u32 %v2792_v57, 23  ;;  %v3646_v18 = vadd.s32 4294967169, %v2328_v61  ;;  %v2948_v19 = vshrl.u32 %v2947_v62, 23  ;;  %v2024_v41 = vadd.s32 1, %v3640_v5 }
  0xa8   : > { %v1869_v36 = vadd.s32 1, %v3637_v1  ;;  %v3649_v20 = vadd.s32 4294967169, %v2483_v7  ;;  %v2179_v49 = vadd.s32 1, %v3643_v8  ;;  %v3652_v50 = vadd.s32 4294967169, %v2638_v11  ;;  %226 = vperm.xlu1 %3749, %v4200_v32   ;;  %3752 = vset.pattern.permute.xlu2 %v3893_v4  ;;  %v421_v8 = vpop.permute.xlu0 %420 }
  0xa9   : > { %v3655_v52 = vadd.s32 4294967169, %v2793_v17  ;;  %v2334_v53 = vadd.s32 1, %v3646_v18  ;;  %v3658_v55 = vadd.s32 4294967169, %v2948_v19  ;;  %v359_v57 = vmul.f32 %v4063_v51, %v4086_v16  ;;  %296 = vperm.xlu2 %3752, %v4175_v58  }
  0xaa   : > { %vm1870_vm0 = vcmp.gt.s32.totalorder %v1869_v36, 0  ;;  %vm2025_vm1 = vcmp.gt.s32.totalorder %v2024_v41, 0  ;;  %vm2180_vm2 = vcmp.gt.s32.totalorder %v2179_v49, 0  ;;  %v2644_v61 = vadd.s32 1, %v3652_v50 }
  0xab   : > { %v4190_v54 = vpop.permute.xlu1 %424  ;;  %v2799_v62 = vadd.s32 1, %v3655_v52  ;;  %v283_v1 = vmul.f32 %v4072_v60, %v4009_v9  ;;  %v284_v5 = vmul.f32 %v4074_v63, %v4009_v9  ;;  %vm2335_vm3 = vcmp.gt.s32.totalorder %v2334_v53, 0 }
  0xac   : > { %v469_v21 = vmul.f32 %v4032_v28, %v4190_v54  ;;  %v470_v31 = vmul.f32 %v4034_v29, %v4190_v54  ;;  %v2954_v7 = vadd.s32 1, %v3658_v55  ;;  %v1871_v11 = vsel %vm1870_vm0, %v1869_v36, 0  ;;  %v529_v36 = vpop.permute.xlu2 %528 }
  0xad   : > { %v2026_v17 = vsel %vm2025_vm1, %v2024_v41, 0  ;;  %v2181_v18 = vsel %vm2180_vm2, %v2179_v49, 0  ;;  %v4221_v19 = vadd.f32 %v359_v57, %v283_v1  ;;  %vm2645_vm5 = vcmp.gt.s32.totalorder %v2644_v61, 0 }
  0xae   : > { %v4203_v42 = vadd.f32 %v469_v21, %v4102_v33  ;;  %v4206_v10 = vadd.f32 %v470_v31, %v4104_v34  ;;  %3754 = vset.pattern.permute.xlu0 %v3893_v4  ;;  %v360_v33 = vmul.f32 %v4067_v56, %v4086_v16  ;;  %v2489_v34 = vadd.s32 1, %v3649_v20 }
  0xaf   : > { %308 = vperm.xlu0 %3754, %v4200_v32   ;;  %v2336_v21 = vsel %vm2335_vm3, %v2334_v53, 0  ;;  %vm2800_vm6 = vcmp.gt.s32.totalorder %v2799_v62, 0  ;;  %v463_v31 = vmul.f32 %v4094_v22, %v421_v8  ;;  %v4226_v20 = vshrl.u32 %v1871_v11, 5 }
  0xb0   : > { %7078 = vst [vmem:[#allocation24_spill] sm:$0xff] %v4206_v10  ;;  %v4223_v16 = vadd.f32 %v360_v33, %v284_v5  ;;  %vm2490_vm4 = vcmp.gt.s32.totalorder %v2489_v34, 0  ;;  %v4228_v50 = vand.u32 31, %v1871_v11  ;;  %v4230_v9 = vshrl.u32 %v2026_v17, 5  ;;  %3753 = vset.pattern.permute.xlu1 %v3893_v4 }
  0xb1   : > { %7079 = vst [vmem:[#allocation25_spill] sm:$0xff] %v4226_v20  ;;  %vm2955_vm7 = vcmp.gt.s32.totalorder %v2954_v7, 0  ;;  %v4233_v41 = vand.u32 31, %v2026_v17  ;;  %v4235_v49 = vshrl.u32 %v2181_v18, 5  ;;  %v4237_v52 = vand.u32 31, %v2181_v18  ;;  %300 = vperm.xlu1 %3753, %v4180_v59   ;;  %304 = vperm.xlu2 %3752, %v4187_v0  }
  0xb2   : > { %7080 = vst [vmem:[#allocation26_spill] sm:$0xff] %v4228_v50  ;;  %v2491_v53 = vsel %vm2490_vm4, %v2489_v34, 0  ;;  %v4241_v55 = vand.u32 31, %v2336_v21  ;;  %v2646_v57 = vsel %vm2645_vm5, %v2644_v61, 0  ;;  %v2801_v33 = vsel %vm2800_vm6, %v2799_v62, 0 }
  0xb3   : > { %7081 = vst [vmem:[#allocation27_spill] sm:$0xff] %v4230_v9  ;;  %v464_v1 = vmul.f32 %v4096_v23, %v421_v8  ;;  %v2956_v4 = vsel %vm2955_vm7, %v2954_v7, 0  ;;  %v465_v5 = vmul.f32 %v4032_v28, %v421_v8  ;;  %v495_v11 = vadd.f32 %v463_v31, %v4156_v30 }
  0xb4   : > { %7082 = vst [vmem:[#allocation28_spill] sm:$0xff] %v4233_v41  ;;  %v571_v34 = vmul.f32 %v4108_v39, %v529_v36  ;;  %v4252_v17 = vsub.s32 32, %v4228_v50  ;;  %v4254_v18 = vshrl.u32 %v2336_v21, 5  ;;  %v2493_v61 = vand.u32 31, %v2491_v53 }
  0xb5   : > { %7083 = vst [vmem:[#allocation29_spill] sm:$0xff] %v4235_v49  ;;  %v466_v62 = vmul.f32 %v4034_v29, %v421_v8  ;;  %v4258_v2 = vsub.s32 32, %v4233_v41  ;;  %v4261_v7 = vsub.s32 32, %v4237_v52  ;;  %v4265_v30 = vand.u32 31, %v2801_v33 }
  0xb6   : > { %7084 = vst [vmem:[#allocation30_spill] sm:$0xff] %v4237_v52  ;;  %v4268_v31 = vsub.s32 32, %v4241_v55  ;;  %v4270_v3 = vshrl.u32 %v2491_v53, 5  ;;  %v4272_v21 = vand.u32 31, %v2956_v4  ;;  %v496_v28 = vadd.f32 %v464_v1, %v4158_v44 }
  0xb7   : > { %7085 = vst [vmem:[#allocation31_spill] sm:$0xff] %v4241_v55  ;;  %3757 = vset.pattern.permute.xlu0 %v6976_v6  ;;  %v4263_v6 = vand.u32 31, %v2646_v57  ;;  %v497_v8 = vadd.f32 %v465_v5, %v4164_v45  ;;  %v572_v29 = vmul.f32 %v4110_v40, %v529_v36  ;;  %v573_v27 = vmul.f32 %v4043_v37, %v529_v36 }
  0xb8   : > { %512 = vperm.xlu0 %3757, %v4175_v58   ;;  %7086 = vst [vmem:[#allocation32_spill] sm:$0xff] %v4254_v18  ;;  %v4278_v26 = vadd.f32 %v571_v34, %v495_v11  ;;  %v2494_v25 = vsub.s32 32, %v2493_v61  ;;  %v4280_v24 = vshrl.u32 %v2646_v57, 5  ;;  %v498_v56 = vadd.f32 %v466_v62, %v4166_v47 }
  0xb9   : > { %7087 = vst [vmem:[#allocation33_spill] sm:$0xff] %v4258_v2  ;;  %v574_v53 = vmul.f32 %v4045_v38, %v529_v36  ;;  %v4285_v51 = vsub.s32 32, %v4263_v6  ;;  %v4287_v63 = vshrl.u32 %v2801_v33, 5  ;;  %v4290_v44 = vsub.s32 32, %v4265_v30 }
  0xba   : > { %7088 = vst [vmem:[#allocation34_spill] sm:$0xff] %v4261_v7  ;;  %v4292_v45 = vshrl.u32 %v2956_v4, 5  ;;  %v7091_v1 = vmov 2   ;;  %v4297_v57 = vsub.s32 32, %v4272_v21  ;;  %v467_v47 = vmul.f32 %v4094_v22, %v4190_v54 }
  0xbb   : > { %7089 = vst [vmem:[#allocation35_spill] sm:$0xff] %v4268_v31  ;;  %3755 = vset.pattern.permute.xlu1 %v7091_v1  ;;  %3756 = vset.pattern.permute.xlu2 %v7091_v1  ;;  %v468_v36 = vmul.f32 %v4096_v23, %v4190_v54  ;;  %v7006_v33 = vand.u32 2147483647, %v4154_v43  ;;  %v4306_v4 = vadd.f32 %v572_v29, %v496_v28  ;;  %v622_v11 = vand.u32 2139095040, %v4278_v26 }
  0xbc   : > { %7090 = vst [vmem:[#allocation36_spill] sm:$0xff] %v4278_v26  ;;  %404 = vperm.xlu1 %3755, %v4175_v58   ;;  %408 = vperm.xlu2 %3756, %v4180_v59   ;;  %v4308_v5 = vadd.f32 %v573_v27, %v497_v8  ;;  %v7094_v34 = vmov 0   ;;  %v4312_v62 = vadd.f32 %v574_v53, %v498_v56  ;;  %v7010_v54 = vmov 683565275  }
  0xbd   : > { %7092 = vst [vmem:[#allocation37_spill] sm:$0xff] %v4306_v4  ;;  %v2486_v1 = vand.u32 8388607, %v7006_v33  ;;  %v2496_v58 = vshll.u32 %v7010_v54, %v2493_v61  ;;  %v7013_v23 = vmov 2475754826   ;;  %v4327_v15 = vadd.f32 %v467_v47, %v4221_v19 }
  0xbe   : > { %7093 = vst [vmem:[#allocation38_spill] sm:$0xff] %v4308_v5  ;;  %v2497_v22 = vshrl.u32 %v7013_v23, %v2494_v25  ;;  %v2499_v28 = vshll.u32 %v7013_v23, %v2493_v61  ;;  %v7017_v27 = vmov 2131351028   ;;  %v7024_v56 = vmov 2102212464  }
  0xbf   : > { %7095 = vst [vmem:[#allocation39_spill] sm:$0xff] %v4312_v62  ;;  %v2487_v60 = vor.u32 8388608, %v2486_v1  ;;  %v2500_v29 = vshrl.u32 %v7017_v27, %v2494_v25  ;;  %v2502_v26 = vshll.u32 %v7017_v27, %v2493_v61  ;;  %v2503_v53 = vshrl.u32 %v7024_v56, %v2494_v25 }
  0xc0   : > { %3761 = vset.pattern.permute.xlu0 %v7094_v34  ;;  %v2498_v8 = vor.u32 %v2497_v22, %v2496_v58  ;;  %v2505_v33 = vshll.u32 %v7024_v56, %v2493_v61  ;;  %v7022_v55 = vmov 920167782   ;;  %v7020_v1 = vmov 1326507024  }
  0xc1   : > { %v2501_v18 = vor.u32 %v2500_v29, %v2499_v28  ;;  %v2506_v54 = vshrl.u32 %v7022_v55, %v2494_v25  ;;  %v2508_v31 = vshll.u32 %v7022_v55, %v2493_v61  ;;  %v2509_v23 = vshrl.u32 %v7020_v1, %v2494_v25 }
  0xc2   : > { %v4330_v22 = vadd.f32 %v468_v36, %v4223_v16  ;;  %v7096_v58 = vmov 683565275   ;;  %v2504_v49 = vor.u32 %v2503_v53, %v2502_v26  ;;  %vm2511_vm8 = vcmp.lt.s32.totalorder %v4270_v3, 1 }
  0xc3   : > { %v2495_v27 = vshrl.u32 %v7096_v58, %v2494_v25  ;;  %v2507_v28 = vor.u32 %v2506_v54, %v2505_v33  ;;  %v2510_v29 = vor.u32 %v2509_v23, %v2508_v31  ;;  %vm2514_vm9 = vcmp.lt.s32.totalorder %v4270_v3, 4  ;;  %v4341_v33 = vpop.permute.xlu1 %532 }
  0xc4   : > { %412 = vperm.xlu1 %3755, %v4187_v0   ;;  %416 = vperm.xlu2 %3756, %v4200_v32   ;;  %v2516_v61 = vsel %vm2514_vm9, %v2504_v49, 2102212464  ;;  %v2519_v1 = vsel %vm2511_vm8, %v2498_v8, %v2501_v18  ;;  %v2523_v19 = vsel %vm2511_vm8, %v2501_v18, %v2504_v49  ;;  %v4337_v47 = vshll.u32 %v2487_v60, 8 }
  0xc5   : > { %vm2512_vm10 = vcmp.lt.s32.totalorder %v4270_v3, 2  ;;  %vm2513_vm11 = vcmp.lt.s32.totalorder %v4270_v3, 3  ;;  %v2520_v25 = vsel %vm2514_vm9, %v2507_v28, 920167782  ;;  %v2524_v26 = vsel %vm2514_vm9, %v2510_v29, 1326507024 }
  0xc6   : > { %v2515_v16 = vsel %vm2511_vm8, %v2495_v27, %v2498_v8  ;;  %v2517_v36 = vsel %vm2513_vm11, %v2501_v18, %v2516_v61  ;;  %v2521_v23 = vsel %vm2513_vm11, %v2504_v49, %v2520_v25  ;;  %v2525_v31 = vsel %vm2513_vm11, %v2507_v28, %v2524_v26 }
  0xc7   : > { %v2522_v54 = vsel %vm2512_vm10, %v2519_v1, %v2521_v23  ;;  %v2526_v53 = vsel %vm2512_vm10, %v2523_v19, %v2525_v31  ;;  %v2528_v60 = vand.u32 65535, %v4337_v47  ;;  %v2529_v55 = vshrl.u32 %v4337_v47, 16 }
  0xc8   : > { %v2530_v56 = vand.u32 65535, %v2526_v53  ;;  %v2531_v52 = vshrl.u32 %v2526_v53, 16  ;;  %v2552_v7 = vand.u32 65535, %v2522_v54  ;;  %v2553_v29 = vshrl.u32 %v2522_v54, 16 }
  0xc9   : > { %v4349_v27 = vshrl.u32 %v622_v11, 23  ;;  %v4356_v1 = vmul.f32 %v4108_v39, %v4341_v33  ;;  %v4360_v28 = vsel %vm2512_vm10, %v2515_v16, %v2517_v36  ;;  %v2651_v23 = vshll.u32 %v7096_v58, %v4263_v6 }
  0xca   : > { %v2533_v61 = vmul.u32 %v2531_v52, %v2528_v60  ;;  %v2534_v19 = vmul.u32 %v2530_v56, %v2529_v55  ;;  %v2555_v25 = vmul.u32 %v2553_v29, %v2528_v60  ;;  %v2556_v26 = vmul.u32 %v2552_v7, %v2529_v55 }
  0xcb   : > { %v7097_v31 = vmov 3   ;;  %v2532_v54 = vmul.u32 %v2530_v56, %v2528_v60  ;;  %v2535_v53 = vmul.u32 %v2531_v52, %v2529_v55  ;;  %v2554_v18 = vmul.u32 %v2552_v7, %v2528_v60 }
  0xcc   : > { %3758 = vset.pattern.permute.xlu1 %v7097_v31  ;;  %v2536_v8 = vshll.u32 %v2533_v61, 16  ;;  %3759 = vset.pattern.permute.xlu2 %v7097_v31  ;;  %v2537_v3 = vshrl.u32 %v2533_v61, 16  ;;  %v2538_v16 = vshll.u32 %v2534_v19, 16  ;;  %v2557_v36 = vmul.u32 %v2553_v29, %v2529_v55 }
  0xcd   : > { %516 = vperm.xlu1 %3758, %v4180_v59   ;;  %v2558_v49 = vshll.u32 %v2555_v25, 16  ;;  %520 = vperm.xlu2 %3759, %v4187_v0   ;;  %v2539_v11 = vshrl.u32 %v2534_v19, 16  ;;  %v2560_v14 = vshll.u32 %v2556_v26, 16  ;;  %v7098_v7 = vmov 2475754826  }
  0xce   : > { %vm2540_vm12 = vc.u32 %v2532_v54, %v2536_v8  ;;  %v2542_v39 = vadd.s32 %v2536_v8, %v2532_v54  ;;  %v2652_v56 = vshrl.u32 %v7098_v7, %v4285_v51  ;;  %v2559_v60 = vshrl.u32 %v2555_v25, 16 }
  0xcf   : > { %v2541_v9 = vsel %vm2540_vm12, 1, %v7094_v34  ;;  %vm2562_vm13 = vc.u32 %v2554_v18, %v2558_v49  ;;  %v2564_v52 = vadd.s32 %v2558_v49, %v2554_v18  ;;  %v2561_v29 = vshrl.u32 %v2556_v26, 16 }
  0xd0   : > { %v2543_v59 = vadd.s32 %v2541_v9, %v2535_v53  ;;  %vm2544_vm14 = vc.u32 %v2542_v39, %v2538_v16  ;;  %v2563_v61 = vsel %vm2562_vm13, 1, %v7094_v34  ;;  %v7099_v31 = vand.u32 2147483647, %v4160_v48 }
  0xd1   : > { %v2545_v55 = vsel %vm2544_vm14, 1, %v7094_v34  ;;  %v2565_v0 = vadd.s32 %v2563_v61, %v2557_v36  ;;  %vm2566_vm15 = vc.u32 %v2564_v52, %v2560_v14  ;;  %v2653_v49 = vor.u32 %v2652_v56, %v2651_v23 }
  0xd2   : > { %v2547_v19 = vadd.s32 %v2545_v55, %v2543_v59  ;;  %v2567_v8 = vsel %vm2566_vm15, 1, %v7094_v34  ;;  %v2641_v54 = vand.u32 8388607, %v7099_v31  ;;  %v2654_v9 = vshll.u32 %v7098_v7, %v4263_v6 }
  0xd3   : > { %v2569_v18 = vadd.s32 %v2567_v8, %v2565_v0  ;;  %v7100_v39 = vmov 2131351028   ;;  %v7101_v53 = vmov 2102212464   ;;  %v7102_v61 = vmov 920167782  }
  0xd4   : > { %v2655_v25 = vshrl.u32 %v7100_v39, %v4285_v51  ;;  %v2658_v16 = vshrl.u32 %v7101_v53, %v4285_v51  ;;  %v2548_v26 = vadd.s32 %v2547_v19, %v2537_v3  ;;  %v2657_v36 = vshll.u32 %v7100_v39, %v4263_v6 }
  0xd5   : > { %v2660_v59 = vshll.u32 %v7101_v53, %v4263_v6  ;;  %v2661_v23 = vshrl.u32 %v7102_v61, %v4285_v51  ;;  %524 = vperm.xlu1 %3758, %v4200_v32   ;;  %v2570_v56 = vadd.s32 %v2569_v18, %v2559_v60  ;;  %v2663_v0 = vshll.u32 %v7102_v61, %v4263_v6 }
  0xd6   : > { %v2656_v55 = vor.u32 %v2655_v25, %v2654_v9  ;;  %v7103_v8 = vmov 1326507024   ;;  %3760 = vset.pattern.permute.xlu2 %v7094_v34  ;;  %v4395_v3 = vadd.s32 %v2548_v26, %v2539_v11  ;;  %v4397_v19 = vadd.s32 %v2564_v52, %v2560_v14 }
  0xd7   : > { %v2664_v31 = vshrl.u32 %v7103_v8, %v4285_v51  ;;  %v2659_v41 = vor.u32 %v2658_v16, %v2657_v36  ;;  %v2662_v2 = vor.u32 %v2661_v23, %v2660_v59  ;;  %v4401_v35 = vmul.f32 %v4110_v40, %v4341_v33 }
  0xd8   : > { %v2571_v32 = vadd.s32 %v2570_v56, %v2561_v29  ;;  %v2642_v60 = vor.u32 8388608, %v2641_v54  ;;  %v2572_v6 = vmul.u32 %v4337_v47, %v4360_v28  ;;  %vm2574_vm0 = vc.u32 %v4395_v3, %v4397_v19 }
  0xd9   : > { %v2665_v18 = vor.u32 %v2664_v31, %v2663_v0  ;;  %vm2666_vm1 = vcmp.lt.s32.totalorder %v4280_v24, 1  ;;  %vm2669_vm2 = vcmp.lt.s32.totalorder %v4280_v24, 4  ;;  %vm2668_vm3 = vcmp.lt.s32.totalorder %v4280_v24, 3 }
  0xda   : > { %v2575_v14 = vadd.s32 1, %v2571_v32  ;;  %v2674_v11 = vsel %vm2666_vm1, %v2653_v49, %v2656_v55  ;;  %v2675_v52 = vsel %vm2669_vm2, %v2662_v2, 920167782  ;;  %vm2667_vm4 = vcmp.lt.s32.totalorder %v4280_v24, 2 }
  0xdb   : > { %v2676_v47 = vsel %vm2668_vm3, %v2659_v41, %v2675_v52  ;;  %v2678_v28 = vsel %vm2666_vm1, %v2656_v55, %v2659_v41  ;;  %v2679_v29 = vsel %vm2669_vm2, %v2665_v18, 1326507024  ;;  %v4425_v16 = vshll.u32 %v2642_v60, 8 }
  0xdc   : > { %v2576_v54 = vsel %vm2574_vm0, %v2575_v14, %v2571_v32  ;;  %v2677_v9 = vsel %vm2667_vm4, %v2674_v11, %v2676_v47  ;;  %v2680_v25 = vsel %vm2668_vm3, %v2662_v2, %v2679_v29  ;;  %v4429_v26 = vmul.f32 %v4043_v37, %v4341_v33 }
  0xdd   : > { %v2577_v36 = vadd.s32 %v2576_v54, %v2572_v6  ;;  %v2681_v59 = vsel %vm2667_vm4, %v2678_v28, %v2680_v25  ;;  %v2708_v23 = vshrl.u32 %v2677_v9, 16  ;;  %3762 = vset.pattern.permute.xlu1 %v7094_v34  ;;  %v2683_v56 = vand.u32 65535, %v4425_v16 }
  0xde   : > { %v2684_v0 = vshrl.u32 %v4425_v16, 16  ;;  %v2685_v31 = vand.u32 65535, %v2681_v59  ;;  %v2686_v32 = vshrl.u32 %v2681_v59, 16  ;;  %v7104_v2 = vand.u32 2139095040, %v4306_v4 }
  0xdf   : > { %v2578_v18 = vadd.s32 536870912, %v2577_v36  ;;  %v2671_v6 = vsel %vm2669_vm2, %v2659_v41, 2102212464  ;;  %v2707_v14 = vand.u32 65535, %v2677_v9  ;;  %v7105_v11 = vand.u32 2139095040, %v4308_v5 }
  0xe0   : > { %v4438_v60 = vshrl.u32 %v7104_v2, 23  ;;  %v2650_v47 = vshrl.u32 %v7096_v58, %v4285_v51  ;;  %v2688_v28 = vmul.u32 %v2686_v32, %v2683_v56  ;;  %v2689_v29 = vmul.u32 %v2685_v31, %v2684_v0 }
  0xe1   : > { %v4444_v52 = vshrl.u32 %v7105_v11, 23  ;;  %v7106_v54 = vand.u32 2139095040, %v4312_v62  ;;  %vm2481_vm5 = vcmp.lt.s32.totalorder %v4154_v43, 0  ;;  %v2579_v59 = vshrl.u32 %v2578_v18, 30 }
  0xe2   : > { %v2710_v2 = vmul.u32 %v2708_v23, %v2683_v56  ;;  %v2670_v41 = vsel %vm2666_vm1, %v2650_v47, %v2653_v49  ;;  %v2672_v9 = vsel %vm2668_vm3, %v2656_v55, %v2671_v6  ;;  %v2687_v11 = vmul.u32 %v2685_v31, %v2683_v56 }
  0xe3   : > { %v4450_v25 = vshrl.u32 %v7106_v54, 23  ;;  %v2691_v37 = vshll.u32 %v2688_v28, 16  ;;  %v2580_v40 = vshll.u32 %v2579_v59, 30  ;;  %v2690_v51 = vmul.u32 %v2686_v32, %v2684_v0 }
  0xe4   : > { %v2709_v5 = vmul.u32 %v2707_v14, %v2683_v56  ;;  %v2713_v4 = vshll.u32 %v2710_v2, 16  ;;  %v2693_v10 = vshll.u32 %v2689_v29, 16  ;;  %v2711_v62 = vmul.u32 %v2707_v14, %v2684_v0 }
  0xe5   : > { %vm2695_vm6 = vc.u32 %v2687_v11, %v2691_v37  ;;  %v2697_v54 = vadd.s32 %v2691_v37, %v2687_v11  ;;  %v2581_v20 = vsub.s32 %v2577_v36, %v2580_v40  ;;  %v4459_v18 = vsel %vm2667_vm4, %v2670_v41, %v2672_v9 }
  0xe6   : > { %v2692_v50 = vshrl.u32 %v2688_v28, 16  ;;  %v2696_v49 = vsel %vm2695_vm6, 1, %v7094_v34  ;;  %v2603_v47 = vsub.s32 4, %v2579_v59  ;;  %vm2717_vm8 = vc.u32 %v2709_v5, %v2713_v4 }
  0xe7   : > { %v2698_v55 = vadd.s32 %v2696_v49, %v2690_v51  ;;  %vm2699_vm7 = vc.u32 %v2697_v54, %v2693_v10  ;;  %vm2582_vm9 = vcmp.lt.s32.totalorder %v2581_v20, 0  ;;  %v2583_v31 = vsub.s32 0, %v2581_v20 }
  0xe8   : > { %v2700_v56 = vsel %vm2699_vm7, 1, %v7094_v34  ;;  %v2712_v32 = vmul.u32 %v2708_v23, %v2684_v0  ;;  %v2715_v37 = vshll.u32 %v2711_v62, 16  ;;  %v2718_v40 = vsel %vm2717_vm8, 1, %v7094_v34 }
  0xe9   : > { %v2702_v6 = vadd.s32 %v2700_v56, %v2698_v55  ;;  %v2719_v36 = vadd.s32 %v2713_v4, %v2709_v5  ;;  %v2584_v24 = vsel %vm2582_vm9, %v2583_v31, %v2581_v20  ;;  %v2694_v14 = vshrl.u32 %v2689_v29, 16 }
  0xea   : > { %v2720_v41 = vadd.s32 %v2718_v40, %v2712_v32  ;;  %v7052_v28 = vand.u32 2147483647, %v4162_v13  ;;  %v2585_v9 = vclz %v2584_v24  ;;  %v2604_v10 = vsel %vm2481_vm5, %v2603_v47, %v2579_v59 }
  0xeb   : > { %v2703_v11 = vadd.s32 %v2702_v6, %v2692_v50  ;;  %vm2721_vm10 = vc.u32 %v2719_v36, %v2715_v37  ;;  %v4468_v51 = vadd.s32 4294967169, %v4349_v27  ;;  %v4472_v23 = vmul.f32 %v4045_v38, %v4341_v33 }
  0xec   : > { %v7107_v4 = vand.u32 2147483647, %v4154_v43  ;;  %v2722_v0 = vsel %vm2721_vm10, 1, %v7094_v34  ;;  %v3650_v29 = vadd.s32 4294967294, %v2585_v9  ;;  %v2714_v50 = vshrl.u32 %v2710_v2, 16 }
  0xed   : > { %v4481_v54 = vadd.s32 %v2703_v11, %v2694_v14  ;;  %v2724_v59 = vadd.s32 %v2722_v0, %v2720_v41  ;;  %v2573_v27 = vadd.s32 %v4397_v19, %v4395_v3  ;;  %v2716_v49 = vshrl.u32 %v2711_v62, 16 }
  0xee   : > { %vm4476_vm11 = vcmp.le.f32.partialorder %v7107_v4, 0.7853982  ;;  %v2727_v47 = vmul.u32 %v4425_v16, %v4459_v18  ;;  %vm3651_vm12 = vcmp.lt.s32.totalorder %v3650_v29, 0  ;;  %v2723_v55 = vadd.s32 %v2719_v36, %v2715_v37 }
  0xef   : > { %v2606_v33 = vsel %vm4476_vm11, 0, %v2604_v10  ;;  %v2725_v31 = vadd.s32 %v2724_v59, %v2714_v50  ;;  %v2796_v56 = vand.u32 8388607, %v7052_v28  ;;  %v2588_v32 = vsel %vm3651_vm12, 0, %v3650_v29 }
  0xf0   : > { %v2807_v2 = vshrl.u32 %v7098_v7, %v4290_v44  ;;  %v2809_v3 = vshll.u32 %v7098_v7, %v4265_v30  ;;  %v2810_v19 = vshrl.u32 %v7100_v39, %v4290_v44  ;;  %v2589_v62 = vsub.s32 32, %v2588_v32 }
  0xf1   : > { %v2593_v6 = vsub.s32 4294967266, %v2588_v32  ;;  %v2726_v40 = vadd.s32 %v2725_v31, %v2716_v49  ;;  %vm2729_vm13 = vc.u32 %v4481_v54, %v2723_v55  ;;  %v2590_v16 = vshll.u32 %v2581_v20, %v2588_v32 }
  0xf2   : > { %v2812_v18 = vshll.u32 %v7100_v39, %v4265_v30  ;;  %v2813_v37 = vshrl.u32 %v7101_v53, %v4290_v44  ;;  %v2815_v36 = vshll.u32 %v7101_v53, %v4265_v30  ;;  %v2591_v24 = vshrl.u32 %v2573_v27, %v2589_v62 }
  0xf3   : > { %v2594_v14 = vadd.s32 127, %v2593_v6  ;;  %v2730_v41 = vadd.s32 1, %v2726_v40  ;;  %v2816_v9 = vshrl.u32 %v7102_v61, %v4290_v44  ;;  %v4506_v10 = vor.u32 %v2810_v19, %v2809_v3 }
  0xf4   : > { %v2814_v11 = vor.u32 %v2813_v37, %v2812_v18  ;;  %v2818_v20 = vshll.u32 %v7102_v61, %v4265_v30  ;;  %v2819_v4 = vshrl.u32 %v7103_v8, %v4290_v44  ;;  %v2592_v0 = vor.u32 %v2591_v24, %v2590_v16 }
  0xf5   : > { %v2595_v29 = vshll.u32 %v2594_v14, 23  ;;  %v2731_v50 = vsel %vm2729_vm13, %v2730_v41, %v2726_v40  ;;  %v2817_v59 = vor.u32 %v2816_v9, %v2815_v36  ;;  %v4514_v27 = vadd.f32 %v4356_v1, %v4327_v15 }
  0xf6   : > { %v2732_v49 = vadd.s32 %v2731_v50, %v2727_v47  ;;  %v2806_v31 = vshll.u32 %v7096_v58, %v4265_v30  ;;  %v2820_v32 = vor.u32 %v2819_v4, %v2818_v20  ;;  %v4520_v3 = vadd.f32 %v4401_v35, %v4330_v22 }
  0xf7   : > { %7110 = vst [vmem:[#allocation40_spill] sm:$0xff] %v4514_v27  ;;  %v2596_v19 = vor.u32 4788187, %v2595_v29  ;;  %v2623_v62 = vadd.s32 3, %v2606_v33  ;;  %v2797_v6 = vor.u32 8388608, %v2796_v56  ;;  %vm2821_vm14 = vcmp.lt.s32.totalorder %v4287_v63, 1 }
  0xf8   : > { %7111 = vst [vmem:[#allocation41_spill] sm:$0xff] %v4520_v3  ;;  %v2733_v16 = vadd.s32 536870912, %v2732_v49  ;;  %v2808_v18 = vor.u32 %v2807_v2, %v2806_v31  ;;  %vm2824_vm15 = vcmp.lt.s32.totalorder %v4287_v63, 4  ;;  %v2599_v1 = vcvt.s32.f32 %v2592_v0 }
  0xf9   : > { %v2597_v15 = vand.u32 2147483647, %v2596_v19  ;;  %v2830_v47 = vsel %vm2824_vm15, %v2817_v59, 920167782  ;;  %v2833_v30 = vsel %vm2821_vm14, %v4506_v10, %v2814_v11  ;;  %vm2636_vm0 = vcmp.lt.s32.totalorder %v4160_v48, 0 }
  0xfa   : > { %v2734_v35 = vshrl.u32 %v2733_v16, 30  ;;  %vm2823_vm1 = vcmp.lt.s32.totalorder %v4287_v63, 3  ;;  %v2834_v22 = vsel %vm2824_vm15, %v2820_v32, 1326507024  ;;  %v7112_v56 = vand.u32 2147483647, %v4160_v48 }
  0xfb   : > { %v2600_v33 = vmul.f32 %v2599_v1, %v2597_v15  ;;  %vm2822_vm3 = vcmp.lt.s32.totalorder %v4287_v63, 2  ;;  %v2835_v40 = vsel %vm2823_vm1, %v2817_v59, %v2834_v22  ;;  %v4542_v37 = vshll.u32 %v2797_v6, 8 }
  0xfc   : > { %vm4535_vm2 = vcmp.le.f32.partialorder %v7112_v56, 0.7853982  ;;  %v2735_v36 = vshll.u32 %v2734_v35, 30  ;;  %v2829_v24 = vsel %vm2821_vm14, %v2808_v18, %v4506_v10  ;;  %v2831_v14 = vsel %vm2823_vm1, %v2814_v11, %v2830_v47 }
  0xfd   : > { %v2836_v41 = vsel %vm2822_vm3, %v2833_v30, %v2835_v40  ;;  %v2601_v9 = vxor.u32 2147483648, %v2600_v33  ;;  %v4551_v20 = vand.u32 3, %v2623_v62  ;;  %v2758_v4 = vsub.s32 4, %v2734_v35 }
  0xfe   : > { %v2805_v0 = vshrl.u32 %v7096_v58, %v4290_v44  ;;  %v2728_v29 = vadd.s32 %v2723_v55, %v4481_v54  ;;  %v4556_v50 = vsub.s32 %v2732_v49, %v2735_v36  ;;  %v2840_v59 = vand.u32 65535, %v2836_v41 }
  0xff   : > { %v2841_v31 = vshrl.u32 %v2836_v41, 16  ;;  %v2602_v32 = vsel %vm2481_vm5, %v2601_v9, %v2600_v33  ;;  %v2832_v62 = vsel %vm2822_vm3, %v2829_v24, %v2831_v14  ;;  %v2838_v6 = vand.u32 65535, %v4542_v37 }
 0x100   : > { %v4562_v19 = vsel %vm2821_vm14, %v2805_v0, %v2808_v18  ;;  %v2605_v44 = vsel %vm4476_vm11, %v4154_v43, %v2602_v32  ;;  %vm2737_vm4 = vcmp.lt.s32.totalorder %v4556_v50, 0  ;;  %v2738_v54 = vsub.s32 0, %v4556_v50 }
 0x101   : > { %v2839_v55 = vshrl.u32 %v4542_v37, 16  ;;  %v2607_v49 = vmul.f32 %v2605_v44, %v2605_v44  ;;  %v4575_v16 = vsel %vm2636_vm0, %v2758_v4, %v2734_v35  ;;  %v2826_v18 = vsel %vm2824_vm15, %v2814_v11, 2102212464 }
 0x102   : > { %v2843_v15 = vmul.u32 %v2841_v31, %v2838_v6  ;;  %v2739_v1 = vsel %vm2737_vm4, %v2738_v54, %v4556_v50  ;;  %v2842_v47 = vmul.u32 %v2840_v59, %v2838_v6  ;;  %v2863_v30 = vshrl.u32 %v2832_v62, 16 }
 0x103   : > { %v4580_v5 = vmul.u32 %v2840_v59, %v2839_v55  ;;  %v2608_v22 = vmul.f32 -0.001358992, %v2607_v49  ;;  %v2615_v33 = vmul.f32 -0.00019511016, %v2607_v49  ;;  %v2740_v56 = vclz %v2739_v1 }
 0x104   : > { %v2846_v40 = vshll.u32 %v2843_v15, 16  ;;  %v2761_v36 = vsel %vm4535_vm2, 0, %v4575_v16  ;;  %v2827_v35 = vsel %vm2823_vm1, %v4506_v10, %v2826_v18  ;;  %v2845_v11 = vmul.u32 %v2841_v31, %v2839_v55 }
 0x105   : > { %v2862_v24 = vand.u32 65535, %v2832_v62  ;;  %v2609_v14 = vadd.f32 0.041655596, %v2608_v22  ;;  %v2616_v41 = vadd.f32 0.008332121, %v2615_v33  ;;  %v3653_v9 = vadd.s32 4294967294, %v2740_v56 }
 0x106   : > { %vm2850_vm5 = vc.u32 %v2842_v47, %v2846_v40  ;;  %v2848_v4 = vshll.u32 %v4580_v5, 16  ;;  %v2852_v59 = vadd.s32 %v2846_v40, %v2842_v47  ;;  %v2865_v32 = vmul.u32 %v2863_v30, %v2838_v6 }
 0x107   : > { %v2851_v0 = vsel %vm2850_vm5, 1, %v7094_v34  ;;  %v2610_v54 = vmul.f32 %v2609_v14, %v2607_v49  ;;  %v2617_v1 = vmul.f32 %v2616_v41, %v2607_v49  ;;  %vm3654_vm6 = vcmp.lt.s32.totalorder %v3653_v9, 0 }
 0x108   : > { %v2853_v16 = vadd.s32 %v2851_v0, %v2845_v11  ;;  %v2743_v28 = vsel %vm3654_vm6, 0, %v3653_v9  ;;  %vm2854_vm7 = vc.u32 %v2852_v59, %v2848_v4  ;;  %v2866_v38 = vmul.u32 %v2862_v24, %v2839_v55 }
 0x109   : > { %v2868_v10 = vshll.u32 %v2865_v32, 16  ;;  %v2611_v31 = vadd.f32 -0.4999988, %v2610_v54  ;;  %v2618_v62 = vadd.f32 -0.16666654, %v2617_v1  ;;  %v2744_v18 = vsub.s32 32, %v2743_v28 }
 0x10a   : > { %v2864_v22 = vmul.u32 %v2862_v24, %v2838_v6  ;;  %v2745_v33 = vshll.u32 %v4556_v50, %v2743_v28  ;;  %v2748_v56 = vsub.s32 4294967266, %v2743_v28  ;;  %v2847_v3 = vshrl.u32 %v2843_v15, 16 }
 0x10b   : > { %v2855_v27 = vsel %vm2854_vm7, 1, %v7094_v34  ;;  %v2612_v47 = vmul.f32 %v2611_v31, %v2607_v49  ;;  %v2619_v40 = vmul.f32 %v2618_v62, %v2607_v49  ;;  %vm2625_vm8 = vcmp.lt.s32.totalorder %v4551_v20, 2 }
 0x10c   : > { %v2746_v14 = vshrl.u32 %v2728_v29, %v2744_v18  ;;  %v2857_v11 = vadd.s32 %v2855_v27, %v2853_v16  ;;  %vm2622_vm9 = vweird.f32 %v4154_v43  ;;  %v2749_v41 = vadd.s32 127, %v2748_v56 }
 0x10d   : > { %v2870_v9 = vshll.u32 %v2866_v38, 16  ;;  %vm2872_vm10 = vc.u32 %v2864_v22, %v2868_v10  ;;  %v2874_v4 = vadd.s32 %v2868_v10, %v2864_v22  ;;  %v2613_v0 = vadd.f32 1.0, %v2612_v47 }
 0x10e   : > { %v2620_v6 = vadd.f32 1.0, %v2619_v40  ;;  %v2747_v24 = vor.u32 %v2746_v14, %v2745_v33  ;;  %v2867_v50 = vmul.u32 %v2863_v30, %v2839_v55  ;;  %v2750_v28 = vshll.u32 %v2749_v41, 23 }
 0x10f   : > { %v2858_v15 = vadd.s32 %v2857_v11, %v2847_v3  ;;  %v2873_v59 = vsel %vm2872_vm10, 1, %v7094_v34  ;;  %vm2876_vm11 = vc.u32 %v2874_v4, %v2870_v9  ;;  %vm2626_vm12 = vcmp.eq.s32.totalorder %v4551_v20, 0 }
 0x110   : > { %v2621_v49 = vmul.f32 %v2620_v6, %v2605_v44  ;;  %vm2629_vm13 = vcmp.eq.s32.totalorder %v4551_v20, 2  ;;  %v2630_v27 = vxor.u32 2147483648, %v2613_v0  ;;  %v2751_v29 = vor.u32 4788187, %v2750_v28 }
 0x111   : > { %v2849_v54 = vshrl.u32 %v4580_v5, 16  ;;  %v2875_v1 = vadd.s32 %v2873_v59, %v2867_v50  ;;  %v2877_v16 = vsel %vm2876_vm11, 1, %v7094_v34  ;;  %v2778_v31 = vadd.s32 3, %v2761_v36 }
 0x112   : > { %v2627_v10 = vxor.u32 2147483648, %v2621_v49  ;;  %v2828_v3 = vsel %vm2822_vm3, %v4562_v19, %v2827_v35  ;;  %v2869_v55 = vshrl.u32 %v2865_v32, 16  ;;  %v2752_v30 = vand.u32 2147483647, %v2751_v29 }
 0x113   : > { %v2754_v44 = vcvt.s32.f32 %v2747_v24  ;;  %v4602_v62 = vadd.s32 %v2858_v15, %v2849_v54  ;;  %v2879_v18 = vadd.s32 %v2877_v16, %v2875_v1  ;;  %v2631_v33 = vsel %vm2629_vm13, %v2630_v27, %v2621_v49 }
 0x114   : > { %v2628_v22 = vsel %vm2626_vm12, %v2613_v0, %v2627_v10  ;;  %v2871_v56 = vshrl.u32 %v2866_v38, 16  ;;  %v2944_v5 = vand.u32 2147483647, %v4118_v46  ;;  %v2878_v36 = vadd.s32 %v2874_v4, %v2870_v9 }
 0x115   : > { %v2632_v47 = vsel %vm2625_vm8, %v2628_v22, %v2631_v33  ;;  %v2755_v40 = vmul.f32 %v2754_v44, %v2752_v30  ;;  %v2880_v14 = vadd.s32 %v2879_v18, %v2869_v55  ;;  %v4608_v63 = vadd.s32 4294967169, %v4438_v60 }
 0x116   : > { %v2633_v19 = vsel %vm2622_vm9, nan, %v2632_v47  ;;  %v4612_v35 = vand.u32 3, %v2778_v31  ;;  %v2882_v32 = vmul.u32 %v4542_v37, %v2828_v3  ;;  %vm2884_vm14 = vc.u32 %v4602_v62, %v2878_v36 }
 0x117   : > { %3128 = vmatpush.msra.mxu0 %v2633_v19  ;;  %v2756_v38 = vxor.u32 2147483648, %v2755_v40  ;;  %v2881_v11 = vadd.s32 %v2880_v14, %v2871_v56  ;;  %v2962_v20 = vshrl.u32 %v7098_v7, %v4297_v57  ;;  %v2951_v41 = vand.u32 8388607, %v2944_v5 }
 0x118   : > { %v2965_v60 = vshrl.u32 %v7100_v39, %v4297_v57  ;;  %v2968_v43 = vshrl.u32 %v7101_v53, %v4297_v57  ;;  %v2971_v37 = vshrl.u32 %v7102_v61, %v4297_v57  ;;  %v2964_v0 = vshll.u32 %v7098_v7, %v4272_v21 }
 0x119   : > { %v2757_v9 = vsel %vm2636_vm0, %v2756_v38, %v2755_v40  ;;  %v2885_v4 = vadd.s32 1, %v2881_v11  ;;  %v2970_v6 = vshll.u32 %v7101_v53, %v4272_v21  ;;  %v2967_v50 = vshll.u32 %v7100_v39, %v4272_v21 }
 0x11a   : > { %v4635_v24 = vsel %vm4535_vm2, %v4160_v48, %v2757_v9  ;;  %v2973_v28 = vshll.u32 %v7102_v61, %v4272_v21  ;;  %v2974_v15 = vshrl.u32 %v7103_v8, %v4297_v57  ;;  %v2961_v27 = vshll.u32 %v7096_v58, %v4272_v21 }
 0x11b   : > { %v2762_v59 = vmul.f32 %v4635_v24, %v4635_v24  ;;  %v2886_v49 = vsel %vm2884_vm14, %v2885_v4, %v2881_v11  ;;  %v2972_v29 = vor.u32 %v2971_v37, %v2970_v6  ;;  %v2966_v54 = vor.u32 %v2965_v60, %v2964_v0 }
 0x11c   : > { %v2887_v2 = vadd.s32 %v2886_v49, %v2882_v32  ;;  %v2969_v1 = vor.u32 %v2968_v43, %v2967_v50  ;;  %v2975_v16 = vor.u32 %v2974_v15, %v2973_v28  ;;  %v2952_v3 = vor.u32 8388608, %v2951_v41 }
 0x11d   : > { %v2763_v10 = vmul.f32 -0.001358992, %v2762_v59  ;;  %v2770_v31 = vmul.f32 -0.00019511016, %v2762_v59  ;;  %v2963_v55 = vor.u32 %v2962_v20, %v2961_v27  ;;  %vm2976_vm15 = vcmp.lt.s32.totalorder %v4292_v45, 1 }
 0x11e   : > { %v2888_v30 = vadd.s32 536870912, %v2887_v2  ;;  %vm2977_vm0 = vcmp.lt.s32.totalorder %v4292_v45, 2  ;;  %vm2979_vm1 = vcmp.lt.s32.totalorder %v4292_v45, 4  ;;  %v4652_v44 = vadd.f32 %v4429_v26, %v4203_v42 }
 0x11f   : > { %v2764_v21 = vadd.f32 0.041655596, %v2763_v10  ;;  %v2771_v18 = vadd.f32 0.008332121, %v2770_v31  ;;  %v2985_v22 = vsel %vm2979_vm1, %v2972_v29, 920167782  ;;  %v2988_v56 = vsel %vm2976_vm15, %v2966_v54, %v2969_v1 }
 0x120   : > { %v2889_v33 = vshrl.u32 %v2888_v30, 30  ;;  %vm2978_vm2 = vcmp.lt.s32.totalorder %v4292_v45, 3  ;;  %v2989_v47 = vsel %vm2979_vm1, %v2975_v16, 1326507024  ;;  %vm2791_vm3 = vcmp.lt.s32.totalorder %v4162_v13, 0 }
 0x121   : > { %v2765_v40 = vmul.f32 %v2764_v21, %v2762_v59  ;;  %v2772_v14 = vmul.f32 %v2771_v18, %v2762_v59  ;;  %v2990_v42 = vsel %vm2978_vm2, %v2972_v29, %v2989_v47  ;;  %v4664_v26 = vshll.u32 %v2952_v3, 8 }
 0x122   : > { %v2890_v19 = vshll.u32 %v2889_v33, 30  ;;  %v2984_v32 = vsel %vm2976_vm15, %v2963_v55, %v2966_v54  ;;  %v2986_v38 = vsel %vm2978_vm2, %v2969_v1, %v2985_v22  ;;  %v2991_v11 = vsel %vm2977_vm0, %v2988_v56, %v2990_v42 }
 0x123   : > { %v2766_v20 = vadd.f32 -0.4999988, %v2765_v40  ;;  %v2773_v41 = vadd.f32 -0.16666654, %v2772_v14  ;;  %vm2784_vm4 = vcmp.eq.s32.totalorder %v4612_v35, 2  ;;  %v2883_v60 = vadd.s32 %v2878_v36, %v4602_v62 }
 0x124   : > { %vm2781_vm5 = vcmp.eq.s32.totalorder %v4612_v35, 0  ;;  %v4675_v43 = vsub.s32 %v2887_v2, %v2890_v19  ;;  %v2960_v37 = vshrl.u32 %v7096_v58, %v4297_v57  ;;  %v2995_v9 = vand.u32 65535, %v2991_v11 }
 0x125   : > { %v2996_v4 = vshrl.u32 %v2991_v11, 16  ;;  %v2767_v0 = vmul.f32 %v2766_v20, %v2762_v59  ;;  %v2774_v6 = vmul.f32 %v2773_v41, %v2762_v59  ;;  %vm2780_vm6 = vcmp.lt.s32.totalorder %v4612_v35, 2 }
 0x126   : > { %v2987_v50 = vsel %vm2977_vm0, %v2984_v32, %v2986_v38  ;;  %v2993_v28 = vand.u32 65535, %v4664_v26  ;;  %vm2777_vm7 = vweird.f32 %v4160_v48  ;;  %vm2892_vm8 = vcmp.lt.s32.totalorder %v4675_v43, 0 }
 0x127   : > { %v2893_v62 = vsub.s32 0, %v4675_v43  ;;  %v2913_v36 = vsub.s32 4, %v2889_v33  ;;  %v2994_v57 = vshrl.u32 %v4664_v26, 16  ;;  %v2768_v15 = vadd.f32 1.0, %v2767_v0 }
 0x128   : > { %v2775_v49 = vadd.f32 1.0, %v2774_v6  ;;  %v2981_v59 = vsel %vm2979_vm1, %v2969_v1, 2102212464  ;;  %v2998_v27 = vmul.u32 %v2996_v4, %v2993_v28  ;;  %v3017_v16 = vand.u32 65535, %v2987_v50 }
 0x129   : > { %v2894_v29 = vsel %vm2892_vm8, %v2893_v62, %v4675_v43  ;;  %v2999_v2 = vmul.u32 %v2995_v9, %v2994_v57  ;;  %v3018_v10 = vshrl.u32 %v2987_v50, 16  ;;  %v2785_v3 = vxor.u32 2147483648, %v2768_v15 }
 0x12a   : > { %v2776_v31 = vmul.f32 %v2775_v49, %v4635_v24  ;;  %v2895_v30 = vclz %v2894_v29  ;;  %v3001_v21 = vshll.u32 %v2998_v27, 16  ;;  %v2914_v18 = vsel %vm2791_vm3, %v2913_v36, %v2889_v33 }
 0x12b   : > { %v2980_v22 = vsel %vm2976_vm15, %v2960_v37, %v2963_v55  ;;  %v2982_v1 = vsel %vm2978_vm2, %v2966_v54, %v2981_v59  ;;  %v2997_v56 = vmul.u32 %v2995_v9, %v2993_v28  ;;  %v3000_v42 = vmul.u32 %v2996_v4, %v2994_v57 }
 0x12c   : > { %v2782_v47 = vxor.u32 2147483648, %v2776_v31  ;;  %v2786_v40 = vsel %vm2784_vm4, %v2785_v3, %v2776_v31  ;;  %v3656_v14 = vadd.s32 4294967294, %v2895_v30  ;;  %v3003_v24 = vshll.u32 %v2999_v2, 16 }
 0x12d   : > { %vm3005_vm9 = vc.u32 %v2997_v56, %v3001_v21  ;;  %v3007_v19 = vadd.s32 %v3001_v21, %v2997_v56  ;;  %v3020_v32 = vmul.u32 %v3018_v10, %v2993_v28  ;;  %v3021_v38 = vmul.u32 %v3017_v16, %v2994_v57 }
 0x12e   : > { %v2783_v33 = vsel %vm2781_vm5, %v2768_v15, %v2782_v47  ;;  %vm3657_vm10 = vcmp.lt.s32.totalorder %v3656_v14, 0  ;;  %v3006_v55 = vsel %vm3005_vm9, 1, %v7094_v34  ;;  %v3019_v4 = vmul.u32 %v3017_v16, %v2993_v28 }
 0x12f   : > { %v2787_v54 = vsel %vm2780_vm6, %v2783_v33, %v2786_v40  ;;  %v2898_v11 = vsel %vm3657_vm10, 0, %v3656_v14  ;;  %v3008_v20 = vadd.s32 %v3006_v55, %v3000_v42  ;;  %vm3009_vm11 = vc.u32 %v3007_v19, %v3003_v24 }
 0x130   : > { %v2788_v41 = vsel %vm2777_vm7, nan, %v2787_v54  ;;  %v2899_v37 = vsub.s32 32, %v2898_v11  ;;  %v2903_v9 = vsub.s32 4294967266, %v2898_v11  ;;  %v3002_v0 = vshrl.u32 %v2998_v27, 16 }
 0x131   : > { %3157 = vmatpush.msra.mxu1 %v2788_v41  ;;  %v3004_v6 = vshrl.u32 %v2999_v2, 16  ;;  %v3010_v50 = vsel %vm3009_vm11, 1, %v7094_v34  ;;  %v3023_v62 = vshll.u32 %v3020_v32, 16  ;;  %v2900_v36 = vshll.u32 %v4675_v43, %v2898_v11  ;;  %v7118_v11 = vld [vmem:[#allocation26_spill] sm:$0xff] }
 0x132   : > { %v2901_v15 = vshrl.u32 %v2883_v60, %v2899_v37  ;;  %v2904_v35 = vadd.s32 127, %v2903_v9  ;;  %v3012_v49 = vadd.s32 %v3010_v50, %v3008_v20  ;;  %v3022_v59 = vmul.u32 %v3018_v10, %v2994_v57 }
 0x133   : > { %v3025_v29 = vshll.u32 %v3021_v38, 16  ;;  %vm3027_vm12 = vc.u32 %v3019_v4, %v3023_v62  ;;  %v3029_v31 = vadd.s32 %v3023_v62, %v3019_v4  ;;  %v7115_v27 = vand.u32 2147483647, %v4162_v13 }
 0x134   : > { %v2902_v48 = vor.u32 %v2901_v15, %v2900_v36  ;;  %v2905_v3 = vshll.u32 %v2904_v35, 23  ;;  %v3013_v30 = vadd.s32 %v3012_v49, %v3002_v0  ;;  %v3028_v28 = vsel %vm3027_vm12, 1, %v7094_v34 }
 0x135   : > { %vm4711_vm13 = vcmp.le.f32.partialorder %v7115_v27, 0.7853982  ;;  %v2983_v60 = vsel %vm2977_vm0, %v2980_v22, %v2982_v1  ;;  %v3030_v43 = vadd.s32 %v3028_v28, %v3022_v59  ;;  %vm3031_vm14 = vc.u32 %v3029_v31, %v3025_v29  ;;  %v7119_v28 = vld [vmem:[#allocation25_spill] sm:$0xff]  ;;  %v7120_v27 = vld [vmem:[#allocation24_spill] sm:$0xff] }
 0x136   : > { %v2906_v57 = vor.u32 4788187, %v2905_v3  ;;  %v2916_v16 = vsel %vm4711_vm13, 0, %v2914_v18  ;;  %v4719_v10 = vadd.s32 %v3013_v30, %v3004_v6  ;;  %v3032_v21 = vsel %vm3031_vm14, 1, %v7094_v34 }
 0x137   : > { %v4723_v56 = vadd.s32 4294967169, %v4444_v52  ;;  %v3024_v47 = vshrl.u32 %v3020_v32, 16  ;;  %v3034_v40 = vadd.s32 %v3032_v21, %v3030_v43  ;;  %v1859_v14 = vand.u32 2147483647, %v4131_v12 }
 0x138   : > { %v4727_v45 = vadd.s32 4294967169, %v4450_v25  ;;  %v2907_v22 = vand.u32 2147483647, %v2906_v57  ;;  %v2909_v1 = vcvt.s32.f32 %v2902_v48  ;;  %v4729_v42 = vadd.s32 %v3029_v31, %v3025_v29 }
 0x139   : > { %v2933_v24 = vadd.s32 3, %v2916_v16  ;;  %v3026_v18 = vshrl.u32 %v3021_v38, 16  ;;  %v3035_v19 = vadd.s32 %v3034_v40, %v3024_v47  ;;  %v3037_v33 = vmul.u32 %v4664_v26, %v2983_v60 }
 0x13a   : > { %v2910_v55 = vmul.f32 %v2909_v1, %v2907_v22  ;;  %vm3039_vm15 = vc.u32 %v4719_v10, %v4729_v42  ;;  %v1877_v52 = vshrl.u32 %v7098_v7, %v4252_v17  ;;  %v1880_v25 = vshrl.u32 %v7100_v39, %v4252_v17 }
 0x13b   : > { %v3036_v32 = vadd.s32 %v3035_v19, %v3026_v18  ;;  %v1866_v54 = vand.u32 8388607, %v1859_v14  ;;  %v1876_v38 = vshll.u32 %v7096_v58, %v7118_v11  ;;  %v1883_v26 = vshrl.u32 %v7101_v53, %v4252_v17 }
 0x13c   : > { %v2911_v20 = vxor.u32 2147483648, %v2910_v55  ;;  %v1879_v41 = vshll.u32 %v7098_v7, %v7118_v11  ;;  %v1885_v37 = vshll.u32 %v7101_v53, %v7118_v11  ;;  %v1886_v9 = vshrl.u32 %v7102_v61, %v4252_v17 }
 0x13d   : > { %v3040_v4 = vadd.s32 1, %v3036_v32  ;;  %v1882_v0 = vshll.u32 %v7100_v39, %v7118_v11  ;;  %v1888_v6 = vshll.u32 %v7102_v61, %v7118_v11  ;;  %v1889_v50 = vshrl.u32 %v7103_v8, %v4252_v17 }
 0x13e   : > { %v2912_v62 = vsel %vm2791_vm3, %v2911_v20, %v2910_v55  ;;  %v4758_v36 = vor.u32 %v1877_v52, %v1876_v38  ;;  %v4760_v15 = vor.u32 %v1880_v25, %v1879_v41  ;;  %v1887_v35 = vor.u32 %v1886_v9, %v1885_v37  ;;  %v7121_v55 = vld [vmem:[#allocation40_spill] sm:$0xff] }
 0x13f   : > { %v4765_v49 = vsel %vm4711_vm13, %v4162_v13, %v2912_v62  ;;  %v3041_v59 = vsel %vm3039_vm15, %v3040_v4, %v3036_v32  ;;  %v1884_v29 = vor.u32 %v1883_v26, %v1882_v0  ;;  %v1890_v31 = vor.u32 %v1889_v50, %v1888_v6  ;;  %v7122_v26 = vld [vmem:[#allocation41_spill] sm:$0xff] }
 0x140   : > { %v2917_v48 = vmul.f32 %v4765_v49, %v4765_v49  ;;  %v3042_v3 = vadd.s32 %v3041_v59, %v3037_v33  ;;  %v1867_v30 = vor.u32 8388608, %v1866_v54  ;;  %vm1894_vm0 = vcmp.lt.s32.totalorder %v7119_v28, 4 }
 0x141   : > { %v4775_v60 = vadd.f32 %v4472_v23, %v7120_v27  ;;  %v4777_v2 = vand.u32 3, %v2933_v24  ;;  %vm1891_vm1 = vcmp.lt.s32.totalorder %v7119_v28, 1  ;;  %v1900_v43 = vsel %vm1894_vm0, %v1887_v35, 920167782 }
 0x142   : > { %v2918_v57 = vmul.f32 -0.001358992, %v2917_v48  ;;  %v2925_v16 = vmul.f32 -0.00019511016, %v2917_v48  ;;  %v3043_v21 = vadd.s32 536870912, %v3042_v3  ;;  %vm1893_vm2 = vcmp.lt.s32.totalorder %v7119_v28, 3 }
 0x143   : > { %v1899_v47 = vsel %vm1891_vm1, %v4758_v36, %v4760_v15  ;;  %v1901_v23 = vsel %vm1893_vm2, %v1884_v29, %v1900_v43  ;;  %v1903_v40 = vsel %vm1891_vm1, %v4760_v15, %v1884_v29  ;;  %v1904_v22 = vsel %vm1894_vm0, %v1890_v31, 1326507024 }
 0x144   : > { %v2919_v1 = vadd.f32 0.041655596, %v2918_v57  ;;  %v2926_v24 = vadd.f32 0.008332121, %v2925_v16  ;;  %v4794_v18 = vshrl.u32 %v3043_v21, 30  ;;  %v4796_v19 = vshll.u32 %v1867_v30, 8 }
 0x145   : > { %v4799_v33 = vadd.s32 1, %v4468_v51  ;;  %v1242_v52 = vand.u32 2139095040, %v7121_v55  ;;  %vm1892_vm3 = vcmp.lt.s32.totalorder %v7119_v28, 2  ;;  %v1905_v25 = vsel %vm1893_vm2, %v1887_v35, %v1904_v22 }
 0x146   : > { %v2920_v32 = vmul.f32 %v2919_v1, %v2917_v48  ;;  %v2927_v54 = vmul.f32 %v2926_v24, %v2917_v48  ;;  %v3045_v11 = vshll.u32 %v4794_v18, 30  ;;  %v4808_v38 = vsel %vm1892_vm3, %v1899_v47, %v1901_v23 }
 0x147   : > { %v1397_v20 = vand.u32 2139095040, %v7122_v26  ;;  %v1552_v51 = vand.u32 2139095040, %v4652_v44  ;;  %v1875_v41 = vshrl.u32 %v7096_v58, %v4252_v17  ;;  %v1906_v37 = vsel %vm1892_vm3, %v1903_v40, %v1905_v25 }
 0x148   : > { %v2921_v9 = vadd.f32 -0.4999988, %v2920_v32  ;;  %v2928_v4 = vadd.f32 -0.16666654, %v2927_v54  ;;  %vm2939_vm4 = vcmp.eq.s32.totalorder %v4777_v2, 2  ;;  %v4817_v0 = vsub.s32 %v3042_v3, %v3045_v11 }
 0x149   : > { %v1908_v6 = vand.u32 65535, %v4796_v19  ;;  %vm2936_vm5 = vcmp.eq.s32.totalorder %v4777_v2, 0  ;;  %v1909_v50 = vshrl.u32 %v4796_v19, 16  ;;  %v1910_v62 = vand.u32 65535, %v1906_v37 }
 0x14a   : > { %v1911_v35 = vshrl.u32 %v1906_v37, 16  ;;  %v1933_v59 = vshrl.u32 %v4808_v38, 16  ;;  %v2922_v17 = vmul.f32 %v2921_v9, %v2917_v48  ;;  %v2929_v31 = vmul.f32 %v2928_v4, %v2917_v48 }
 0x14b   : > { %vm2935_vm6 = vcmp.lt.s32.totalorder %v4777_v2, 2  ;;  %vm3047_vm7 = vcmp.lt.s32.totalorder %v4817_v0, 0  ;;  %v3048_v30 = vsub.s32 0, %v4817_v0  ;;  %vm2932_vm8 = vweird.f32 %v4162_v13 }
 0x14c   : > { %vm2946_vm9 = vcmp.lt.s32.totalorder %v4118_v46, 0  ;;  %v3038_v3 = vadd.s32 %v4729_v42, %v4719_v10  ;;  %v1896_v27 = vsel %vm1894_vm0, %v1884_v29, 2102212464  ;;  %v1913_v43 = vmul.u32 %v1911_v35, %v1908_v6 }
 0x14d   : > { %v1932_v57 = vand.u32 65535, %v4808_v38  ;;  %v2923_v48 = vadd.f32 1.0, %v2922_v17  ;;  %v2930_v16 = vadd.f32 1.0, %v2929_v31  ;;  %v3049_v21 = vsel %vm3047_vm7, %v3048_v30, %v4817_v0 }
 0x14e   : > { %v1914_v47 = vmul.u32 %v1910_v62, %v1909_v50  ;;  %v3050_v23 = vclz %v3049_v21  ;;  %v1895_v40 = vsel %vm1891_vm1, %v1875_v41, %v4758_v36  ;;  %v1916_v22 = vshll.u32 %v1913_v43, 16 }
 0x14f   : > { %v1935_v1 = vmul.u32 %v1933_v59, %v1908_v6  ;;  %v2931_v10 = vmul.f32 %v2930_v16, %v4765_v49  ;;  %v2940_v42 = vxor.u32 2147483648, %v2923_v48  ;;  %v1897_v29 = vsel %vm1893_vm2, %v4760_v15, %v1896_v27 }
 0x150   : > { %v1912_v24 = vmul.u32 %v1910_v62, %v1908_v6  ;;  %vm4843_vm10 = vcmp.le.f32.partialorder %v2944_v5, 0.7853982  ;;  %v3659_v32 = vadd.s32 4294967294, %v3050_v23  ;;  %v3068_v54 = vsub.s32 4, %v4794_v18 }
 0x151   : > { %v1915_v36 = vmul.u32 %v1911_v35, %v1909_v50  ;;  %v1936_v11 = vmul.u32 %v1932_v57, %v1909_v50  ;;  %v2937_v38 = vxor.u32 2147483648, %v2931_v10  ;;  %v1918_v41 = vshll.u32 %v1914_v47, 16 }
 0x152   : > { %vm1920_vm11 = vc.u32 %v1912_v24, %v1916_v22  ;;  %v1922_v49 = vadd.s32 %v1916_v22, %v1912_v24  ;;  %v2941_v37 = vsel %vm2939_vm4, %v2940_v42, %v2931_v10  ;;  %vm3660_vm12 = vcmp.lt.s32.totalorder %v3659_v32, 0 }
 0x153   : > { %v1921_v15 = vsel %vm1920_vm11, 1, %v7094_v34  ;;  %v1938_v9 = vshll.u32 %v1935_v1, 16  ;;  %v2938_v5 = vsel %vm2936_vm5, %v2923_v48, %v2937_v38  ;;  %v3053_v4 = vsel %vm3660_vm12, 0, %v3659_v32 }
 0x154   : > { %v1923_v62 = vadd.s32 %v1921_v15, %v1915_v36  ;;  %vm1924_vm13 = vc.u32 %v1922_v49, %v1918_v41  ;;  %v2942_v35 = vsel %vm2935_vm6, %v2938_v5, %v2941_v37  ;;  %v3054_v17 = vsub.s32 32, %v3053_v4 }
 0x155   : > { %v3058_v31 = vsub.s32 4294967266, %v3053_v4  ;;  %v1934_v30 = vmul.u32 %v1932_v57, %v1908_v6  ;;  %v2943_v27 = vsel %vm2932_vm8, nan, %v2942_v35  ;;  %v3069_v16 = vsel %vm2946_vm9, %v3068_v54, %v4794_v18 }
 0x156   : > { %v1917_v21 = vshrl.u32 %v1913_v43, 16  ;;  %v1925_v23 = vsel %vm1924_vm13, 1, %v7094_v34  ;;  %3186 = vmatpush.msra.mxu2 %v2943_v27  ;;  %v3055_v48 = vshll.u32 %v4817_v0, %v3053_v4  ;;  %v3056_v22 = vshrl.u32 %v3038_v3, %v3054_v17 }
 0x157   : > { %v3059_v10 = vadd.s32 127, %v3058_v31  ;;  %v1927_v2 = vadd.s32 %v1925_v23, %v1923_v62  ;;  %v1937_v42 = vmul.u32 %v1933_v59, %v1909_v50  ;;  %v1940_v24 = vshll.u32 %v1936_v11, 16  ;;  %v7125_v59 = vld [vmem:[#allocation23_spill] sm:$0xff] }
 0x158   : > { %vm1942_vm14 = vc.u32 %v1934_v30, %v1938_v9  ;;  %v1944_v6 = vadd.s32 %v1938_v9, %v1934_v30  ;;  %v3057_v57 = vor.u32 %v3056_v22, %v3055_v48  ;;  %v3071_v18 = vsel %vm4843_vm10, 0, %v3069_v16 }
 0x159   : > { %v3060_v13 = vshll.u32 %v3059_v10, 23  ;;  %v1928_v32 = vadd.s32 %v1927_v2, %v1917_v21  ;;  %v1943_v36 = vsel %vm1942_vm14, 1, %v7094_v34  ;;  %v1919_v43 = vshrl.u32 %v1914_v47, 16 }
 0x15a   : > { %v1945_v54 = vadd.s32 %v1943_v36, %v1937_v42  ;;  %vm1946_vm15 = vc.u32 %v1944_v6, %v1940_v24  ;;  %v1898_v0 = vsel %vm1892_vm3, %v1895_v40, %v1897_v29  ;;  %v2014_v3 = vand.u32 2147483647, %v7125_v59 }
 0x15b   : > { %v3061_v38 = vor.u32 4788187, %v3060_v13  ;;  %v1947_v50 = vsel %vm1946_vm15, 1, %v7094_v34  ;;  %v1243_v41 = vshrl.u32 %v1242_v52, 23  ;;  %v4871_v49 = vadd.s32 %v1928_v32, %v1919_v43  ;;  %v7126_v52 = vld [vmem:[#allocation33_spill] sm:$0xff] }
 0x15c   : > { %v1939_v37 = vshrl.u32 %v1935_v1, 16  ;;  %v1949_v15 = vadd.s32 %v1947_v50, %v1945_v54  ;;  %v1398_v47 = vshrl.u32 %v1397_v20, 23  ;;  %v3064_v5 = vcvt.s32.f32 %v3057_v57  ;;  %v7127_v20 = vld [vmem:[#allocation28_spill] sm:$0xff] }
 0x15d   : > { %v3062_v9 = vand.u32 2147483647, %v3061_v38  ;;  %v3088_v4 = vadd.s32 3, %v3071_v18  ;;  %v1941_v62 = vshrl.u32 %v1936_v11, 16  ;;  %v1948_v28 = vadd.s32 %v1944_v6, %v1940_v24 }
 0x15e   : > { %v1950_v40 = vadd.s32 %v1949_v15, %v1939_v37  ;;  %v1952_v29 = vmul.u32 %v4796_v19, %v1898_v0  ;;  %v2021_v17 = vand.u32 8388607, %v2014_v3  ;;  %v2032_v31 = vshrl.u32 %v7098_v7, %v7126_v52  ;;  %v7128_v0 = vld [vmem:[#allocation27_spill] sm:$0xff] }
 0x15f   : > { %v3065_v35 = vmul.f32 %v3064_v5, %v3062_v9  ;;  %v2035_v1 = vshrl.u32 %v7100_v39, %v7126_v52  ;;  %vm1954_vm0 = vc.u32 %v4871_v49, %v1948_v28  ;;  %v2031_v11 = vshll.u32 %v7096_v58, %v7127_v20 }
 0x160   : > { %v1951_v30 = vadd.s32 %v1950_v40, %v1941_v62  ;;  %v2038_v27 = vshrl.u32 %v7101_v53, %v7126_v52  ;;  %v2034_v16 = vshll.u32 %v7098_v7, %v7127_v20  ;;  %v2040_v21 = vshll.u32 %v7101_v53, %v7127_v20 }
 0x161   : > { %v3066_v19 = vxor.u32 2147483648, %v3065_v35  ;;  %v2041_v23 = vshrl.u32 %v7102_v61, %v7126_v52  ;;  %v2037_v22 = vshll.u32 %v7100_v39, %v7127_v20  ;;  %v2043_v10 = vshll.u32 %v7102_v61, %v7127_v20 }
 0x162   : > { %v1955_v48 = vadd.s32 1, %v1951_v30  ;;  %v2044_v2 = vshrl.u32 %v7103_v8, %v7126_v52  ;;  %v4901_v24 = vor.u32 %v2032_v31, %v2031_v11  ;;  %v4903_v6 = vor.u32 %v2035_v1, %v2034_v16 }
 0x163   : > { %v3067_v42 = vsel %vm2946_vm9, %v3066_v19, %v3065_v35  ;;  %v2042_v57 = vor.u32 %v2041_v23, %v2040_v21  ;;  %v2039_v36 = vor.u32 %v2038_v27, %v2037_v22  ;;  %v2022_v38 = vor.u32 8388608, %v2021_v17 }
 0x164   : > { %v4908_v13 = vsel %vm4843_vm10, %v4118_v46, %v3067_v42  ;;  %v1956_v32 = vsel %vm1954_vm0, %v1955_v48, %v1951_v30  ;;  %v2045_v18 = vor.u32 %v2044_v2, %v2043_v10  ;;  %vm2049_vm1 = vcmp.lt.s32.totalorder %v7128_v0, 4 }
 0x165   : > { %v3072_v43 = vmul.f32 %v4908_v13, %v4908_v13  ;;  %v1957_v54 = vadd.s32 %v1956_v32, %v1952_v29  ;;  %v3625_v50 = vadd.s32 4294967169, %v1243_v41  ;;  %v4915_v37 = vand.u32 3, %v3088_v4 }
 0x166   : > { %vm2046_vm2 = vcmp.lt.s32.totalorder %v7128_v0, 1  ;;  %v2055_v25 = vsel %vm2049_vm1, %v2042_v57, 920167782  ;;  %vm2048_vm3 = vcmp.lt.s32.totalorder %v7128_v0, 3  ;;  %v2059_v40 = vsel %vm2049_vm1, %v2045_v18, 1326507024 }
 0x167   : > { %v3073_v15 = vmul.f32 -0.001358992, %v3072_v43  ;;  %v3080_v9 = vmul.f32 -0.00019511016, %v3072_v43  ;;  %v1958_v5 = vadd.s32 536870912, %v1957_v54  ;;  %v2054_v62 = vsel %vm2046_vm2, %v4901_v24, %v4903_v6 }
 0x168   : > { %v2056_v41 = vsel %vm2048_vm3, %v2039_v36, %v2055_v25  ;;  %v2058_v4 = vsel %vm2046_vm2, %v4903_v6, %v2039_v36  ;;  %v4934_v31 = vshll.u32 %v2022_v38, 8  ;;  %v4938_v1 = vshrl.u32 %v1552_v51, 23 }
 0x169   : > { %v3074_v29 = vadd.f32 0.041655596, %v3073_v15  ;;  %v3081_v35 = vadd.f32 0.008332121, %v3080_v9  ;;  %v4932_v17 = vshrl.u32 %v1958_v5, 30  ;;  %v1707_v30 = vand.u32 2139095040, %v4775_v60 }
 0x16a   : > { %vm2047_vm4 = vcmp.lt.s32.totalorder %v7128_v0, 2  ;;  %v2060_v20 = vsel %vm2048_vm3, %v2042_v57, %v2059_v40  ;;  %v4949_v21 = vadd.s32 1, %v3625_v50  ;;  %v4951_v23 = vadd.s32 4294967169, %v1398_v47 }
 0x16b   : > { %v3075_v11 = vmul.f32 %v3074_v29, %v3072_v43  ;;  %v3082_v27 = vmul.f32 %v3081_v35, %v3072_v43  ;;  %v1960_v19 = vshll.u32 %v4932_v17, 30  ;;  %v4947_v16 = vsel %vm2047_vm4, %v2054_v62, %v2056_v41 }
 0x16c   : > { %v1953_v51 = vadd.s32 %v1948_v28, %v4871_v49  ;;  %v2061_v48 = vsel %vm2047_vm4, %v2058_v4, %v2060_v20  ;;  %vm3094_vm5 = vcmp.eq.s32.totalorder %v4915_v37, 2  ;;  %v2063_v42 = vand.u32 65535, %v4934_v31 }
 0x16d   : > { %v3076_v22 = vadd.f32 -0.4999988, %v3075_v11  ;;  %v3083_v10 = vadd.f32 -0.16666654, %v3082_v27  ;;  %v4957_v2 = vsub.s32 %v1957_v54, %v1960_v19  ;;  %vm3091_vm6 = vcmp.eq.s32.totalorder %v4915_v37, 0 }
 0x16e   : > { %v2064_v57 = vshrl.u32 %v4934_v31, 16  ;;  %v2065_v32 = vand.u32 65535, %v2061_v48  ;;  %v2066_v47 = vshrl.u32 %v2061_v48, 16  ;;  %v2088_v18 = vshrl.u32 %v4947_v16, 16 }
 0x16f   : > { %v3077_v49 = vmul.f32 %v3076_v22, %v3072_v43  ;;  %v3084_v28 = vmul.f32 %v3083_v10, %v3072_v43  ;;  %vm3090_vm7 = vcmp.lt.s32.totalorder %v4915_v37, 2  ;;  %vm1962_vm8 = vcmp.lt.s32.totalorder %v4957_v2, 0 }
 0x170   : > { %v1963_v38 = vsub.s32 0, %v4957_v2  ;;  %vm3087_vm9 = vweird.f32 %v4118_v46  ;;  %vm1861_vm10 = vcmp.lt.s32.totalorder %v4131_v12, 0  ;;  %v2030_v54 = vshrl.u32 %v7096_v58, %v7126_v52 }
 0x171   : > { %v2051_v50 = vsel %vm2049_vm1, %v2039_v36, 2102212464  ;;  %v2068_v25 = vmul.u32 %v2066_v47, %v2063_v42  ;;  %v2087_v15 = vand.u32 65535, %v4947_v16  ;;  %v3078_v43 = vadd.f32 1.0, %v3077_v49 }
 0x172   : > { %v3085_v9 = vadd.f32 1.0, %v3084_v28  ;;  %v1964_v5 = vsel %vm1962_vm8, %v1963_v38, %v4957_v2  ;;  %v2069_v62 = vmul.u32 %v2065_v32, %v2064_v57  ;;  %v2050_v4 = vsel %vm2046_vm2, %v2030_v54, %v4901_v24 }
 0x173   : > { %v1965_v41 = vclz %v1964_v5  ;;  %v2071_v40 = vshll.u32 %v2068_v25, 16  ;;  %v2090_v29 = vmul.u32 %v2088_v18, %v2063_v42  ;;  %v3095_v35 = vxor.u32 2147483648, %v3078_v43 }
 0x174   : > { %v3086_v52 = vmul.f32 %v3085_v9, %v4908_v13  ;;  %v2052_v36 = vsel %vm2048_vm3, %v4903_v6, %v2051_v50  ;;  %v2067_v20 = vmul.u32 %v2065_v32, %v2063_v42  ;;  %vm4983_vm11 = vcmp.le.f32.partialorder %v1859_v14, 0.7853982 }
 0x175   : > { %v3638_v27 = vadd.s32 4294967294, %v1965_v41  ;;  %v1983_v19 = vsub.s32 4, %v4932_v17  ;;  %v2070_v24 = vmul.u32 %v2066_v47, %v2064_v57  ;;  %v2091_v16 = vmul.u32 %v2087_v15, %v2064_v57 }
 0x176   : > { %v3092_v48 = vxor.u32 2147483648, %v3086_v52  ;;  %v2073_v22 = vshll.u32 %v2069_v62, 16  ;;  %vm2075_vm12 = vc.u32 %v2067_v20, %v2071_v40  ;;  %v2077_v13 = vadd.s32 %v2071_v40, %v2067_v20 }
 0x177   : > { %v3096_v10 = vsel %vm3094_vm5, %v3095_v35, %v3086_v52  ;;  %vm3639_vm13 = vcmp.lt.s32.totalorder %v3638_v27, 0  ;;  %v2076_v6 = vsel %vm2075_vm12, 1, %v7094_v34  ;;  %v2093_v32 = vshll.u32 %v2090_v29, 16 }
 0x178   : > { %v3093_v14 = vsel %vm3091_vm6, %v3078_v43, %v3092_v48  ;;  %v1968_v49 = vsel %vm3639_vm13, 0, %v3638_v27  ;;  %v2078_v28 = vadd.s32 %v2076_v6, %v2070_v24  ;;  %vm2079_vm14 = vc.u32 %v2077_v13, %v2073_v22 }
 0x179   : > { %v3097_v47 = vsel %vm3090_vm7, %v3093_v14, %v3096_v10  ;;  %v1969_v38 = vsub.s32 32, %v1968_v49  ;;  %v1973_v54 = vsub.s32 4294967266, %v1968_v49  ;;  %v2089_v50 = vmul.u32 %v2087_v15, %v2063_v42 }
 0x17a   : > { %v3098_v9 = vsel %vm3087_vm9, nan, %v3097_v47  ;;  %v1984_v5 = vsel %vm1861_vm10, %v1983_v19, %v4932_v17  ;;  %v2072_v41 = vshrl.u32 %v2068_v25, 16  ;;  %v2080_v40 = vsel %vm2079_vm14, 1, %v7094_v34 }
 0x17b   : > { %3215 = vmatpush.msra.mxu3 %v3098_v9  ;;  %v1970_v43 = vshll.u32 %v4957_v2, %v1968_v49  ;;  %v1971_v52 = vshrl.u32 %v1953_v51, %v1969_v38  ;;  %v1974_v35 = vadd.s32 127, %v1973_v54  ;;  %v2082_v37 = vadd.s32 %v2080_v40, %v2078_v28  ;;  %v7132_v54 = vld [vmem:[#allocation34_spill] sm:$0xff] }
 0x17c   : > { %v2092_v20 = vmul.u32 %v2088_v18, %v2064_v57  ;;  %v2095_v27 = vshll.u32 %v2091_v16, 16  ;;  %vm2097_vm15 = vc.u32 %v2089_v50, %v2093_v32  ;;  %v2099_v42 = vadd.s32 %v2093_v32, %v2089_v50  ;;  %v7131_v57 = vld [vmem:[#allocation17_spill] sm:$0xff] }
 0x17d   : > { %v1972_v15 = vor.u32 %v1971_v52, %v1970_v43  ;;  %v1975_v46 = vshll.u32 %v1974_v35, 23  ;;  %v2083_v24 = vadd.s32 %v2082_v37, %v2072_v41  ;;  %v2098_v48 = vsel %vm2097_vm15, 1, %v7094_v34 }
 0x17e   : > { %v1986_v17 = vsel %vm4983_vm11, 0, %v1984_v5  ;;  %v2074_v25 = vshrl.u32 %v2069_v62, 16  ;;  %v2100_v19 = vadd.s32 %v2098_v48, %v2092_v20  ;;  %vm2101_vm0 = vc.u32 %v2099_v42, %v2095_v27 }
 0x17f   : > { %v1976_v22 = vor.u32 4788187, %v1975_v46  ;;  %v2053_v51 = vsel %vm2047_vm4, %v2050_v4, %v2052_v36  ;;  %v2102_v2 = vsel %vm2101_vm0, 1, %v7094_v34  ;;  %v2169_v18 = vand.u32 2147483647, %v7131_v57 }
 0x180   : > { %v5010_v13 = vadd.s32 1, %v4951_v23  ;;  %v5012_v10 = vadd.s32 %v2083_v24, %v2074_v25  ;;  %v2094_v6 = vshrl.u32 %v2090_v29, 16  ;;  %v2104_v32 = vadd.s32 %v2102_v2, %v2100_v19  ;;  %v7134_v2 = vld [vmem:[#allocation29_spill] sm:$0xff] }
 0x181   : > { %v5015_v14 = vadd.s32 4294967169, %v4938_v1  ;;  %v1977_v62 = vand.u32 2147483647, %v1976_v22  ;;  %v1979_v49 = vcvt.s32.f32 %v1972_v15  ;;  %v2003_v28 = vadd.s32 3, %v1986_v17 }
 0x182   : > { %v2096_v47 = vshrl.u32 %v2091_v16, 16  ;;  %v5017_v0 = vadd.s32 %v2099_v42, %v2095_v27  ;;  %v2105_v4 = vadd.s32 %v2104_v32, %v2094_v6  ;;  %v2107_v36 = vmul.u32 %v4934_v31, %v2053_v51  ;;  %v7133_v16 = vld [vmem:[#allocation30_spill] sm:$0xff] }
 0x183   : > { %v1980_v38 = vmul.f32 %v1979_v49, %v1977_v62  ;;  %v2176_v23 = vand.u32 8388607, %v2169_v18  ;;  %v2190_v29 = vshrl.u32 %v7100_v39, %v7132_v54  ;;  %v2193_v1 = vshrl.u32 %v7101_v53, %v7132_v54 }
 0x184   : > { %v2106_v50 = vadd.s32 %v2105_v4, %v2096_v47  ;;  %vm2109_vm1 = vc.u32 %v5012_v10, %v5017_v0  ;;  %v2195_v9 = vshll.u32 %v7101_v53, %v7133_v16  ;;  %v2196_v31 = vshrl.u32 %v7102_v61, %v7132_v54 }
 0x185   : > { %v1981_v5 = vxor.u32 2147483648, %v1980_v38  ;;  %v2187_v41 = vshrl.u32 %v7098_v7, %v7132_v54  ;;  %v2189_v40 = vshll.u32 %v7098_v7, %v7133_v16  ;;  %v2192_v43 = vshll.u32 %v7100_v39, %v7133_v16 }
 0x186   : > { %v2110_v52 = vadd.s32 1, %v2106_v50  ;;  %v2197_v35 = vor.u32 %v2196_v31, %v2195_v9  ;;  %v2198_v37 = vshll.u32 %v7102_v61, %v7133_v16  ;;  %v2199_v20 = vshrl.u32 %v7103_v8, %v7132_v54 }
 0x187   : > { %v1982_v27 = vsel %vm1861_vm10, %v1981_v5, %v1980_v38  ;;  %v2186_v42 = vshll.u32 %v7096_v58, %v7133_v16  ;;  %v5046_v15 = vor.u32 %v2190_v29, %v2189_v40  ;;  %v5048_v46 = vor.u32 %v2193_v1, %v2192_v43 }
 0x188   : > { %v5053_v24 = vsel %vm4983_vm11, %v4131_v12, %v1982_v27  ;;  %v2111_v48 = vsel %vm2109_vm1, %v2110_v52, %v2106_v50  ;;  %v2177_v17 = vor.u32 8388608, %v2176_v23  ;;  %v2200_v25 = vor.u32 %v2199_v20, %v2198_v37 }
 0x189   : > { %v1987_v19 = vmul.f32 %v5053_v24, %v5053_v24  ;;  %v2112_v22 = vadd.s32 %v2111_v48, %v2107_v36  ;;  %v5060_v51 = vor.u32 %v2187_v41, %v2186_v42  ;;  %vm2204_vm2 = vcmp.lt.s32.totalorder %v7134_v2, 4 }
 0x18a   : > { %vm2201_vm3 = vcmp.lt.s32.totalorder %v7134_v2, 1  ;;  %vm2203_vm4 = vcmp.lt.s32.totalorder %v7134_v2, 3  ;;  %v2210_v11 = vsel %vm2204_vm2, %v2197_v35, 920167782  ;;  %v2214_v6 = vsel %vm2204_vm2, %v2200_v25, 1326507024 }
 0x18b   : > { %v1988_v32 = vmul.f32 -0.001358992, %v1987_v19  ;;  %v1995_v62 = vmul.f32 -0.00019511016, %v1987_v19  ;;  %v2113_v49 = vadd.s32 536870912, %v2112_v22  ;;  %v2213_v47 = vsel %vm2201_vm3, %v5046_v15, %v5048_v46 }
 0x18c   : > { %vm1250_vm5 = vcmp.gt.s32.totalorder %v4949_v21, 0  ;;  %v5076_v4 = vshrl.u32 %v1707_v30, 23  ;;  %v2215_v36 = vsel %vm2203_vm4, %v2197_v35, %v2214_v6  ;;  %v5080_v38 = vshll.u32 %v2177_v17, 8 }
 0x18d   : > { %v1989_v23 = vadd.f32 0.041655596, %v1988_v32  ;;  %v1996_v29 = vadd.f32 0.008332121, %v1995_v62  ;;  %v5082_v1 = vshrl.u32 %v2113_v49, 30  ;;  %vm2202_vm6 = vcmp.lt.s32.totalorder %v7134_v2, 2 }
 0x18e   : > { %v5085_v50 = vand.u32 3, %v2003_v28  ;;  %v2209_v16 = vsel %vm2201_vm3, %v5060_v51, %v5046_v15  ;;  %v2211_v30 = vsel %vm2203_vm4, %v5048_v46, %v2210_v11  ;;  %v2216_v9 = vsel %vm2202_vm6, %v2213_v47, %v2215_v36 }
 0x18f   : > { %v5097_v31 = vsel %vm1250_vm5, %v4949_v21, 0  ;;  %v1990_v5 = vmul.f32 %v1989_v23, %v1987_v19  ;;  %v1997_v41 = vmul.f32 %v1996_v29, %v1987_v19  ;;  %v2115_v28 = vshll.u32 %v5082_v1, 30 }
 0x190   : > { %v2218_v40 = vand.u32 65535, %v5080_v38  ;;  %v5102_v43 = vshrl.u32 %v5080_v38, 16  ;;  %v2220_v52 = vand.u32 65535, %v2216_v9  ;;  %v2221_v35 = vshrl.u32 %v2216_v9, 16 }
 0x191   : > { %v1991_v37 = vadd.f32 -0.4999988, %v1990_v5  ;;  %v1998_v20 = vadd.f32 -0.16666654, %v1997_v41  ;;  %v5104_v27 = vsub.s32 %v2112_v22, %v2115_v28  ;;  %v2212_v42 = vsel %vm2202_vm6, %v2209_v16, %v2211_v30 }
 0x192   : > { %vm2006_vm7 = vcmp.eq.s32.totalorder %v5085_v50, 0  ;;  %vm2009_vm8 = vcmp.eq.s32.totalorder %v5085_v50, 2  ;;  %v2185_v21 = vshrl.u32 %v7096_v58, %v7132_v54  ;;  %v2223_v48 = vmul.u32 %v2221_v35, %v2218_v40 }
 0x193   : > { %v5113_v17 = vmul.u32 %v2220_v52, %v5102_v43  ;;  %v1992_v25 = vmul.f32 %v1991_v37, %v1987_v19  ;;  %v1999_v11 = vmul.f32 %v1998_v20, %v1987_v19  ;;  %vm2005_vm9 = vcmp.lt.s32.totalorder %v5085_v50, 2 }
 0x194   : > { %vm2117_vm10 = vcmp.lt.s32.totalorder %v5104_v27, 0  ;;  %v2118_v22 = vsub.s32 0, %v5104_v27  ;;  %vm2002_vm11 = vweird.f32 %v4131_v12  ;;  %vm2016_vm12 = vcmp.lt.s32.totalorder %v7125_v59, 0 }
 0x195   : > { %v2108_v6 = vadd.s32 %v5017_v0, %v5012_v10  ;;  %v2222_v54 = vmul.u32 %v2220_v52, %v2218_v40  ;;  %v2226_v32 = vshll.u32 %v2223_v48, 16  ;;  %v2242_v62 = vand.u32 65535, %v2212_v42 }
 0x196   : > { %v1993_v49 = vadd.f32 1.0, %v1992_v25  ;;  %v2000_v47 = vadd.f32 1.0, %v1999_v11  ;;  %v2119_v19 = vsel %vm2117_vm10, %v2118_v22, %v5104_v27  ;;  %v2243_v36 = vshrl.u32 %v2212_v42, 16 }
 0x197   : > { %v2120_v23 = vclz %v2119_v19  ;;  %v2225_v29 = vmul.u32 %v2221_v35, %v5102_v43  ;;  %v2228_v16 = vshll.u32 %v5113_v17, 16  ;;  %vm2230_vm13 = vc.u32 %v2222_v54, %v2226_v32 }
 0x198   : > { %v2001_v30 = vmul.f32 %v2000_v47, %v5053_v24  ;;  %v2010_v9 = vxor.u32 2147483648, %v1993_v49  ;;  %v2231_v5 = vsel %vm2230_vm13, 1, %v7094_v34  ;;  %v2232_v10 = vadd.s32 %v2226_v32, %v2222_v54 }
 0x199   : > { %vm5129_vm14 = vcmp.le.f32.partialorder %v2014_v3, 0.7853982  ;;  %v3641_v41 = vadd.s32 4294967294, %v2120_v23  ;;  %v2138_v28 = vsub.s32 4, %v5082_v1  ;;  %v2205_v52 = vsel %vm2201_vm3, %v2185_v21, %v5060_v51 }
 0x19a   : > { %v2206_v24 = vsel %vm2204_vm2, %v5048_v46, 2102212464  ;;  %v2007_v35 = vxor.u32 2147483648, %v2001_v30  ;;  %v2227_v37 = vshrl.u32 %v2223_v48, 16  ;;  %v2233_v20 = vadd.s32 %v2231_v5, %v2225_v29 }
 0x19b   : > { %vm2234_vm15 = vc.u32 %v2232_v10, %v2228_v16  ;;  %v2011_v3 = vsel %vm2009_vm8, %v2010_v9, %v2001_v30  ;;  %vm3642_vm0 = vcmp.lt.s32.totalorder %v3641_v41, 0  ;;  %v2245_v25 = vmul.u32 %v2243_v36, %v2218_v40 }
 0x19c   : > { %v2235_v42 = vsel %vm2234_vm15, 1, %v7094_v34  ;;  %v2008_v11 = vsel %vm2006_vm7, %v1993_v49, %v2007_v35  ;;  %v2123_v22 = vsel %vm3642_vm0, 0, %v3641_v41  ;;  %v2246_v21 = vmul.u32 %v2242_v62, %v5102_v43 }
 0x19d   : > { %v2237_v51 = vadd.s32 %v2235_v42, %v2233_v20  ;;  %v2012_v46 = vsel %vm2005_vm9, %v2008_v11, %v2011_v3  ;;  %v2124_v48 = vsub.s32 32, %v2123_v22  ;;  %v2128_v54 = vsub.s32 4294967266, %v2123_v22 }
 0x19e   : > { %v2244_v32 = vmul.u32 %v2242_v62, %v2218_v40  ;;  %v2013_v47 = vsel %vm2002_vm11, nan, %v2012_v46  ;;  %v2139_v19 = vsel %vm2016_vm12, %v2138_v28, %v5082_v1  ;;  %v2248_v29 = vshll.u32 %v2245_v25, 16  ;;  %v7137_v28 = vld [vmem:[#allocation18_spill] sm:$0xff]  ;;  %v7138_v46 = vld [vmem:[#allocation35_spill] sm:$0xff] }
 0x19f   : > { %v2238_v23 = vadd.s32 %v2237_v51, %v2227_v37  ;;  %3129 = vmatpush.msra.mxu0 %v2013_v47  ;;  %v2125_v49 = vshll.u32 %v5104_v27, %v2123_v22  ;;  %v2126_v16 = vshrl.u32 %v2108_v6, %v2124_v48  ;;  %v2129_v30 = vadd.s32 127, %v2128_v54 }
 0x1a0   : > { %v2229_v50 = vshrl.u32 %v5113_v17, 16  ;;  %v2247_v9 = vmul.u32 %v2243_v36, %v5102_v43  ;;  %v2250_v5 = vshll.u32 %v2246_v21, 16  ;;  %vm2252_vm1 = vc.u32 %v2244_v32, %v2248_v29 }
 0x1a1   : > { %v2254_v40 = vadd.s32 %v2248_v29, %v2244_v32  ;;  %v2127_v12 = vor.u32 %v2126_v16, %v2125_v49  ;;  %v2130_v62 = vshll.u32 %v2129_v30, 23  ;;  %v2207_v1 = vsel %vm2203_vm4, %v5046_v15, %v2206_v24 }
 0x1a2   : > { %v2253_v10 = vsel %vm2252_vm1, 1, %v7094_v34  ;;  %v2141_v27 = vsel %vm5129_vm14, 0, %v2139_v19  ;;  %v5162_v6 = vadd.s32 %v2238_v23, %v2229_v50  ;;  %v5165_v43 = vadd.s32 1, %v5015_v14 }
 0x1a3   : > { %v2255_v41 = vadd.s32 %v2253_v10, %v2247_v9  ;;  %vm2256_vm2 = vc.u32 %v2254_v40, %v2250_v5  ;;  %v2131_v17 = vor.u32 4788187, %v2130_v62  ;;  %v2324_v35 = vand.u32 2147483647, %v7137_v28 }
 0x1a4   : > { %v2257_v36 = vsel %vm2256_vm2, 1, %v7094_v34  ;;  %v5170_v37 = vand.u32 31, %v5097_v31  ;;  %v2249_v15 = vshrl.u32 %v2245_v25, 16  ;;  %v5172_v24 = vadd.s32 %v2254_v40, %v2250_v5 }
 0x1a5   : > { %v2259_v20 = vadd.s32 %v2257_v36, %v2255_v41  ;;  %v2132_v3 = vand.u32 2147483647, %v2131_v17  ;;  %v2134_v42 = vcvt.s32.f32 %v2127_v12  ;;  %v2158_v11 = vadd.s32 3, %v2141_v27 }
 0x1a6   : > { %v2208_v22 = vsel %vm2202_vm6, %v2205_v52, %v2207_v1  ;;  %v2251_v14 = vshrl.u32 %v2246_v21, 16  ;;  %vm2264_vm3 = vc.u32 %v5162_v6, %v5172_v24  ;;  %v2345_v48 = vshrl.u32 %v7100_v39, %v7138_v46  ;;  %v7139_v52 = vld [vmem:[#allocation31_spill] sm:$0xff] }
 0x1a7   : > { %v2260_v51 = vadd.s32 %v2259_v20, %v2249_v15  ;;  %v2135_v54 = vmul.f32 %v2134_v42, %v2132_v3  ;;  %v2331_v25 = vand.u32 8388607, %v2324_v35  ;;  %v2342_v32 = vshrl.u32 %v7098_v7, %v7138_v46  ;;  %v7140_v3 = vld [vmem:[#allocation32_spill] sm:$0xff] }
 0x1a8   : > { %v2348_v47 = vshrl.u32 %v7101_v53, %v7138_v46  ;;  %v2344_v21 = vshll.u32 %v7098_v7, %v7139_v52  ;;  %v2347_v19 = vshll.u32 %v7100_v39, %v7139_v52  ;;  %v2351_v23 = vshrl.u32 %v7102_v61, %v7138_v46 }
 0x1a9   : > { %v2261_v2 = vadd.s32 %v2260_v51, %v2251_v14  ;;  %vm1405_vm4 = vcmp.gt.s32.totalorder %v5010_v13, 0  ;;  %v2136_v29 = vxor.u32 2147483648, %v2135_v54  ;;  %v2341_v49 = vshll.u32 %v7096_v58, %v7139_v52 }
 0x1aa   : > { %v2353_v16 = vshll.u32 %v7102_v61, %v7139_v52  ;;  %v2354_v30 = vshrl.u32 %v7103_v8, %v7138_v46  ;;  %v5199_v9 = vor.u32 %v2345_v48, %v2344_v21  ;;  %v5201_v5 = vor.u32 %v2348_v47, %v2347_v19 }
 0x1ab   : > { %v2265_v50 = vadd.s32 1, %v2261_v2  ;;  %v2350_v40 = vshll.u32 %v7101_v53, %v7139_v52  ;;  %v2137_v12 = vsel %vm2016_vm12, %v2136_v29, %v2135_v54  ;;  %v2262_v62 = vmul.u32 %v5080_v38, %v2208_v22 }
 0x1ac   : > { %v2332_v1 = vor.u32 8388608, %v2331_v25  ;;  %v2355_v10 = vor.u32 %v2354_v30, %v2353_v16  ;;  %v5211_v27 = vsel %vm5129_vm14, %v7125_v59, %v2137_v12  ;;  %v5216_v17 = vor.u32 %v2342_v32, %v2341_v49 }
 0x1ad   : > { %v2266_v41 = vsel %vm2264_vm3, %v2265_v50, %v2261_v2  ;;  %v2352_v36 = vor.u32 %v2351_v23, %v2350_v40  ;;  %v2142_v15 = vmul.f32 %v5211_v27, %v5211_v27  ;;  %vm2356_vm5 = vcmp.lt.s32.totalorder %v7140_v3, 1 }
 0x1ae   : > { %v2267_v20 = vadd.s32 %v2266_v41, %v2262_v62  ;;  %vm2359_vm6 = vcmp.lt.s32.totalorder %v7140_v3, 4  ;;  %v5222_v38 = vand.u32 3, %v2158_v11  ;;  %vm2357_vm7 = vcmp.lt.s32.totalorder %v7140_v3, 2 }
 0x1af   : > { %v2368_v0 = vsel %vm2356_vm5, %v5199_v9, %v5201_v5  ;;  %v2369_v42 = vsel %vm2359_vm6, %v2355_v10, 1326507024  ;;  %v2143_v22 = vmul.f32 -0.001358992, %v2142_v15  ;;  %v2150_v14 = vmul.f32 -0.00019511016, %v2142_v15 }
 0x1b0   : > { %v2268_v51 = vadd.s32 536870912, %v2267_v20  ;;  %vm2358_vm8 = vcmp.lt.s32.totalorder %v7140_v3, 3  ;;  %v2364_v11 = vsel %vm2356_vm5, %v5216_v17, %v5199_v9  ;;  %v2365_v48 = vsel %vm2359_vm6, %v2352_v36, 920167782 }
 0x1b1   : > { %v2370_v54 = vsel %vm2358_vm8, %v2352_v36, %v2369_v42  ;;  %v5240_v25 = vshll.u32 %v2332_v1, 8  ;;  %v2144_v32 = vadd.f32 0.041655596, %v2143_v22  ;;  %v2151_v47 = vadd.f32 0.008332121, %v2150_v14 }
 0x1b2   : > { %v5242_v2 = vshrl.u32 %v2268_v51, 30  ;;  %v2371_v52 = vsel %vm2357_vm7, %v2368_v0, %v2370_v54  ;;  %v2366_v50 = vsel %vm2358_vm8, %v5201_v5, %v2365_v48  ;;  %v5259_v40 = vsel %vm1405_vm4, %v5010_v13, 0 }
 0x1b3   : > { %v5247_v21 = vand.u32 65535, %v5240_v25  ;;  %v5250_v19 = vshrl.u32 %v5240_v25, 16  ;;  %v2375_v23 = vand.u32 65535, %v2371_v52  ;;  %v2376_v29 = vshrl.u32 %v2371_v52, 16 }
 0x1b4   : > { %v2145_v49 = vmul.f32 %v2144_v32, %v2142_v15  ;;  %v2152_v16 = vmul.f32 %v2151_v47, %v2142_v15  ;;  %v2270_v30 = vshll.u32 %v5242_v2, 30  ;;  %v5262_v12 = vadd.s32 4294967169, %v5076_v4 }
 0x1b5   : > { %v2378_v62 = vmul.u32 %v2376_v29, %v5247_v21  ;;  %v5266_v1 = vmul.u32 %v2375_v23, %v5250_v19  ;;  %v5269_v10 = vsub.s32 32, %v5170_v37  ;;  %vm2161_vm9 = vcmp.eq.s32.totalorder %v5222_v38, 0 }
 0x1b6   : > { %v2146_v41 = vadd.f32 -0.4999988, %v2145_v49  ;;  %v2153_v36 = vadd.f32 -0.16666654, %v2152_v16  ;;  %v5271_v0 = vsub.s32 %v2267_v20, %v2270_v30  ;;  %v2340_v13 = vshrl.u32 %v7096_v58, %v7138_v46 }
 0x1b7   : > { %v2367_v4 = vsel %vm2357_vm7, %v2364_v11, %v2366_v50  ;;  %v2377_v42 = vmul.u32 %v2375_v23, %v5247_v21  ;;  %v2381_v22 = vshll.u32 %v2378_v62, 16  ;;  %vm2160_vm10 = vcmp.lt.s32.totalorder %v5222_v38, 2 }
 0x1b8   : > { %v2147_v14 = vmul.f32 %v2146_v41, %v2142_v15  ;;  %v2154_v51 = vmul.f32 %v2153_v36, %v2142_v15  ;;  %vm2171_vm11 = vcmp.lt.s32.totalorder %v7131_v57, 0  ;;  %vm2272_vm12 = vcmp.lt.s32.totalorder %v5271_v0, 0 }
 0x1b9   : > { %v2273_v20 = vsub.s32 0, %v5271_v0  ;;  %vm2157_vm13 = vweird.f32 %v7125_v59  ;;  %v2380_v46 = vmul.u32 %v2376_v29, %v5250_v19  ;;  %v2383_v48 = vshll.u32 %v5266_v1, 16 }
 0x1ba   : > { %vm2385_vm14 = vc.u32 %v2377_v42, %v2381_v22  ;;  %v2387_v11 = vadd.s32 %v2381_v22, %v2377_v42  ;;  %v2148_v54 = vadd.f32 1.0, %v2147_v14  ;;  %v2155_v32 = vadd.f32 1.0, %v2154_v51 }
 0x1bb   : > { %v2274_v15 = vsel %vm2272_vm12, %v2273_v20, %v5271_v0  ;;  %v2386_v47 = vsel %vm2385_vm14, 1, %v7094_v34  ;;  %v2361_v23 = vsel %vm2359_vm6, %v5201_v5, 2102212464  ;;  %vm5294_vm0 = vcmp.le.f32.partialorder %v2169_v18, 0.7853982 }
 0x1bc   : > { %v2275_v52 = vclz %v2274_v15  ;;  %v2388_v49 = vadd.s32 %v2386_v47, %v2380_v46  ;;  %vm2389_vm15 = vc.u32 %v2387_v11, %v2383_v48  ;;  %v2156_v16 = vmul.f32 %v2155_v32, %v5211_v27 }
 0x1bd   : > { %v2165_v29 = vxor.u32 2147483648, %v2148_v54  ;;  %v2390_v50 = vsel %vm2389_vm15, 1, %v7094_v34  ;;  %v2397_v41 = vand.u32 65535, %v2367_v4  ;;  %vm2164_vm1 = vcmp.eq.s32.totalorder %v5222_v38, 2 }
 0x1be   : > { %v2263_v36 = vadd.s32 %v5172_v24, %v5162_v6  ;;  %v3644_v5 = vadd.s32 4294967294, %v2275_v52  ;;  %v2293_v42 = vsub.s32 4, %v5242_v2  ;;  %v2162_v22 = vxor.u32 2147483648, %v2156_v16 }
 0x1bf   : > { %v2360_v27 = vsel %vm2356_vm5, %v2340_v13, %v5216_v17  ;;  %v2392_v18 = vadd.s32 %v2390_v50, %v2388_v49  ;;  %v2398_v14 = vshrl.u32 %v2367_v4, 16  ;;  %v2166_v51 = vsel %vm2164_vm1, %v2165_v29, %v2156_v16 }
 0x1c0   : > { %vm3645_vm2 = vcmp.lt.s32.totalorder %v3644_v5, 0  ;;  %v2362_v20 = vsel %vm2358_vm8, %v5199_v9, %v2361_v23  ;;  %v2382_v46 = vshrl.u32 %v2378_v62, 16  ;;  %v2163_v6 = vsel %vm2161_vm9, %v2148_v54, %v2162_v22 }
 0x1c1   : > { %v2278_v24 = vsel %vm3645_vm2, 0, %v3644_v5  ;;  %v2400_v48 = vmul.u32 %v2398_v14, %v5247_v21  ;;  %v2401_v11 = vmul.u32 %v2397_v41, %v5250_v19  ;;  %v2167_v17 = vsel %vm2160_vm10, %v2163_v6, %v2166_v51 }
 0x1c2   : > { %v2279_v13 = vsub.s32 32, %v2278_v24  ;;  %v2283_v4 = vsub.s32 4294967266, %v2278_v24  ;;  %v2294_v32 = vsel %vm2171_vm11, %v2293_v42, %v5242_v2  ;;  %v2168_v9 = vsel %vm2157_vm13, nan, %v2167_v17 }
 0x1c3   : > { %v2393_v62 = vadd.s32 %v2392_v18, %v2382_v46  ;;  %v2399_v54 = vmul.u32 %v2397_v41, %v5247_v21  ;;  %v2403_v15 = vshll.u32 %v2400_v48, 16  ;;  %3158 = vmatpush.msra.mxu1 %v2168_v9  ;;  %v2280_v47 = vshll.u32 %v5271_v0, %v2278_v24 }
 0x1c4   : > { %v2281_v52 = vshrl.u32 %v2263_v36, %v2279_v13  ;;  %v2284_v23 = vadd.s32 127, %v2283_v4  ;;  %v2384_v38 = vshrl.u32 %v5266_v1, 16  ;;  %v2402_v49 = vmul.u32 %v2398_v14, %v5250_v19 }
 0x1c5   : > { %v2405_v16 = vshll.u32 %v2401_v11, 16  ;;  %vm2407_vm3 = vc.u32 %v2399_v54, %v2403_v15  ;;  %v2409_v29 = vadd.s32 %v2403_v15, %v2399_v54  ;;  %v2296_v59 = vsel %vm5294_vm0, 0, %v2294_v32 }
 0x1c6   : > { %v2282_v2 = vor.u32 %v2281_v52, %v2280_v47  ;;  %v2285_v50 = vshll.u32 %v2284_v23, 23  ;;  %v2408_v21 = vsel %vm2407_vm3, 1, %v7094_v34  ;;  %v5327_v41 = vadd.s32 %v2393_v62, %v2384_v38 }
 0x1c7   : > { %v2410_v5 = vadd.s32 %v2408_v21, %v2402_v49  ;;  %vm2411_vm4 = vc.u32 %v2409_v29, %v2405_v16  ;;  %v1239_v0 = vand.u32 2147483647, %v7121_v55  ;;  %v5331_v1 = vshrl.u32 %v5097_v31, 5 }
 0x1c8   : > { %v5334_v19 = vshrl.u32 %v5259_v40, 5  ;;  %v2286_v36 = vor.u32 4788187, %v2285_v50  ;;  %v2412_v42 = vsel %vm2411_vm4, 1, %v7094_v34  ;;  %v2363_v22 = vsel %vm2357_vm7, %v2360_v27, %v2362_v20 }
 0x1c9   : > { %v2404_v18 = vshrl.u32 %v2400_v48, 16  ;;  %v5339_v14 = vadd.s32 %v2409_v29, %v2405_v16  ;;  %v2414_v51 = vadd.s32 %v2412_v42, %v2410_v5  ;;  %v2289_v6 = vcvt.s32.f32 %v2282_v2 }
 0x1ca   : > { %v2287_v46 = vand.u32 2147483647, %v2286_v36  ;;  %v2313_v24 = vadd.s32 3, %v2296_v59  ;;  %v2406_v17 = vshrl.u32 %v2401_v11, 16  ;;  %v1246_v31 = vand.u32 8388607, %v1239_v0 }
 0x1cb   : > { %v2415_v13 = vadd.s32 %v2414_v51, %v2404_v18  ;;  %vm2419_vm5 = vc.u32 %v5327_v41, %v5339_v14  ;;  %v1260_v4 = vshrl.u32 %v7100_v39, %v5269_v10  ;;  %v1257_v27 = vshrl.u32 %v7098_v7, %v5269_v10 }
 0x1cc   : > { %v2290_v3 = vmul.f32 %v2289_v6, %v2287_v46  ;;  %v1259_v20 = vshll.u32 %v7098_v7, %v5170_v37  ;;  %v1263_v48 = vshrl.u32 %v7101_v53, %v5269_v10  ;;  %v1262_v32 = vshll.u32 %v7100_v39, %v5170_v37 }
 0x1cd   : > { %v2416_v11 = vadd.s32 %v2415_v13, %v2406_v17  ;;  %v1265_v9 = vshll.u32 %v7101_v53, %v5170_v37  ;;  %v1266_v62 = vshrl.u32 %v7102_v61, %v5269_v10  ;;  %v1256_v15 = vshll.u32 %v7096_v58, %v5170_v37 }
 0x1ce   : > { %v2291_v54 = vxor.u32 2147483648, %v2290_v3  ;;  %v1268_v47 = vshll.u32 %v7102_v61, %v5170_v37  ;;  %v1269_v52 = vshrl.u32 %v7103_v8, %v5269_v10  ;;  %v5365_v38 = vor.u32 %v1260_v4, %v1259_v20 }
 0x1cf   : > { %v2420_v23 = vadd.s32 1, %v2416_v11  ;;  %v5367_v49 = vor.u32 %v1263_v48, %v1262_v32  ;;  %v1267_v16 = vor.u32 %v1266_v62, %v1265_v9  ;;  %v2417_v2 = vmul.u32 %v5240_v25, %v2363_v22 }
 0x1d0   : > { %v2292_v29 = vsel %vm2171_vm11, %v2291_v54, %v2290_v3  ;;  %v1247_v50 = vor.u32 8388608, %v1246_v31  ;;  %v1270_v59 = vor.u32 %v1269_v52, %v1268_v47  ;;  %v5380_v5 = vor.u32 %v1257_v27, %v1256_v15 }
 0x1d1   : > { %v5375_v37 = vsel %vm5294_vm0, %v7131_v57, %v2292_v29  ;;  %v2421_v21 = vsel %vm2419_vm5, %v2420_v23, %v2416_v11  ;;  %vm1274_vm6 = vcmp.lt.s32.totalorder %v5331_v1, 4  ;;  %vm1271_vm7 = vcmp.lt.s32.totalorder %v5331_v1, 1 }
 0x1d2   : > { %v2297_v36 = vmul.f32 %v5375_v37, %v5375_v37  ;;  %v2422_v42 = vadd.s32 %v2421_v21, %v2417_v2  ;;  %v1280_v25 = vsel %vm1274_vm6, %v1267_v16, 920167782  ;;  %v5388_v30 = vand.u32 3, %v2313_v24 }
 0x1d3   : > { %vm1272_vm8 = vcmp.lt.s32.totalorder %v5331_v1, 2  ;;  %v1283_v22 = vsel %vm1271_vm7, %v5365_v38, %v5367_v49  ;;  %v1284_v18 = vsel %vm1274_vm6, %v1270_v59, 1326507024  ;;  %vm1273_vm9 = vcmp.lt.s32.totalorder %v5331_v1, 3 }
 0x1d4   : > { %v2298_v51 = vmul.f32 -0.001358992, %v2297_v36  ;;  %v2305_v46 = vmul.f32 -0.00019511016, %v2297_v36  ;;  %v2423_v6 = vadd.s32 536870912, %v2422_v42  ;;  %v1279_v24 = vsel %vm1271_vm7, %v5380_v5, %v5365_v38 }
 0x1d5   : > { %v1281_v17 = vsel %vm1273_vm9, %v5367_v49, %v1280_v25  ;;  %v1285_v13 = vsel %vm1273_vm9, %v1267_v16, %v1284_v18  ;;  %v5407_v31 = vshll.u32 %v1247_v50, 8  ;;  %v5420_v52 = vand.u32 31, %v5259_v40 }
 0x1d6   : > { %v2299_v4 = vadd.f32 0.041655596, %v2298_v51  ;;  %v2306_v3 = vadd.f32 0.008332121, %v2305_v46  ;;  %v2424_v27 = vshrl.u32 %v2423_v6, 30  ;;  %v1286_v20 = vsel %vm1272_vm8, %v1283_v22, %v1285_v13 }
 0x1d7   : > { %v5412_v48 = vand.u32 65535, %v5407_v31  ;;  %v5415_v11 = vshrl.u32 %v5407_v31, 16  ;;  %v1290_v32 = vand.u32 65535, %v1286_v20  ;;  %v1291_v9 = vshrl.u32 %v1286_v20, 16 }
 0x1d8   : > { %v2300_v62 = vmul.f32 %v2299_v4, %v2297_v36  ;;  %v2307_v54 = vmul.f32 %v2306_v3, %v2297_v36  ;;  %v2425_v15 = vshll.u32 %v2424_v27, 30  ;;  %v1282_v47 = vsel %vm1272_vm8, %v1279_v24, %v1281_v17 }
 0x1d9   : > { %v5423_v23 = vadd.s32 1, %v5262_v12  ;;  %v1293_v16 = vmul.u32 %v1291_v9, %v5412_v48  ;;  %v5427_v29 = vmul.u32 %v1290_v32, %v5415_v11  ;;  %vm2326_vm10 = vcmp.lt.s32.totalorder %v7137_v28, 0 }
 0x1da   : > { %v2301_v2 = vadd.f32 -0.4999988, %v2300_v62  ;;  %v2308_v50 = vadd.f32 -0.16666654, %v2307_v54  ;;  %v5430_v59 = vsub.s32 %v2422_v42, %v2425_v15  ;;  %vm2316_vm11 = vcmp.eq.s32.totalorder %v5388_v30, 0 }
 0x1db   : > { %v1255_v40 = vshrl.u32 %v7096_v58, %v5269_v10  ;;  %v1292_v21 = vmul.u32 %v1290_v32, %v5412_v48  ;;  %v1296_v12 = vshll.u32 %v1293_v16, 16  ;;  %v1313_v25 = vshrl.u32 %v1282_v47, 16 }
 0x1dc   : > { %v2302_v22 = vmul.f32 %v2301_v2, %v2297_v36  ;;  %v2309_v18 = vmul.f32 %v2308_v50, %v2297_v36  ;;  %vm2315_vm12 = vcmp.lt.s32.totalorder %v5388_v30, 2  ;;  %vm2427_vm13 = vcmp.lt.s32.totalorder %v5430_v59, 0 }
 0x1dd   : > { %v2428_v51 = vsub.s32 0, %v5430_v59  ;;  %vm2312_vm14 = vweird.f32 %v7131_v57  ;;  %v1295_v42 = vmul.u32 %v1291_v9, %v5415_v11  ;;  %v1298_v46 = vshll.u32 %v5427_v29, 16 }
 0x1de   : > { %vm1300_vm15 = vc.u32 %v1292_v21, %v1296_v12  ;;  %v1302_v10 = vadd.s32 %v1296_v12, %v1292_v21  ;;  %v2303_v6 = vadd.f32 1.0, %v2302_v22  ;;  %v2310_v24 = vadd.f32 1.0, %v2309_v18 }
 0x1df   : > { %v2429_v17 = vsel %vm2427_vm13, %v2428_v51, %v5430_v59  ;;  %v1301_v36 = vsel %vm1300_vm15, 1, %v7094_v34  ;;  %v2448_v4 = vsub.s32 4, %v2424_v27  ;;  %vm1560_vm1 = vcmp.gt.s32.totalorder %v5165_v43, 0 }
 0x1e0   : > { %v2430_v13 = vclz %v2429_v17  ;;  %v1303_v3 = vadd.s32 %v1301_v36, %v1295_v42  ;;  %vm1304_vm0 = vc.u32 %v1302_v10, %v1298_v46  ;;  %v2311_v20 = vmul.f32 %v2310_v24, %v5375_v37 }
 0x1e1   : > { %v2320_v32 = vxor.u32 2147483648, %v2303_v6  ;;  %v1305_v9 = vsel %vm1304_vm0, 1, %v7094_v34  ;;  %v1312_v62 = vand.u32 65535, %v1282_v47  ;;  %vm2319_vm2 = vcmp.eq.s32.totalorder %v5388_v30, 2 }
 0x1e2   : > { %vm5450_vm3 = vcmp.le.f32.partialorder %v2324_v35, 0.7853982  ;;  %v2418_v15 = vadd.s32 %v5339_v14, %v5327_v41  ;;  %v3647_v2 = vadd.s32 4294967294, %v2430_v13  ;;  %v1275_v37 = vsel %vm1271_vm7, %v1255_v40, %v5380_v5 }
 0x1e3   : > { %v2317_v50 = vxor.u32 2147483648, %v2311_v20  ;;  %v1276_v47 = vsel %vm1274_vm6, %v5367_v49, 2102212464  ;;  %v1307_v21 = vadd.s32 %v1305_v9, %v1303_v3  ;;  %v1315_v12 = vmul.u32 %v1313_v25, %v5412_v48 }
 0x1e4   : > { %v2321_v35 = vsel %vm2319_vm2, %v2320_v32, %v2311_v20  ;;  %vm3648_vm4 = vcmp.lt.s32.totalorder %v3647_v2, 0  ;;  %v2449_v22 = vsel %vm2326_vm10, %v2448_v4, %v2424_v27  ;;  %v1297_v18 = vshrl.u32 %v1293_v16, 16 }
 0x1e5   : > { %v2318_v41 = vsel %vm2316_vm11, %v2303_v6, %v2317_v50  ;;  %v2433_v14 = vsel %vm3648_vm4, 0, %v3647_v2  ;;  %v1316_v5 = vmul.u32 %v1312_v62, %v5415_v11  ;;  %v1318_v40 = vshll.u32 %v1315_v12, 16 }
 0x1e6   : > { %v2322_v51 = vsel %vm2315_vm12, %v2318_v41, %v2321_v35  ;;  %v2434_v49 = vsub.s32 32, %v2433_v14  ;;  %v2438_v42 = vsub.s32 4294967266, %v2433_v14  ;;  %v1314_v46 = vmul.u32 %v1312_v62, %v5412_v48 }
 0x1e7   : > { %v2323_v10 = vsel %vm2312_vm14, nan, %v2322_v51  ;;  %v1299_v27 = vshrl.u32 %v5427_v29, 16  ;;  %v1308_v16 = vadd.s32 %v1307_v21, %v1297_v18  ;;  %v1317_v24 = vmul.u32 %v1313_v25, %v5415_v11 }
 0x1e8   : > { %3187 = vmatpush.msra.mxu2 %v2323_v10  ;;  %v2435_v6 = vshll.u32 %v5430_v59, %v2433_v14  ;;  %v2436_v17 = vshrl.u32 %v2418_v15, %v2434_v49  ;;  %v2439_v36 = vadd.s32 127, %v2438_v42  ;;  %vm1322_vm5 = vc.u32 %v1314_v46, %v1318_v40 }
 0x1e9   : > { %v1320_v30 = vshll.u32 %v1316_v5, 16  ;;  %v1323_v13 = vsel %vm1322_vm5, 1, %v7094_v34  ;;  %v1324_v4 = vadd.s32 %v1318_v40, %v1314_v46  ;;  %v1394_v48 = vand.u32 2147483647, %v7122_v26 }
 0x1ea   : > { %v2437_v3 = vor.u32 %v2436_v17, %v2435_v6  ;;  %v2440_v57 = vshll.u32 %v2439_v36, 23  ;;  %v1277_v29 = vsel %vm1273_vm9, %v5365_v38, %v1276_v47  ;;  %v1325_v20 = vadd.s32 %v1323_v13, %v1317_v24 }
 0x1eb   : > { %v5482_v11 = vsub.s32 32, %v5420_v52  ;;  %v2451_v59 = vsel %vm5450_vm3, 0, %v2449_v22  ;;  %v5486_v25 = vadd.s32 %v1308_v16, %v1299_v27  ;;  %vm1326_vm6 = vc.u32 %v1324_v4, %v1320_v30 }
 0x1ec   : > { %v5491_v32 = vsel %vm1560_vm1, %v5165_v43, 0  ;;  %v2441_v9 = vor.u32 4788187, %v2440_v57  ;;  %v1327_v62 = vsel %vm1326_vm6, 1, %v7094_v34  ;;  %v1401_v38 = vand.u32 8388607, %v1394_v48 }
 0x1ed   : > { %v1278_v15 = vsel %vm1272_vm8, %v1275_v37, %v1277_v29  ;;  %v1319_v2 = vshrl.u32 %v1315_v12, 16  ;;  %v5498_v50 = vadd.s32 %v1324_v4, %v1320_v30  ;;  %v1329_v47 = vadd.s32 %v1327_v62, %v1325_v20 }
 0x1ee   : > { %v2442_v21 = vand.u32 2147483647, %v2441_v9  ;;  %v2444_v35 = vcvt.s32.f32 %v2437_v3  ;;  %v2468_v22 = vadd.s32 3, %v2451_v59  ;;  %v1321_v18 = vshrl.u32 %v1316_v5, 16 }
 0x1ef   : > { %v1330_v41 = vadd.s32 %v1329_v47, %v1319_v2  ;;  %vm1334_vm7 = vc.u32 %v5486_v25, %v5498_v50  ;;  %v1415_v43 = vshrl.u32 %v7100_v39, %v5482_v11  ;;  %v1418_v14 = vshrl.u32 %v7101_v53, %v5482_v11 }
 0x1f0   : > { %v2445_v1 = vmul.f32 %v2444_v35, %v2442_v21  ;;  %v1402_v37 = vor.u32 8388608, %v1401_v38  ;;  %v1420_v12 = vshll.u32 %v7101_v53, %v5420_v52  ;;  %v1421_v40 = vshrl.u32 %v7102_v61, %v5482_v11 }
 0x1f1   : > { %v1331_v51 = vadd.s32 %v1330_v41, %v1321_v18  ;;  %v1412_v5 = vshrl.u32 %v7098_v7, %v5482_v11  ;;  %v1414_v49 = vshll.u32 %v7098_v7, %v5420_v52  ;;  %v1417_v42 = vshll.u32 %v7100_v39, %v5420_v52 }
 0x1f2   : > { %v2446_v46 = vxor.u32 2147483648, %v2445_v1  ;;  %v1422_v10 = vor.u32 %v1421_v40, %v1420_v12  ;;  %v1423_v27 = vshll.u32 %v7102_v61, %v5420_v52  ;;  %v1424_v16 = vshrl.u32 %v7103_v8, %v5482_v11 }
 0x1f3   : > { %v1335_v24 = vadd.s32 1, %v1331_v51  ;;  %v1411_v6 = vshll.u32 %v7096_v58, %v5420_v52  ;;  %v5522_v17 = vor.u32 %v1415_v43, %v1414_v49  ;;  %v1419_v36 = vor.u32 %v1418_v14, %v1417_v42 }
 0x1f4   : > { %v5525_v30 = vshrl.u32 %v5491_v32, 5  ;;  %v2447_v13 = vsel %vm2326_vm10, %v2446_v46, %v2445_v1  ;;  %v1332_v4 = vmul.u32 %v5407_v31, %v1278_v15  ;;  %v1425_v3 = vor.u32 %v1424_v16, %v1423_v27 }
 0x1f5   : > { %v5533_v57 = vsel %vm5450_vm3, %v7137_v28, %v2447_v13  ;;  %v1336_v52 = vsel %vm1334_vm7, %v1335_v24, %v1331_v51  ;;  %v5538_v29 = vor.u32 %v1412_v5, %v1411_v6  ;;  %vm1429_vm8 = vcmp.lt.s32.totalorder %v5334_v19, 4 }
 0x1f6   : > { %v2452_v20 = vmul.f32 %v5533_v57, %v5533_v57  ;;  %v1337_v59 = vadd.s32 %v1336_v52, %v1332_v4  ;;  %vm1426_vm9 = vcmp.lt.s32.totalorder %v5334_v19, 1  ;;  %v1435_v31 = vsel %vm1429_vm8, %v1422_v10, 920167782 }
 0x1f7   : > { %v5546_v54 = vand.u32 3, %v2468_v22  ;;  %v1438_v9 = vsel %vm1426_vm9, %v5522_v17, %v1419_v36  ;;  %v1439_v62 = vsel %vm1429_vm8, %v1425_v3, 1326507024  ;;  %v5553_v38 = vshll.u32 %v1402_v37, 8 }
 0x1f8   : > { %v2453_v15 = vmul.f32 -0.001358992, %v2452_v20  ;;  %v2460_v2 = vmul.f32 -0.00019511016, %v2452_v20  ;;  %v1338_v47 = vadd.s32 536870912, %v1337_v59  ;;  %vm1428_vm10 = vcmp.lt.s32.totalorder %v5334_v19, 3 }
 0x1f9   : > { %vm1427_vm11 = vcmp.lt.s32.totalorder %v5334_v19, 2  ;;  %v1434_v21 = vsel %vm1426_vm9, %v5538_v29, %v5522_v17  ;;  %v1436_v35 = vsel %vm1428_vm10, %v1419_v36, %v1435_v31  ;;  %v1440_v22 = vsel %vm1428_vm10, %v1422_v10, %v1439_v62 }
 0x1fa   : > { %v2454_v18 = vadd.f32 0.041655596, %v2453_v15  ;;  %v2461_v41 = vadd.f32 0.008332121, %v2460_v2  ;;  %v5565_v43 = vshrl.u32 %v1338_v47, 30  ;;  %v1441_v14 = vsel %vm1427_vm11, %v1438_v9, %v1440_v22 }
 0x1fb   : > { %v1443_v1 = vand.u32 65535, %v5553_v38  ;;  %v1444_v37 = vshrl.u32 %v5553_v38, 16  ;;  %v1445_v12 = vand.u32 65535, %v1441_v14  ;;  %v1446_v40 = vshrl.u32 %v1441_v14, 16 }
 0x1fc   : > { %v2455_v51 = vmul.f32 %v2454_v18, %v2452_v20  ;;  %v2462_v5 = vmul.f32 %v2461_v41, %v2452_v20  ;;  %v1340_v49 = vshll.u32 %v5565_v43, 30  ;;  %v1437_v42 = vsel %vm1427_vm11, %v1434_v21, %v1436_v35 }
 0x1fd   : > { %v5575_v46 = vand.u32 31, %v5491_v32  ;;  %v1410_v10 = vshrl.u32 %v7096_v58, %v5482_v11  ;;  %v1448_v27 = vmul.u32 %v1446_v40, %v1443_v1  ;;  %v5579_v16 = vmul.u32 %v1445_v12, %v1444_v37 }
 0x1fe   : > { %v2456_v24 = vadd.f32 -0.4999988, %v2455_v51  ;;  %v2463_v6 = vadd.f32 -0.16666654, %v2462_v5  ;;  %v5581_v13 = vsub.s32 %v1337_v59, %v1340_v49  ;;  %v1431_v4 = vsel %vm1429_vm8, %v1419_v36, 2102212464 }
 0x1ff   : > { %vm2471_vm12 = vcmp.eq.s32.totalorder %v5546_v54, 0  ;;  %vm2474_vm13 = vcmp.eq.s32.totalorder %v5546_v54, 2  ;;  %v1447_v3 = vmul.u32 %v1445_v12, %v1443_v1  ;;  %v1451_v32 = vshll.u32 %v1448_v27, 16 }
 0x200   : > { %v1467_v52 = vand.u32 65535, %v1437_v42  ;;  %v1468_v31 = vshrl.u32 %v1437_v42, 16  ;;  %v2457_v9 = vmul.f32 %v2456_v24, %v2452_v20  ;;  %v2464_v11 = vmul.f32 %v2463_v6, %v2452_v20 }
 0x201   : > { %vm2470_vm14 = vcmp.lt.s32.totalorder %v5546_v54, 2  ;;  %vm1342_vm15 = vcmp.lt.s32.totalorder %v5581_v13, 0  ;;  %v1343_v59 = vsub.s32 0, %v5581_v13  ;;  %vm2467_vm0 = vweird.f32 %v7137_v28 }
 0x202   : > { %v1450_v62 = vmul.u32 %v1446_v40, %v1444_v37  ;;  %v1453_v36 = vshll.u32 %v5579_v16, 16  ;;  %vm1455_vm1 = vc.u32 %v1447_v3, %v1451_v32  ;;  %v1457_v15 = vadd.s32 %v1451_v32, %v1447_v3 }
 0x203   : > { %v2458_v2 = vadd.f32 1.0, %v2457_v9  ;;  %v2465_v47 = vadd.f32 1.0, %v2464_v11  ;;  %v1344_v21 = vsel %vm1342_vm15, %v1343_v59, %v5581_v13  ;;  %v1456_v35 = vsel %vm1455_vm1, 1, %v7094_v34 }
 0x204   : > { %vm1715_vm2 = vcmp.gt.s32.totalorder %v5423_v23, 0  ;;  %vm1241_vm3 = vcmp.lt.s32.totalorder %v7121_v55, 0  ;;  %v1333_v20 = vadd.s32 %v5498_v50, %v5486_v25  ;;  %v1345_v22 = vclz %v1344_v21 }
 0x205   : > { %v1458_v18 = vadd.s32 %v1456_v35, %v1450_v62  ;;  %vm1459_vm4 = vc.u32 %v1457_v15, %v1453_v36  ;;  %v2466_v41 = vmul.f32 %v2465_v47, %v5533_v57  ;;  %v2475_v14 = vxor.u32 2147483648, %v2458_v2 }
 0x206   : > { %v1460_v12 = vsel %vm1459_vm4, 1, %v7094_v34  ;;  %v1470_v40 = vmul.u32 %v1468_v31, %v1443_v1  ;;  %v3626_v51 = vadd.s32 4294967294, %v1345_v22  ;;  %v1430_v5 = vsel %vm1426_vm9, %v1410_v10, %v5538_v29 }
 0x207   : > { %v1432_v49 = vsel %vm1428_vm10, %v5522_v17, %v1431_v4  ;;  %v1469_v42 = vmul.u32 %v1467_v52, %v1443_v1  ;;  %v2472_v25 = vxor.u32 2147483648, %v2466_v41  ;;  %v1363_v50 = vsub.s32 4, %v5565_v43 }
 0x208   : > { %v1462_v24 = vadd.s32 %v1460_v12, %v1458_v18  ;;  %v1471_v6 = vmul.u32 %v1467_v52, %v1444_v37  ;;  %vm3627_vm5 = vcmp.lt.s32.totalorder %v3626_v51, 0  ;;  %v1452_v57 = vshrl.u32 %v1448_v27, 16 }
 0x209   : > { %v1454_v3 = vshrl.u32 %v5579_v16, 16  ;;  %v1473_v32 = vshll.u32 %v1470_v40, 16  ;;  %v2473_v9 = vsel %vm2471_vm12, %v2458_v2, %v2472_v25  ;;  %v2476_v29 = vsel %vm2474_vm13, %v2475_v14, %v2466_v41 }
 0x20a   : > { %v1348_v10 = vsel %vm3627_vm5, 0, %v3626_v51  ;;  %v1472_v11 = vmul.u32 %v1468_v31, %v1444_v37  ;;  %v2477_v17 = vsel %vm2470_vm14, %v2473_v9, %v2476_v29  ;;  %v1463_v59 = vadd.s32 %v1462_v24, %v1452_v57 }
 0x20b   : > { %v1349_v1 = vsub.s32 32, %v1348_v10  ;;  %v1353_v4 = vsub.s32 4294967266, %v1348_v10  ;;  %v2478_v27 = vsel %vm2467_vm0, nan, %v2477_v17  ;;  %v1350_v16 = vshll.u32 %v5581_v13, %v1348_v10 }
 0x20c   : > { %v1475_v52 = vshll.u32 %v1471_v6, 16  ;;  %vm1477_vm6 = vc.u32 %v1469_v42, %v1473_v32  ;;  %3216 = vmatpush.msra.mxu3 %v2478_v27  ;;  %v1479_v2 = vadd.s32 %v1473_v32, %v1469_v42  ;;  %v5619_v37 = vsub.s32 32, %v5575_v46 }
 0x20d   : > { %v1351_v62 = vshrl.u32 %v1333_v20, %v1349_v1  ;;  %v1354_v36 = vadd.s32 127, %v1353_v4  ;;  %v1478_v15 = vsel %vm1477_vm6, 1, %v7094_v34  ;;  %v1364_v54 = vsel %vm1241_vm3, %v1363_v50, %v5565_v43 }
 0x20e   : > { %v1480_v31 = vadd.s32 %v1478_v15, %v1472_v11  ;;  %v1549_v28 = vand.u32 2147483647, %v4652_v44  ;;  %v5625_v21 = vadd.s32 %v1463_v59, %v1454_v3  ;;  %vm1481_vm7 = vc.u32 %v1479_v2, %v1475_v52 }
 0x20f   : > { %v1352_v47 = vor.u32 %v1351_v62, %v1350_v16  ;;  %v1355_v13 = vshll.u32 %v1354_v36, 23  ;;  %v5630_v35 = vsel %vm1715_vm2, %v5423_v23, 0  ;;  %vm5634_vm8 = vcmp.le.f32.partialorder %v1239_v0, 0.7853982 }
 0x210   : > { %v1433_v43 = vsel %vm1427_vm11, %v1430_v5, %v1432_v49  ;;  %v1482_v22 = vsel %vm1481_vm7, 1, %v7094_v34  ;;  %v1474_v41 = vshrl.u32 %v1470_v40, 16  ;;  %v5641_v14 = vadd.s32 %v1479_v2, %v1475_v52 }
 0x211   : > { %v1356_v18 = vor.u32 4788187, %v1355_v13  ;;  %v1484_v12 = vadd.s32 %v1482_v22, %v1480_v31  ;;  %v1359_v51 = vcvt.s32.f32 %v1352_v47  ;;  %v1366_v23 = vsel %vm5634_vm8, 0, %v1364_v54 }
 0x212   : > { %v1476_v42 = vshrl.u32 %v1471_v6, 16  ;;  %v1556_v0 = vand.u32 8388607, %v1549_v28  ;;  %vm1489_vm9 = vc.u32 %v5625_v21, %v5641_v14  ;;  %v1567_v19 = vshrl.u32 %v7098_v7, %v5619_v37 }
 0x213   : > { %v1357_v25 = vand.u32 2147483647, %v1356_v18  ;;  %v1485_v50 = vadd.s32 %v1484_v12, %v1474_v41  ;;  %v1569_v40 = vshll.u32 %v7098_v7, %v5575_v46  ;;  %v1570_v5 = vshrl.u32 %v7100_v39, %v5619_v37 }
 0x214   : > { %v1572_v49 = vshll.u32 %v7100_v39, %v5575_v46  ;;  %v1573_v24 = vshrl.u32 %v7101_v53, %v5619_v37  ;;  %v1575_v3 = vshll.u32 %v7101_v53, %v5575_v46  ;;  %v1576_v32 = vshrl.u32 %v7102_v61, %v5619_v37 }
 0x215   : > { %v1360_v6 = vmul.f32 %v1359_v51, %v1357_v25  ;;  %v1486_v57 = vadd.s32 %v1485_v50, %v1476_v42  ;;  %vm630_vm10 = vcmp.gt.s32.totalorder %v4799_v33, 0  ;;  %v1566_v9 = vshll.u32 %v7096_v58, %v5575_v46 }
 0x216   : > { %v5666_v29 = vor.u32 %v1570_v5, %v1569_v40  ;;  %v1578_v10 = vshll.u32 %v7102_v61, %v5575_v46  ;;  %v1579_v11 = vshrl.u32 %v7103_v8, %v5619_v37  ;;  %v5672_v4 = vor.u32 %v1573_v24, %v1572_v49 }
 0x217   : > { %v1361_v17 = vxor.u32 2147483648, %v1360_v6  ;;  %v1490_v1 = vadd.s32 1, %v1486_v57  ;;  %v1577_v59 = vor.u32 %v1576_v32, %v1575_v3  ;;  %v5675_v27 = vand.u32 31, %v5630_v35 }
 0x218   : > { %v1487_v16 = vmul.u32 %v5553_v38, %v1433_v43  ;;  %v1557_v52 = vor.u32 8388608, %v1556_v0  ;;  %v1580_v62 = vor.u32 %v1579_v11, %v1578_v10  ;;  %v1383_v15 = vadd.s32 3, %v1366_v23 }
 0x219   : > { %v1362_v36 = vsel %vm1241_vm3, %v1361_v17, %v1360_v6  ;;  %v1491_v46 = vsel %vm1489_vm9, %v1490_v1, %v1486_v57  ;;  %v5683_v2 = vor.u32 %v1567_v19, %v1566_v9  ;;  %vm1581_vm11 = vcmp.lt.s32.totalorder %v5525_v30, 1 }
 0x21a   : > { %v5688_v54 = vsel %vm5634_vm8, %v7121_v55, %v1362_v36  ;;  %v1492_v31 = vadd.s32 %v1491_v46, %v1487_v16  ;;  %vm1584_vm12 = vcmp.lt.s32.totalorder %v5525_v30, 4  ;;  %vm1582_vm13 = vcmp.lt.s32.totalorder %v5525_v30, 2 }
 0x21b   : > { %v1367_v38 = vmul.f32 %v5688_v54, %v5688_v54  ;;  %v1590_v47 = vsel %vm1584_vm12, %v1577_v59, 920167782  ;;  %v1593_v13 = vsel %vm1581_vm11, %v5666_v29, %v5672_v4  ;;  %vm1583_vm14 = vcmp.lt.s32.totalorder %v5525_v30, 3 }
 0x21c   : > { %v1493_v20 = vadd.s32 536870912, %v1492_v31  ;;  %v1594_v43 = vsel %vm1584_vm12, %v1580_v62, 1326507024  ;;  %v5704_v22 = vshll.u32 %v1557_v52, 8  ;;  %v1589_v12 = vsel %vm1581_vm11, %v5683_v2, %v5666_v29 }
 0x21d   : > { %v1368_v18 = vmul.f32 -0.001358992, %v1367_v38  ;;  %v1375_v41 = vmul.f32 -0.00019511016, %v1367_v38  ;;  %v1595_v51 = vsel %vm1583_vm14, %v1577_v59, %v1594_v43  ;;  %v1591_v42 = vsel %vm1583_vm14, %v5672_v4, %v1590_v47 }
 0x21e   : > { %v1494_v23 = vshrl.u32 %v1493_v20, 30  ;;  %v1596_v0 = vsel %vm1582_vm13, %v1593_v13, %v1595_v51  ;;  %v1598_v25 = vand.u32 65535, %v5704_v22  ;;  %v5719_v49 = vadd.s32 1, %v4608_v63 }
 0x21f   : > { %v1369_v50 = vadd.f32 0.041655596, %v1368_v18  ;;  %v1376_v19 = vadd.f32 0.008332121, %v1375_v41  ;;  %v1600_v40 = vand.u32 65535, %v1596_v0  ;;  %v1601_v5 = vshrl.u32 %v1596_v0, 16 }
 0x220   : > { %v1384_v24 = vand.u32 3, %v1383_v15  ;;  %v1495_v6 = vshll.u32 %v1494_v23, 30  ;;  %v1599_v57 = vshrl.u32 %v5704_v22, 16  ;;  %v5725_v3 = vsel %vm630_vm10, %v4799_v33, 0 }
 0x221   : > { %v1370_v32 = vmul.f32 %v1369_v50, %v1367_v38  ;;  %v1377_v9 = vmul.f32 %v1376_v19, %v1367_v38  ;;  %v1603_v10 = vmul.u32 %v1601_v5, %v1598_v25  ;;  %v5728_v11 = vsub.s32 32, %v5675_v27 }
 0x222   : > { %v5730_v17 = vsub.s32 %v1492_v31, %v1495_v6  ;;  %v1592_v63 = vsel %vm1582_vm13, %v1589_v12, %v1591_v42  ;;  %v5734_v1 = vmul.u32 %v1600_v40, %v1599_v57  ;;  %vm1396_vm15 = vcmp.lt.s32.totalorder %v7122_v26, 0 }
 0x223   : > { %v1371_v59 = vadd.f32 -0.4999988, %v1370_v32  ;;  %v1378_v16 = vadd.f32 -0.16666654, %v1377_v9  ;;  %v1606_v52 = vshll.u32 %v1603_v10, 16  ;;  %vm1386_vm0 = vcmp.eq.s32.totalorder %v1384_v24, 0 }
 0x224   : > { %vm1389_vm1 = vcmp.eq.s32.totalorder %v1384_v24, 2  ;;  %vm1497_vm2 = vcmp.lt.s32.totalorder %v5730_v17, 0  ;;  %v1498_v33 = vsub.s32 0, %v5730_v17  ;;  %v1518_v62 = vsub.s32 4, %v1494_v23 }
 0x225   : > { %v1602_v36 = vmul.u32 %v1600_v40, %v1598_v25  ;;  %v1372_v15 = vmul.f32 %v1371_v59, %v1367_v38  ;;  %v1379_v46 = vmul.f32 %v1378_v16, %v1367_v38  ;;  %vm1385_vm3 = vcmp.lt.s32.totalorder %v1384_v24, 2 }
 0x226   : > { %v1605_v31 = vmul.u32 %v1601_v5, %v1599_v57  ;;  %v1623_v47 = vshrl.u32 %v1592_v63, 16  ;;  %vm1382_vm4 = vweird.f32 %v7121_v55  ;;  %v1499_v13 = vsel %vm1497_vm2, %v1498_v33, %v5730_v17 }
 0x227   : > { %v1608_v20 = vshll.u32 %v5734_v1, 16  ;;  %vm1610_vm5 = vc.u32 %v1602_v36, %v1606_v52  ;;  %v1612_v43 = vadd.s32 %v1606_v52, %v1602_v36  ;;  %v1373_v18 = vadd.f32 1.0, %v1372_v15 }
 0x228   : > { %v1380_v41 = vadd.f32 1.0, %v1379_v46  ;;  %v1500_v12 = vclz %v1499_v13  ;;  %v1611_v51 = vsel %vm1610_vm5, 1, %v7094_v34  ;;  %v1488_v42 = vadd.s32 %v5641_v14, %v5625_v21 }
 0x229   : > { %v1565_v38 = vshrl.u32 %v7096_v58, %v5619_v37  ;;  %v1613_v0 = vadd.s32 %v1611_v51, %v1605_v31  ;;  %v1622_v50 = vand.u32 65535, %v1592_v63  ;;  %v1390_v40 = vxor.u32 2147483648, %v1373_v18 }
 0x22a   : > { %v1381_v19 = vmul.f32 %v1380_v41, %v5688_v54  ;;  %vm5750_vm6 = vcmp.le.f32.partialorder %v1394_v48, 0.7853982  ;;  %v3629_v6 = vadd.s32 4294967294, %v1500_v12  ;;  %vm1614_vm7 = vc.u32 %v1612_v43, %v1608_v20 }
 0x22b   : > { %v1519_v32 = vsel %vm1396_vm15, %v1518_v62, %v1494_v23  ;;  %v1586_v37 = vsel %vm1584_vm12, %v5672_v4, 2102212464  ;;  %v1615_v21 = vsel %vm1614_vm7, 1, %v7094_v34  ;;  %v1625_v14 = vmul.u32 %v1623_v47, %v1598_v25 }
 0x22c   : > { %v1387_v54 = vxor.u32 2147483648, %v1381_v19  ;;  %vm3630_vm8 = vcmp.lt.s32.totalorder %v3629_v6, 0  ;;  %v1607_v9 = vshrl.u32 %v1603_v10, 16  ;;  %v1617_v63 = vadd.s32 %v1615_v21, %v1613_v0 }
 0x22d   : > { %v1503_v48 = vsel %vm3630_vm8, 0, %v3629_v6  ;;  %v1624_v59 = vmul.u32 %v1622_v50, %v1598_v25  ;;  %v1626_v16 = vmul.u32 %v1622_v50, %v1599_v57  ;;  %v1628_v52 = vshll.u32 %v1625_v14, 16 }
 0x22e   : > { %v1388_v33 = vsel %vm1386_vm0, %v1373_v18, %v1387_v54  ;;  %v1391_v36 = vsel %vm1389_vm1, %v1390_v40, %v1381_v19  ;;  %v1504_v23 = vsub.s32 32, %v1503_v48  ;;  %v1508_v62 = vsub.s32 4294967266, %v1503_v48 }
 0x22f   : > { %v1392_v15 = vsel %vm1385_vm3, %v1388_v33, %v1391_v36  ;;  %v1505_v4 = vshll.u32 %v5730_v17, %v1503_v48  ;;  %v1618_v46 = vadd.s32 %v1617_v63, %v1607_v9  ;;  %v1627_v31 = vmul.u32 %v1623_v47, %v1599_v57 }
 0x230   : > { %v1393_v10 = vsel %vm1382_vm4, nan, %v1392_v15  ;;  %v1506_v13 = vshrl.u32 %v1488_v42, %v1504_v23  ;;  %v1509_v20 = vadd.s32 127, %v1508_v62  ;;  %vm1632_vm9 = vc.u32 %v1624_v59, %v1628_v52 }
 0x231   : > { %3130 = vmatpush.msra.mxu0 %v1393_v10  ;;  %v1609_v25 = vshrl.u32 %v5734_v1, 16  ;;  %v1630_v43 = vshll.u32 %v1626_v16, 16  ;;  %v1633_v18 = vsel %vm1632_vm9, 1, %v7094_v34  ;;  %v1634_v41 = vadd.s32 %v1628_v52, %v1624_v59 }
 0x232   : > { %v1507_v12 = vor.u32 %v1506_v13, %v1505_v4  ;;  %v1510_v24 = vshll.u32 %v1509_v20, 23  ;;  %v1585_v17 = vsel %vm1581_vm11, %v1565_v38, %v5683_v2  ;;  %v1635_v57 = vadd.s32 %v1633_v18, %v1627_v31 }
 0x233   : > { %v1521_v55 = vsel %vm5750_vm6, 0, %v1519_v32  ;;  %v1587_v47 = vsel %vm1583_vm14, %v5666_v29, %v1586_v37  ;;  %v5776_v51 = vadd.s32 %v1618_v46, %v1609_v25  ;;  %vm1636_vm10 = vc.u32 %v1634_v41, %v1630_v43 }
 0x234   : > { %v5779_v1 = vand.u32 31, %v5725_v3  ;;  %v1511_v42 = vor.u32 4788187, %v1510_v24  ;;  %v1637_v0 = vsel %vm1636_vm10, 1, %v7094_v34  ;;  %v1704_v50 = vand.u32 2147483647, %v4775_v60 }
 0x235   : > { %v5784_v2 = vshrl.u32 %v5630_v35, 5  ;;  %v1629_v38 = vshrl.u32 %v1625_v14, 16  ;;  %v5786_v19 = vadd.s32 %v1634_v41, %v1630_v43  ;;  %v1639_v40 = vadd.s32 %v1637_v0, %v1635_v57 }
 0x236   : > { %v1512_v6 = vand.u32 2147483647, %v1511_v42  ;;  %v1514_v29 = vcvt.s32.f32 %v1507_v12  ;;  %v1538_v32 = vadd.s32 3, %v1521_v55  ;;  %v1588_v37 = vsel %vm1582_vm13, %v1585_v17, %v1587_v47 }
 0x237   : > { %v1631_v21 = vshrl.u32 %v1626_v16, 16  ;;  %v1640_v54 = vadd.s32 %v1639_v40, %v1629_v38  ;;  %vm1644_vm11 = vc.u32 %v5776_v51, %v5786_v19  ;;  %v1725_v9 = vshrl.u32 %v7100_v39, %v5728_v11 }
 0x238   : > { %v1515_v35 = vmul.f32 %v1514_v29, %v1512_v6  ;;  %v1711_v14 = vand.u32 8388607, %v1704_v50  ;;  %v1722_v63 = vshrl.u32 %v7098_v7, %v5728_v11  ;;  %v1728_v48 = vshrl.u32 %v7101_v53, %v5728_v11 }
 0x239   : > { %v1641_v30 = vadd.s32 %v1640_v54, %v1631_v21  ;;  %v1724_v59 = vshll.u32 %v7098_v7, %v5675_v27  ;;  %v1727_v16 = vshll.u32 %v7100_v39, %v5675_v27  ;;  %v1731_v52 = vshrl.u32 %v7102_v61, %v5728_v11 }
 0x23a   : > { %v1516_v33 = vxor.u32 2147483648, %v1515_v35  ;;  %v1721_v36 = vshll.u32 %v7096_v58, %v5675_v27  ;;  %v1733_v23 = vshll.u32 %v7102_v61, %v5675_v27  ;;  %v1734_v62 = vshrl.u32 %v7103_v8, %v5728_v11 }
 0x23b   : > { %v1645_v15 = vadd.s32 1, %v1641_v30  ;;  %v5812_v4 = vor.u32 %v1725_v9, %v1724_v59  ;;  %v5814_v46 = vor.u32 %v1728_v48, %v1727_v16  ;;  %v1730_v31 = vshll.u32 %v7101_v53, %v5675_v27 }
 0x23c   : > { %v1517_v10 = vsel %vm1396_vm15, %v1516_v33, %v1515_v35  ;;  %v1642_v13 = vmul.u32 %v5704_v22, %v1588_v37  ;;  %v1712_v20 = vor.u32 8388608, %v1711_v14  ;;  %v1735_v25 = vor.u32 %v1734_v62, %v1733_v23 }
 0x23d   : > { %v5824_v43 = vsel %vm5750_vm6, %v7122_v26, %v1517_v10  ;;  %v1646_v18 = vsel %vm1644_vm11, %v1645_v15, %v1641_v30  ;;  %v5829_v41 = vor.u32 %v1722_v63, %v1721_v36  ;;  %v1732_v12 = vor.u32 %v1731_v52, %v1730_v31 }
 0x23e   : > { %v1522_v27 = vmul.f32 %v5824_v43, %v5824_v43  ;;  %v1647_v24 = vadd.s32 %v1646_v18, %v1642_v13  ;;  %vm1736_vm12 = vcmp.lt.s32.totalorder %v5784_v2, 1  ;;  %vm1739_vm13 = vcmp.lt.s32.totalorder %v5784_v2, 4 }
 0x23f   : > { %v5835_v22 = vand.u32 3, %v1538_v32  ;;  %vm1737_vm14 = vcmp.lt.s32.totalorder %v5784_v2, 2  ;;  %v1748_v5 = vsel %vm1736_vm12, %v5812_v4, %v5814_v46  ;;  %v1749_v17 = vsel %vm1739_vm13, %v1735_v25, 1326507024 }
 0x240   : > { %v1523_v57 = vmul.f32 -0.001358992, %v1522_v27  ;;  %v1530_v55 = vmul.f32 -0.00019511016, %v1522_v27  ;;  %v1648_v47 = vadd.s32 536870912, %v1647_v24  ;;  %vm1738_vm15 = vcmp.lt.s32.totalorder %v5784_v2, 3 }
 0x241   : > { %v1744_v42 = vsel %vm1736_vm12, %v5829_v41, %v5812_v4  ;;  %v1745_v0 = vsel %vm1739_vm13, %v1732_v12, 920167782  ;;  %v1750_v38 = vsel %vm1738_vm15, %v1732_v12, %v1749_v17  ;;  %v5853_v40 = vshll.u32 %v1712_v20, 8 }
 0x242   : > { %v1524_v6 = vadd.f32 0.041655596, %v1523_v57  ;;  %v1531_v29 = vadd.f32 0.008332121, %v1530_v55  ;;  %v5855_v32 = vshrl.u32 %v1648_v47, 30  ;;  %v1751_v37 = vsel %vm1737_vm14, %v1748_v5, %v1750_v38 }
 0x243   : > { %v5860_v21 = vand.u32 65535, %v5853_v40  ;;  %v5863_v54 = vshrl.u32 %v5853_v40, 16  ;;  %v1755_v9 = vand.u32 65535, %v1751_v37  ;;  %v1756_v35 = vshrl.u32 %v1751_v37, 16 }
 0x244   : > { %v1525_v14 = vmul.f32 %v1524_v6, %v1522_v27  ;;  %v1532_v63 = vmul.f32 %v1531_v29, %v1522_v27  ;;  %v1650_v48 = vshll.u32 %v5855_v32, 30  ;;  %v1746_v30 = vsel %vm1738_vm15, %v5814_v46, %v1745_v0 }
 0x245   : > { %v5870_v59 = vadd.s32 1, %v4723_v56  ;;  %v5873_v16 = vadd.s32 1, %v4727_v45  ;;  %v1758_v52 = vmul.u32 %v1756_v35, %v5860_v21  ;;  %v5877_v33 = vmul.u32 %v1755_v9, %v5863_v54 }
 0x246   : > { %v5880_v36 = vsub.s32 32, %v5779_v1  ;;  %v1526_v23 = vadd.f32 -0.4999988, %v1525_v14  ;;  %v1533_v62 = vadd.f32 -0.16666654, %v1532_v63  ;;  %v5882_v15 = vsub.s32 %v1647_v24, %v1650_v48 }
 0x247   : > { %vm1541_vm0 = vcmp.eq.s32.totalorder %v5835_v22, 0  ;;  %v1720_v56 = vshrl.u32 %v7096_v58, %v5728_v11  ;;  %v1747_v45 = vsel %vm1737_vm14, %v1744_v42, %v1746_v30  ;;  %v1757_v31 = vmul.u32 %v1755_v9, %v5860_v21 }
 0x248   : > { %v1761_v10 = vshll.u32 %v1758_v52, 16  ;;  %v1527_v13 = vmul.f32 %v1526_v23, %v1522_v27  ;;  %v1534_v20 = vmul.f32 %v1533_v62, %v1522_v27  ;;  %vm1540_vm1 = vcmp.lt.s32.totalorder %v5835_v22, 2 }
 0x249   : > { %vm1551_vm2 = vcmp.lt.s32.totalorder %v4652_v44, 0  ;;  %vm1652_vm3 = vcmp.lt.s32.totalorder %v5882_v15, 0  ;;  %v1653_v25 = vsub.s32 0, %v5882_v15  ;;  %vm1537_vm4 = vweird.f32 %v7122_v26 }
 0x24a   : > { %v1760_v11 = vmul.u32 %v1756_v35, %v5863_v54  ;;  %v1763_v18 = vshll.u32 %v5877_v33, 16  ;;  %vm1765_vm5 = vc.u32 %v1757_v31, %v1761_v10  ;;  %v1767_v12 = vadd.s32 %v1761_v10, %v1757_v31 }
 0x24b   : > { %v1528_v24 = vadd.f32 1.0, %v1527_v13  ;;  %v1535_v5 = vadd.f32 1.0, %v1534_v20  ;;  %v1654_v27 = vsel %vm1652_vm3, %v1653_v25, %v5882_v15  ;;  %v1766_v17 = vsel %vm1765_vm5, 1, %v7094_v34 }
 0x24c   : > { %v1655_v57 = vclz %v1654_v27  ;;  %v1741_v55 = vsel %vm1739_vm13, %v5814_v46, 2102212464  ;;  %v1768_v47 = vadd.s32 %v1766_v17, %v1760_v11  ;;  %vm1769_vm6 = vc.u32 %v1767_v12, %v1763_v18 }
 0x24d   : > { %vm785_vm7 = vcmp.gt.s32.totalorder %v5719_v49, 0  ;;  %v1536_v42 = vmul.f32 %v1535_v5, %v5824_v43  ;;  %v1545_v0 = vxor.u32 2147483648, %v1528_v24  ;;  %vm5906_vm8 = vcmp.le.f32.partialorder %v1549_v28, 0.7853982 }
 0x24e   : > { %v1770_v6 = vsel %vm1769_vm6, 1, %v7094_v34  ;;  %v1777_v29 = vand.u32 65535, %v1747_v45  ;;  %vm1544_vm9 = vcmp.eq.s32.totalorder %v5835_v22, 2  ;;  %v1643_v46 = vadd.s32 %v5786_v19, %v5776_v51 }
 0x24f   : > { %v3632_v37 = vadd.s32 4294967294, %v1655_v57  ;;  %v1673_v9 = vsub.s32 4, %v5855_v32  ;;  %v1542_v35 = vxor.u32 2147483648, %v1536_v42  ;;  %v1740_v43 = vsel %vm1736_vm12, %v1720_v56, %v5829_v41 }
 0x250   : > { %v1772_v28 = vadd.s32 %v1770_v6, %v1768_v47  ;;  %v1778_v14 = vshrl.u32 %v1747_v45, 16  ;;  %v1546_v63 = vsel %vm1544_vm9, %v1545_v0, %v1536_v42  ;;  %v1742_v48 = vsel %vm1738_vm15, %v5812_v4, %v1741_v55 }
 0x251   : > { %vm3633_vm10 = vcmp.lt.s32.totalorder %v3632_v37, 0  ;;  %v1762_v30 = vshrl.u32 %v1758_v52, 16  ;;  %v1543_v51 = vsel %vm1541_vm0, %v1528_v24, %v1542_v35  ;;  %v1781_v62 = vmul.u32 %v1777_v29, %v5863_v54 }
 0x252   : > { %v1658_v19 = vsel %vm3633_vm10, 0, %v3632_v37  ;;  %v1780_v23 = vmul.u32 %v1778_v14, %v5860_v21  ;;  %v1547_v41 = vsel %vm1540_vm1, %v1543_v51, %v1546_v63  ;;  %v1674_v31 = vsel %vm1551_vm2, %v1673_v9, %v5855_v32 }
 0x253   : > { %v1659_v56 = vsub.s32 32, %v1658_v19  ;;  %v1663_v45 = vsub.s32 4294967266, %v1658_v19  ;;  %v1548_v4 = vsel %vm1537_vm4, nan, %v1547_v41  ;;  %v1773_v52 = vadd.s32 %v1772_v28, %v1762_v30 }
 0x254   : > { %v1779_v10 = vmul.u32 %v1777_v29, %v5860_v21  ;;  %v1783_v13 = vshll.u32 %v1780_v23, 16  ;;  %3159 = vmatpush.msra.mxu1 %v1548_v4  ;;  %v1660_v20 = vshll.u32 %v5882_v15, %v1658_v19  ;;  %v1764_v22 = vshrl.u32 %v5877_v33, 16  ;;  %v7151_v15 = vld [vmem:[#allocation36_spill] sm:$0xff] }
 0x255   : > { %v1661_v25 = vshrl.u32 %v1643_v46, %v1659_v56  ;;  %v1664_v11 = vadd.s32 127, %v1663_v45  ;;  %v1782_v18 = vmul.u32 %v1778_v14, %v5863_v54  ;;  %v1785_v12 = vshll.u32 %v1781_v62, 16 }
 0x256   : > { %vm1787_vm11 = vc.u32 %v1779_v10, %v1783_v13  ;;  %v1789_v24 = vadd.s32 %v1783_v13, %v1779_v10  ;;  %v1676_v26 = vsel %vm5906_vm8, 0, %v1674_v31  ;;  %v5939_v27 = vadd.s32 %v1773_v52, %v1764_v22 }
 0x257   : > { %v1662_v32 = vor.u32 %v1661_v25, %v1660_v20  ;;  %v1665_v5 = vshll.u32 %v1664_v11, 23  ;;  %v1788_v21 = vsel %vm1787_vm11, 1, %v7094_v34  ;;  %v619_v57 = vand.u32 2147483647, %v7151_v15 }
 0x258   : > { %v1790_v17 = vadd.s32 %v1788_v21, %v1782_v18  ;;  %vm1791_vm12 = vc.u32 %v1789_v24, %v1785_v12  ;;  %v5943_v33 = vshrl.u32 %v5725_v3, 5  ;;  %v5948_v54 = vsel %vm785_vm7, %v5719_v49, 0 }
 0x259   : > { %v1666_v55 = vor.u32 4788187, %v1665_v5  ;;  %v1792_v47 = vsel %vm1791_vm12, 1, %v7094_v34  ;;  %v1743_v42 = vsel %vm1737_vm14, %v1740_v43, %v1742_v48  ;;  %v1784_v0 = vshrl.u32 %v1780_v23, 16 }
 0x25a   : > { %v5953_v6 = vadd.s32 %v1789_v24, %v1785_v12  ;;  %v1794_v29 = vadd.s32 %v1792_v47, %v1790_v17  ;;  %v1669_v37 = vcvt.s32.f32 %v1662_v32  ;;  %v1693_v9 = vadd.s32 3, %v1676_v26 }
 0x25b   : > { %v1667_v46 = vand.u32 2147483647, %v1666_v55  ;;  %v1786_v3 = vshrl.u32 %v1781_v62, 16  ;;  %v626_v49 = vand.u32 8388607, %v619_v57  ;;  %v640_v28 = vshrl.u32 %v7100_v39, %v5880_v36 }
 0x25c   : > { %v1795_v35 = vadd.s32 %v1794_v29, %v1784_v0  ;;  %vm1799_vm13 = vc.u32 %v5939_v27, %v5953_v6  ;;  %v637_v43 = vshrl.u32 %v7098_v7, %v5880_v36  ;;  %v639_v14 = vshll.u32 %v7098_v7, %v5779_v1 }
 0x25d   : > { %v1670_v2 = vmul.f32 %v1669_v37, %v1667_v46  ;;  %v643_v63 = vshrl.u32 %v7101_v53, %v5880_v36  ;;  %v642_v30 = vshll.u32 %v7100_v39, %v5779_v1  ;;  %v645_v51 = vshll.u32 %v7101_v53, %v5779_v1 }
 0x25e   : > { %v1796_v48 = vadd.s32 %v1795_v35, %v1786_v3  ;;  %v646_v19 = vshrl.u32 %v7102_v61, %v5880_v36  ;;  %vm940_vm14 = vcmp.gt.s32.totalorder %v5870_v59, 0  ;;  %v636_v62 = vshll.u32 %v7096_v58, %v5779_v1 }
 0x25f   : > { %v1671_v23 = vxor.u32 2147483648, %v1670_v2  ;;  %v648_v41 = vshll.u32 %v7102_v61, %v5779_v1  ;;  %v649_v56 = vshrl.u32 %v7103_v8, %v5880_v36  ;;  %v5980_v31 = vor.u32 %v640_v28, %v639_v14 }
 0x260   : > { %v1800_v45 = vadd.s32 1, %v1796_v48  ;;  %v5982_v4 = vor.u32 %v643_v63, %v642_v30  ;;  %v647_v52 = vor.u32 %v646_v19, %v645_v51  ;;  %v1797_v13 = vmul.u32 %v5853_v40, %v1743_v42 }
 0x261   : > { %v1672_v10 = vsel %vm1551_vm2, %v1671_v23, %v1670_v2  ;;  %v627_v20 = vor.u32 8388608, %v626_v49  ;;  %v650_v25 = vor.u32 %v649_v56, %v648_v41  ;;  %v5995_v22 = vor.u32 %v637_v43, %v636_v62 }
 0x262   : > { %v5990_v1 = vsel %vm5906_vm8, %v4652_v44, %v1672_v10  ;;  %v1801_v11 = vsel %vm1799_vm13, %v1800_v45, %v1796_v48  ;;  %vm654_vm15 = vcmp.lt.s32.totalorder %v5943_v33, 4  ;;  %vm651_vm0 = vcmp.lt.s32.totalorder %v5943_v33, 1 }
 0x263   : > { %v1677_v18 = vmul.f32 %v5990_v1, %v5990_v1  ;;  %v1802_v12 = vadd.s32 %v1801_v11, %v1797_v13  ;;  %v660_v40 = vsel %vm654_vm15, %v647_v52, 920167782  ;;  %v6003_v38 = vand.u32 3, %v1693_v9 }
 0x264   : > { %vm652_vm1 = vcmp.lt.s32.totalorder %v5943_v33, 2  ;;  %v663_v24 = vsel %vm651_vm0, %v5980_v31, %v5982_v4  ;;  %v664_v32 = vsel %vm654_vm15, %v650_v25, 1326507024  ;;  %vm653_vm2 = vcmp.lt.s32.totalorder %v5943_v33, 3 }
 0x265   : > { %v1678_v5 = vmul.f32 -0.001358992, %v1677_v18  ;;  %v1685_v26 = vmul.f32 -0.00019511016, %v1677_v18  ;;  %v1803_v21 = vadd.s32 536870912, %v1802_v12  ;;  %v659_v17 = vsel %vm651_vm0, %v5995_v22, %v5980_v31 }
 0x266   : > { %v661_v55 = vsel %vm653_vm2, %v5982_v4, %v660_v40  ;;  %v665_v47 = vsel %vm653_vm2, %v647_v52, %v664_v32  ;;  %v6022_v42 = vshll.u32 %v627_v20, 8  ;;  %v6035_v63 = vand.u32 31, %v5948_v54 }
 0x267   : > { %v1679_v0 = vadd.f32 0.041655596, %v1678_v5  ;;  %v1686_v29 = vadd.f32 0.008332121, %v1685_v26  ;;  %v1804_v46 = vshrl.u32 %v1803_v21, 30  ;;  %v666_v37 = vsel %vm652_vm1, %v663_v24, %v665_v47 }
 0x268   : > { %v6027_v9 = vand.u32 65535, %v6022_v42  ;;  %v6030_v3 = vshrl.u32 %v6022_v42, 16  ;;  %v670_v35 = vand.u32 65535, %v666_v37  ;;  %v671_v49 = vshrl.u32 %v666_v37, 16 }
 0x269   : > { %v1680_v28 = vmul.f32 %v1679_v0, %v1677_v18  ;;  %v1687_v2 = vmul.f32 %v1686_v29, %v1677_v18  ;;  %v1805_v43 = vshll.u32 %v1804_v46, 30  ;;  %v662_v14 = vsel %vm652_vm1, %v659_v17, %v661_v55 }
 0x26a   : > { %v6040_v48 = vsel %vm940_vm14, %v5870_v59, 0  ;;  %v673_v30 = vmul.u32 %v671_v49, %v6027_v9  ;;  %v6044_v51 = vmul.u32 %v670_v35, %v6030_v3  ;;  %vm1706_vm3 = vcmp.lt.s32.totalorder %v4775_v60, 0 }
 0x26b   : > { %v1681_v19 = vadd.f32 -0.4999988, %v1680_v28  ;;  %v1688_v23 = vadd.f32 -0.16666654, %v1687_v2  ;;  %v6047_v62 = vsub.s32 %v1802_v12, %v1805_v43  ;;  %vm1696_vm4 = vcmp.eq.s32.totalorder %v6003_v38, 0 }
 0x26c   : > { %v635_v41 = vshrl.u32 %v7096_v58, %v5880_v36  ;;  %v672_v56 = vmul.u32 %v670_v35, %v6027_v9  ;;  %v676_v59 = vshll.u32 %v673_v30, 16  ;;  %v693_v45 = vshrl.u32 %v662_v14, 16 }
 0x26d   : > { %v1682_v52 = vmul.f32 %v1681_v19, %v1677_v18  ;;  %v1689_v10 = vmul.f32 %v1688_v23, %v1677_v18  ;;  %vm1695_vm5 = vcmp.lt.s32.totalorder %v6003_v38, 2  ;;  %vm1807_vm6 = vcmp.lt.s32.totalorder %v6047_v62, 0 }
 0x26e   : > { %v1808_v13 = vsub.s32 0, %v6047_v62  ;;  %vm1692_vm7 = vweird.f32 %v4652_v44  ;;  %v675_v20 = vmul.u32 %v671_v49, %v6030_v3  ;;  %v678_v25 = vshll.u32 %v6044_v51, 16 }
 0x26f   : > { %vm680_vm8 = vc.u32 %v672_v56, %v676_v59  ;;  %v682_v36 = vadd.s32 %v676_v59, %v672_v56  ;;  %v1683_v11 = vadd.f32 1.0, %v1682_v52  ;;  %v1690_v12 = vadd.f32 1.0, %v1689_v10 }
 0x270   : > { %v1809_v40 = vsel %vm1807_vm6, %v1808_v13, %v6047_v62  ;;  %v681_v18 = vsel %vm680_vm8, 1, %v7094_v34  ;;  %v1828_v32 = vsub.s32 4, %v1804_v46  ;;  %v692_v55 = vand.u32 65535, %v662_v14 }
 0x271   : > { %v1810_v24 = vclz %v1809_v40  ;;  %v683_v5 = vadd.s32 %v681_v18, %v675_v20  ;;  %vm684_vm9 = vc.u32 %v682_v36, %v678_v25  ;;  %v1691_v26 = vmul.f32 %v1690_v12, %v5990_v1  ;;  %v7154_v36 = vld [vmem:[#allocation37_spill] sm:$0xff] }
 0x272   : > { %v1700_v21 = vxor.u32 2147483648, %v1683_v11  ;;  %v685_v17 = vsel %vm684_vm9, 1, %v7094_v34  ;;  %vm1699_vm10 = vcmp.eq.s32.totalorder %v6003_v38, 2  ;;  %vm6066_vm11 = vcmp.le.f32.partialorder %v1704_v50, 0.7853982 }
 0x273   : > { %v1798_v0 = vadd.s32 %v5953_v6, %v5939_v27  ;;  %v3635_v29 = vadd.s32 4294967294, %v1810_v24  ;;  %v655_v1 = vsel %vm651_vm0, %v635_v41, %v5995_v22  ;;  %v1697_v37 = vxor.u32 2147483648, %v1691_v26 }
 0x274   : > { %v656_v35 = vsel %vm654_vm15, %v5982_v4, 2102212464  ;;  %v687_v49 = vadd.s32 %v685_v17, %v683_v5  ;;  %v695_v28 = vmul.u32 %v693_v45, %v6027_v9  ;;  %v1701_v50 = vsel %vm1699_vm10, %v1700_v21, %v1691_v26 }
 0x275   : > { %vm3636_vm12 = vcmp.lt.s32.totalorder %v3635_v29, 0  ;;  %v1829_v2 = vsel %vm1706_vm3, %v1828_v32, %v1804_v46  ;;  %v677_v43 = vshrl.u32 %v673_v30, 16  ;;  %v1698_v27 = vsel %vm1696_vm4, %v1683_v11, %v1697_v37 }
 0x276   : > { %v1813_v6 = vsel %vm3636_vm12, 0, %v3635_v29  ;;  %v696_v22 = vmul.u32 %v692_v55, %v6030_v3  ;;  %v698_v14 = vshll.u32 %v695_v28, 16  ;;  %v1702_v19 = vsel %vm1695_vm5, %v1698_v27, %v1701_v50 }
 0x277   : > { %v1814_v4 = vsub.s32 32, %v1813_v6  ;;  %v1818_v23 = vsub.s32 4294967266, %v1813_v6  ;;  %v694_v41 = vmul.u32 %v692_v55, %v6027_v9  ;;  %v1703_v56 = vsel %vm1692_vm7, nan, %v1702_v19 }
 0x278   : > { %v679_v46 = vshrl.u32 %v6044_v51, 16  ;;  %v688_v30 = vadd.s32 %v687_v49, %v677_v43  ;;  %v697_v59 = vmul.u32 %v693_v45, %v6030_v3  ;;  %3188 = vmatpush.msra.mxu2 %v1703_v56  ;;  %v1815_v52 = vshll.u32 %v6047_v62, %v1813_v6 }
 0x279   : > { %v1816_v10 = vshrl.u32 %v1798_v0, %v1814_v4  ;;  %v1819_v13 = vadd.s32 127, %v1818_v23  ;;  %vm702_vm13 = vc.u32 %v694_v41, %v698_v14  ;;  %v700_v38 = vshll.u32 %v696_v22, 16 }
 0x27a   : > { %v703_v20 = vsel %vm702_vm13, 1, %v7094_v34  ;;  %v704_v25 = vadd.s32 %v698_v14, %v694_v41  ;;  %v774_v9 = vand.u32 2147483647, %v7154_v36  ;;  %v657_v51 = vsel %vm653_vm2, %v5980_v31, %v656_v35 }
 0x27b   : > { %v1817_v11 = vor.u32 %v1816_v10, %v1815_v52  ;;  %v1820_v44 = vshll.u32 %v1819_v13, 23  ;;  %v705_v12 = vadd.s32 %v703_v20, %v697_v59  ;;  %v6098_v3 = vsub.s32 32, %v6035_v63 }
 0x27c   : > { %v1831_v62 = vsel %vm6066_vm11, 0, %v1829_v2  ;;  %v6102_v45 = vadd.s32 %v688_v30, %v679_v46  ;;  %vm706_vm14 = vc.u32 %v704_v25, %v700_v38  ;;  %v6105_v40 = vshrl.u32 %v5948_v54, 5 }
 0x27d   : > { %v1821_v18 = vor.u32 4788187, %v1820_v44  ;;  %v707_v24 = vsel %vm706_vm14, 1, %v7094_v34  ;;  %v781_v32 = vand.u32 8388607, %v774_v9  ;;  %v658_v31 = vsel %vm652_vm1, %v655_v1, %v657_v51 }
 0x27e   : > { %v699_v5 = vshrl.u32 %v695_v28, 16  ;;  %v6112_v26 = vadd.s32 %v704_v25, %v700_v38  ;;  %v709_v21 = vadd.s32 %v707_v24, %v705_v12  ;;  %v1824_v55 = vcvt.s32.f32 %v1817_v11 }
 0x27f   : > { %v1822_v17 = vand.u32 2147483647, %v1821_v18  ;;  %v1848_v0 = vadd.s32 3, %v1831_v62  ;;  %v701_v29 = vshrl.u32 %v696_v22, 16  ;;  %v795_v54 = vshrl.u32 %v7100_v39, %v6098_v3 }
 0x280   : > { %v710_v37 = vadd.s32 %v709_v21, %v699_v5  ;;  %vm714_vm15 = vc.u32 %v6102_v45, %v6112_v26  ;;  %v798_v35 = vshrl.u32 %v7101_v53, %v6098_v3  ;;  %v782_v1 = vor.u32 8388608, %v781_v32 }
 0x281   : > { %v1825_v33 = vmul.f32 %v1824_v55, %v1822_v17  ;;  %v800_v49 = vshll.u32 %v7101_v53, %v6035_v63  ;;  %v801_v28 = vshrl.u32 %v7102_v61, %v6098_v3  ;;  %v792_v2 = vshrl.u32 %v7098_v7, %v6098_v3 }
 0x282   : > { %v711_v50 = vadd.s32 %v710_v37, %v701_v29  ;;  %v794_v43 = vshll.u32 %v7098_v7, %v6035_v63  ;;  %v797_v27 = vshll.u32 %v7100_v39, %v6035_v63  ;;  %v803_v14 = vshll.u32 %v7102_v61, %v6035_v63 }
 0x283   : > { %v1826_v6 = vxor.u32 2147483648, %v1825_v33  ;;  %v802_v22 = vor.u32 %v801_v28, %v800_v49  ;;  %v804_v19 = vshrl.u32 %v7103_v8, %v6098_v3  ;;  %v791_v23 = vshll.u32 %v7096_v58, %v6035_v63 }
 0x284   : > { %v715_v4 = vadd.s32 1, %v711_v50  ;;  %v6136_v41 = vor.u32 %v795_v54, %v794_v43  ;;  %v799_v56 = vor.u32 %v798_v35, %v797_v27  ;;  %v6139_v46 = vshrl.u32 %v6040_v48, 5 }
 0x285   : > { %v1827_v30 = vsel %vm1706_vm3, %v1826_v6, %v1825_v33  ;;  %v712_v59 = vmul.u32 %v6022_v42, %v658_v31  ;;  %v805_v52 = vor.u32 %v804_v19, %v803_v14  ;;  %v6152_v13 = vor.u32 %v792_v2, %v791_v23 }
 0x286   : > { %v6147_v10 = vsel %vm6066_vm11, %v4775_v60, %v1827_v30  ;;  %v716_v63 = vsel %vm714_vm15, %v715_v4, %v711_v50  ;;  %vm809_vm0 = vcmp.lt.s32.totalorder %v6105_v40, 4  ;;  %vm806_vm1 = vcmp.lt.s32.totalorder %v6105_v40, 1 }
 0x287   : > { %v1832_v38 = vmul.f32 %v6147_v10, %v6147_v10  ;;  %v717_v20 = vadd.s32 %v716_v63, %v712_v59  ;;  %v815_v42 = vsel %vm809_vm0, %v802_v22, 920167782  ;;  %v6160_v47 = vand.u32 3, %v1848_v0 }
 0x288   : > { %v818_v25 = vsel %vm806_vm1, %v6136_v41, %v799_v56  ;;  %v819_v11 = vsel %vm809_vm0, %v805_v52, 1326507024  ;;  %v6167_v44 = vshll.u32 %v782_v1, 8  ;;  %vm808_vm2 = vcmp.lt.s32.totalorder %v6105_v40, 3 }
 0x289   : > { %v1833_v51 = vmul.f32 -0.001358992, %v1832_v38  ;;  %v1840_v12 = vmul.f32 -0.00019511016, %v1832_v38  ;;  %v718_v62 = vadd.s32 536870912, %v717_v20  ;;  %vm807_vm3 = vcmp.lt.s32.totalorder %v6105_v40, 2 }
 0x28a   : > { %v814_v18 = vsel %vm806_vm1, %v6152_v13, %v6136_v41  ;;  %v816_v24 = vsel %vm808_vm2, %v799_v56, %v815_v42  ;;  %v820_v32 = vsel %vm808_vm2, %v802_v22, %v819_v11  ;;  %v823_v55 = vand.u32 65535, %v6167_v44 }
 0x28b   : > { %v1834_v31 = vadd.f32 0.041655596, %v1833_v51  ;;  %v1841_v5 = vadd.f32 0.008332121, %v1840_v12  ;;  %v6179_v21 = vshrl.u32 %v718_v62, 30  ;;  %v821_v17 = vsel %vm807_vm3, %v818_v25, %v820_v32 }
 0x28c   : > { %v824_v0 = vshrl.u32 %v6167_v44, 16  ;;  %v825_v29 = vand.u32 65535, %v821_v17  ;;  %v826_v37 = vshrl.u32 %v821_v17, 16  ;;  %v817_v1 = vsel %vm807_vm3, %v814_v18, %v816_v24 }
 0x28d   : > { %v1835_v54 = vmul.f32 %v1834_v31, %v1832_v38  ;;  %v1842_v35 = vmul.f32 %v1841_v5, %v1832_v38  ;;  %v720_v33 = vshll.u32 %v6179_v21, 30  ;;  %v6189_v49 = vand.u32 31, %v6040_v48 }
 0x28e   : > { %v790_v28 = vshrl.u32 %v7096_v58, %v6098_v3  ;;  %v828_v50 = vmul.u32 %v826_v37, %v823_v55  ;;  %v6193_v2 = vmul.u32 %v825_v29, %v824_v0  ;;  %v811_v22 = vsel %vm809_vm0, %v799_v56, 2102212464 }
 0x28f   : > { %v1836_v43 = vadd.f32 -0.4999988, %v1835_v54  ;;  %v1843_v27 = vadd.f32 -0.16666654, %v1842_v35  ;;  %v6195_v6 = vsub.s32 %v717_v20, %v720_v33  ;;  %vm1851_vm4 = vcmp.eq.s32.totalorder %v6160_v47, 0 }
 0x290   : > { %vm1854_vm5 = vcmp.eq.s32.totalorder %v6160_v47, 2  ;;  %v827_v14 = vmul.u32 %v825_v29, %v823_v55  ;;  %v831_v48 = vshll.u32 %v828_v50, 16  ;;  %v847_v19 = vand.u32 65535, %v817_v1 }
 0x291   : > { %v848_v4 = vshrl.u32 %v817_v1, 16  ;;  %v1837_v23 = vmul.f32 %v1836_v43, %v1832_v38  ;;  %v1844_v3 = vmul.f32 %v1843_v27, %v1832_v38  ;;  %vm1850_vm6 = vcmp.lt.s32.totalorder %v6160_v47, 2 }
 0x292   : > { %vm722_vm7 = vcmp.lt.s32.totalorder %v6195_v6, 0  ;;  %v723_v30 = vsub.s32 0, %v6195_v6  ;;  %vm1847_vm8 = vweird.f32 %v4775_v60  ;;  %v830_v59 = vmul.u32 %v826_v37, %v824_v0  ;;  %v7155_v60 = vld [vmem:[#allocation38_spill] sm:$0xff] }
 0x293   : > { %v833_v56 = vshll.u32 %v6193_v2, 16  ;;  %vm835_vm9 = vc.u32 %v827_v14, %v831_v48  ;;  %v837_v52 = vadd.s32 %v831_v48, %v827_v14  ;;  %v1838_v63 = vadd.f32 1.0, %v1837_v23 }
 0x294   : > { %v1845_v20 = vadd.f32 1.0, %v1844_v3  ;;  %v724_v42 = vsel %vm722_vm7, %v723_v30, %v6195_v6  ;;  %v836_v25 = vsel %vm835_vm9, 1, %v7094_v34  ;;  %vm1095_vm10 = vcmp.gt.s32.totalorder %v5873_v16, 0 }
 0x295   : > { %vm621_vm11 = vcmp.lt.s32.totalorder %v7151_v15, 0  ;;  %v713_v38 = vadd.s32 %v6112_v26, %v6102_v45  ;;  %v725_v11 = vclz %v724_v42  ;;  %v838_v51 = vadd.s32 %v836_v25, %v830_v59 }
 0x296   : > { %vm839_vm12 = vc.u32 %v837_v52, %v833_v56  ;;  %v1846_v12 = vmul.f32 %v1845_v20, %v6147_v10  ;;  %v1855_v62 = vxor.u32 2147483648, %v1838_v63  ;;  %v850_v24 = vmul.u32 %v848_v4, %v823_v55 }
 0x297   : > { %v840_v18 = vsel %vm839_vm12, 1, %v7094_v34  ;;  %v3614_v32 = vadd.s32 4294967294, %v725_v11  ;;  %v810_v31 = vsel %vm806_vm1, %v790_v28, %v6152_v13  ;;  %v812_v5 = vsel %vm808_vm2, %v6136_v41, %v811_v22 }
 0x298   : > { %v849_v17 = vmul.u32 %v847_v19, %v823_v55  ;;  %v1852_v45 = vxor.u32 2147483648, %v1846_v12  ;;  %v743_v26 = vsub.s32 4, %v6179_v21  ;;  %v842_v29 = vadd.s32 %v840_v18, %v838_v51 }
 0x299   : > { %v851_v37 = vmul.u32 %v847_v19, %v824_v0  ;;  %vm3615_vm13 = vcmp.lt.s32.totalorder %v3614_v32, 0  ;;  %v832_v10 = vshrl.u32 %v828_v50, 16  ;;  %v834_v54 = vshrl.u32 %v6193_v2, 16 }
 0x29a   : > { %v853_v35 = vshll.u32 %v850_v24, 16  ;;  %v1853_v33 = vsel %vm1851_vm4, %v1838_v63, %v1852_v45  ;;  %v1856_v13 = vsel %vm1854_vm5, %v1855_v62, %v1846_v12  ;;  %v728_v1 = vsel %vm3615_vm13, 0, %v3614_v32 }
 0x29b   : > { %v852_v28 = vmul.u32 %v848_v4, %v824_v0  ;;  %v1857_v41 = vsel %vm1850_vm6, %v1853_v33, %v1856_v13  ;;  %v729_v55 = vsub.s32 32, %v728_v1  ;;  %v733_v43 = vsub.s32 4294967266, %v728_v1 }
 0x29c   : > { %v843_v27 = vadd.s32 %v842_v29, %v832_v10  ;;  %v1858_v50 = vsel %vm1847_vm8, nan, %v1857_v41  ;;  %v730_v2 = vshll.u32 %v6195_v6, %v728_v1  ;;  %v855_v22 = vshll.u32 %v851_v37, 16 }
 0x29d   : > { %vm857_vm14 = vc.u32 %v849_v17, %v853_v35  ;;  %3217 = vmatpush.msra.mxu3 %v1858_v50  ;;  %v731_v14 = vshrl.u32 %v713_v38, %v729_v55  ;;  %v734_v48 = vadd.s32 127, %v733_v43  ;;  %v859_v23 = vadd.s32 %v853_v35, %v849_v17 }
 0x29e   : > { %v858_v19 = vsel %vm857_vm14, 1, %v7094_v34  ;;  %v6233_v0 = vsub.s32 32, %v6189_v49  ;;  %v744_v47 = vsel %vm621_vm11, %v743_v26, %v6179_v21  ;;  %v929_v3 = vand.u32 2147483647, %v7155_v60 }
 0x29f   : > { %v860_v4 = vadd.s32 %v858_v19, %v852_v28  ;;  %v732_v30 = vor.u32 %v731_v14, %v730_v2  ;;  %v735_v6 = vshll.u32 %v734_v48, 23  ;;  %v6239_v59 = vadd.s32 %v843_v27, %v834_v54 }
 0x2a0   : > { %vm861_vm15 = vc.u32 %v859_v23, %v855_v22  ;;  %v6244_v56 = vsel %vm1095_vm10, %v5873_v16, 0  ;;  %vm6248_vm0 = vcmp.le.f32.partialorder %v619_v57, 0.7853982  ;;  %v813_v21 = vsel %vm807_vm3, %v810_v31, %v812_v5 }
 0x2a1   : > { %v862_v63 = vsel %vm861_vm15, 1, %v7094_v34  ;;  %v736_v20 = vor.u32 4788187, %v735_v6  ;;  %v854_v42 = vshrl.u32 %v850_v24, 16  ;;  %v6255_v25 = vadd.s32 %v859_v23, %v855_v22 }
 0x2a2   : > { %v864_v38 = vadd.s32 %v862_v63, %v860_v4  ;;  %v739_v11 = vcvt.s32.f32 %v732_v30  ;;  %v746_v16 = vsel %vm6248_vm0, 0, %v744_v47  ;;  %v856_v51 = vshrl.u32 %v851_v37, 16 }
 0x2a3   : > { %v936_v57 = vand.u32 8388607, %v929_v3  ;;  %v737_v12 = vand.u32 2147483647, %v736_v20  ;;  %vm869_vm1 = vc.u32 %v6239_v59, %v6255_v25  ;;  %v947_v40 = vshrl.u32 %v7098_v7, %v6233_v0 }
 0x2a4   : > { %v865_v62 = vadd.s32 %v864_v38, %v854_v42  ;;  %v949_v18 = vshll.u32 %v7098_v7, %v6189_v49  ;;  %v950_v24 = vshrl.u32 %v7100_v39, %v6233_v0  ;;  %v952_v32 = vshll.u32 %v7100_v39, %v6189_v49 }
 0x2a5   : > { %v953_v31 = vshrl.u32 %v7101_v53, %v6233_v0  ;;  %v740_v5 = vmul.f32 %v739_v11, %v737_v12  ;;  %v955_v45 = vshll.u32 %v7101_v53, %v6189_v49  ;;  %v956_v26 = vshrl.u32 %v7102_v61, %v6233_v0 }
 0x2a6   : > { %v866_v17 = vadd.s32 %v865_v62, %v856_v51  ;;  %v946_v29 = vshll.u32 %v7096_v58, %v6189_v49  ;;  %v6279_v37 = vor.u32 %v950_v24, %v949_v18  ;;  %v958_v10 = vshll.u32 %v7102_v61, %v6189_v49 }
 0x2a7   : > { %v959_v54 = vshrl.u32 %v7103_v8, %v6233_v0  ;;  %v741_v35 = vxor.u32 2147483648, %v740_v5  ;;  %v6285_v13 = vor.u32 %v953_v31, %v952_v32  ;;  %v957_v1 = vor.u32 %v956_v26, %v955_v45 }
 0x2a8   : > { %v870_v33 = vadd.s32 1, %v866_v17  ;;  %v6288_v28 = vand.u32 31, %v6244_v56  ;;  %v867_v41 = vmul.u32 %v6167_v44, %v813_v21  ;;  %v937_v55 = vor.u32 8388608, %v936_v57 }
 0x2a9   : > { %v960_v43 = vor.u32 %v959_v54, %v958_v10  ;;  %v742_v27 = vsel %vm621_vm11, %v741_v35, %v740_v5  ;;  %v763_v50 = vadd.s32 3, %v746_v16  ;;  %v6296_v2 = vor.u32 %v947_v40, %v946_v29 }
 0x2aa   : > { %v871_v49 = vsel %vm869_vm1, %v870_v33, %v866_v17  ;;  %v745_v22 = vsel %vm6248_vm0, %v7151_v15, %v742_v27  ;;  %vm961_vm2 = vcmp.lt.s32.totalorder %v6139_v46, 1  ;;  %vm964_vm3 = vcmp.lt.s32.totalorder %v6139_v46, 4 }
 0x2ab   : > { %v872_v14 = vadd.s32 %v871_v49, %v867_v41  ;;  %v747_v44 = vmul.f32 %v745_v22, %v745_v22  ;;  %vm962_vm4 = vcmp.lt.s32.totalorder %v6139_v46, 2  ;;  %v970_v48 = vsel %vm964_vm3, %v957_v1, 920167782 }
 0x2ac   : > { %v973_v19 = vsel %vm961_vm2, %v6279_v37, %v6285_v13  ;;  %vm963_vm5 = vcmp.lt.s32.totalorder %v6139_v46, 3  ;;  %v974_v47 = vsel %vm964_vm3, %v960_v43, 1326507024  ;;  %v6313_v4 = vshll.u32 %v937_v55, 8 }
 0x2ad   : > { %v873_v23 = vadd.s32 536870912, %v872_v14  ;;  %v748_v30 = vmul.f32 -0.001358992, %v747_v44  ;;  %v755_v6 = vmul.f32 -0.00019511016, %v747_v44  ;;  %v969_v52 = vsel %vm961_vm2, %v6296_v2, %v6279_v37 }
 0x2ae   : > { %v975_v21 = vsel %vm963_vm5, %v957_v1, %v974_v47  ;;  %v971_v20 = vsel %vm963_vm5, %v6285_v13, %v970_v48  ;;  %v978_v38 = vand.u32 65535, %v6313_v4  ;;  %v764_v12 = vand.u32 3, %v763_v50 }
 0x2af   : > { %v6321_v63 = vshrl.u32 %v873_v23, 30  ;;  %v976_v42 = vsel %vm962_vm4, %v973_v19, %v975_v21  ;;  %v749_v11 = vadd.f32 0.041655596, %v748_v30  ;;  %v756_v16 = vadd.f32 0.008332121, %v755_v6 }
 0x2b0   : > { %v980_v51 = vand.u32 65535, %v976_v42  ;;  %v981_v57 = vshrl.u32 %v976_v42, 16  ;;  %v979_v40 = vshrl.u32 %v6313_v4, 16  ;;  %v972_v5 = vsel %vm962_vm4, %v969_v52, %v971_v20 }
 0x2b1   : > { %v875_v62 = vshll.u32 %v6321_v63, 30  ;;  %v750_v18 = vmul.f32 %v749_v11, %v747_v44  ;;  %v757_v24 = vmul.f32 %v756_v16, %v747_v44  ;;  %v6338_v45 = vsub.s32 32, %v6288_v28 }
 0x2b2   : > { %v983_v32 = vmul.u32 %v981_v57, %v978_v38  ;;  %v6335_v17 = vmul.u32 %v980_v51, %v979_v40  ;;  %vm766_vm6 = vcmp.eq.s32.totalorder %v764_v12, 0  ;;  %v982_v35 = vmul.u32 %v980_v51, %v978_v38 }
 0x2b3   : > { %v6331_v31 = vsub.s32 %v872_v14, %v875_v62  ;;  %v751_v26 = vadd.f32 -0.4999988, %v750_v18  ;;  %v758_v29 = vadd.f32 -0.16666654, %v757_v24  ;;  %vm765_vm8 = vcmp.lt.s32.totalorder %v764_v12, 2 }
 0x2b4   : > { %v986_v10 = vshll.u32 %v983_v32, 16  ;;  %v985_v41 = vmul.u32 %v981_v57, %v979_v40  ;;  %v1003_v55 = vshrl.u32 %v972_v5, 16  ;;  %vm762_vm9 = vweird.f32 %v7151_v15 }
 0x2b5   : > { %vm877_vm7 = vcmp.lt.s32.totalorder %v6331_v31, 0  ;;  %v878_v54 = vsub.s32 0, %v6331_v31  ;;  %v752_v33 = vmul.f32 %v751_v26, %v747_v44  ;;  %v759_v1 = vmul.f32 %v758_v29, %v747_v44 }
 0x2b6   : > { %v988_v27 = vshll.u32 %v6335_v17, 16  ;;  %vm990_vm10 = vc.u32 %v982_v35, %v986_v10  ;;  %v992_v50 = vadd.s32 %v986_v10, %v982_v35  ;;  %vm769_vm11 = vcmp.eq.s32.totalorder %v764_v12, 2 }
 0x2b7   : > { %v879_v43 = vsel %vm877_vm7, %v878_v54, %v6331_v31  ;;  %v753_v49 = vadd.f32 1.0, %v752_v33  ;;  %v760_v14 = vadd.f32 1.0, %v759_v1  ;;  %v991_v19 = vsel %vm990_vm10, 1, %v7094_v34 }
 0x2b8   : > { %v880_v48 = vclz %v879_v43  ;;  %v868_v44 = vadd.s32 %v6255_v25, %v6239_v59  ;;  %v993_v23 = vadd.s32 %v991_v19, %v985_v41  ;;  %v1002_v47 = vand.u32 65535, %v972_v5 }
 0x2b9   : > { %v761_v30 = vmul.f32 %v760_v14, %v745_v22  ;;  %v770_v6 = vxor.u32 2147483648, %v753_v49  ;;  %vm776_vm12 = vcmp.lt.s32.totalorder %v7154_v36, 0  ;;  %vm994_vm13 = vc.u32 %v992_v50, %v988_v27 }
 0x2ba   : > { %v3617_v52 = vadd.s32 4294967294, %v880_v48  ;;  %v898_v21 = vsub.s32 4, %v6321_v63  ;;  %v966_v20 = vsel %vm964_vm3, %v6285_v13, 2102212464  ;;  %v995_v42 = vsel %vm994_vm13, 1, %v7094_v34 }
 0x2bb   : > { %v1005_v11 = vmul.u32 %v1003_v55, %v978_v38  ;;  %v767_v16 = vxor.u32 2147483648, %v761_v30  ;;  %v987_v59 = vshrl.u32 %v983_v32, 16  ;;  %v997_v25 = vadd.s32 %v995_v42, %v993_v23 }
 0x2bc   : > { %vm3618_vm14 = vcmp.lt.s32.totalorder %v3617_v52, 0  ;;  %v1004_v22 = vmul.u32 %v1002_v47, %v978_v38  ;;  %v1006_v57 = vmul.u32 %v1002_v47, %v979_v40  ;;  %v771_v24 = vsel %vm769_vm11, %v770_v6, %v761_v30 }
 0x2bd   : > { %v883_v51 = vsel %vm3618_vm14, 0, %v3617_v52  ;;  %v1008_v62 = vshll.u32 %v1005_v11, 16  ;;  %v768_v18 = vsel %vm766_vm6, %v753_v49, %v767_v16  ;;  %v998_v10 = vadd.s32 %v997_v25, %v987_v59 }
 0x2be   : > { %v884_v5 = vsub.s32 32, %v883_v51  ;;  %v888_v26 = vsub.s32 4294967266, %v883_v51  ;;  %v772_v29 = vsel %vm765_vm8, %v768_v18, %v771_v24  ;;  %v885_v13 = vshll.u32 %v6331_v31, %v883_v51 }
 0x2bf   : > { %v1007_v54 = vmul.u32 %v1003_v55, %v979_v40  ;;  %v773_v32 = vsel %vm762_vm9, nan, %v772_v29  ;;  %vm1012_vm15 = vc.u32 %v1004_v22, %v1008_v62  ;;  %v945_v38 = vshrl.u32 %v7096_v58, %v6233_v0 }
 0x2c0   : > { %v886_v35 = vshrl.u32 %v868_v44, %v884_v5  ;;  %v889_v33 = vadd.s32 127, %v888_v26  ;;  %3131 = vmatpush.msra.mxu0 %v773_v32  ;;  %v1010_v1 = vshll.u32 %v1006_v57, 16  ;;  %v1013_v41 = vsel %vm1012_vm15, 1, %v7094_v34 }
 0x2c1   : > { %v1014_v43 = vadd.s32 %v1008_v62, %v1004_v22  ;;  %v989_v31 = vshrl.u32 %v6335_v17, 16  ;;  %v1015_v50 = vadd.s32 %v1013_v41, %v1007_v54  ;;  %v899_v15 = vsel %vm776_vm12, %v898_v21, %v6321_v63  ;;  %v7158_v17 = vld [vmem:[#allocation39_spill] sm:$0xff] }
 0x2c2   : > { %v887_v12 = vor.u32 %v886_v35, %v885_v13  ;;  %v890_v27 = vshll.u32 %v889_v33, 23  ;;  %v965_v40 = vsel %vm961_vm2, %v945_v38, %v6296_v2  ;;  %v967_v0 = vsel %vm963_vm5, %v6279_v37, %v966_v20 }
 0x2c3   : > { %vm1016_vm0 = vc.u32 %v1014_v43, %v1010_v1  ;;  %v6373_v49 = vadd.s32 %v998_v10, %v989_v31  ;;  %v1084_v48 = vand.u32 2147483647, %v7158_v17  ;;  %v6378_v19 = vshrl.u32 %v6244_v56, 5 }
 0x2c4   : > { %v891_v55 = vor.u32 4788187, %v890_v27  ;;  %v1017_v14 = vsel %vm1016_vm0, 1, %v7094_v34  ;;  %vm6382_vm1 = vcmp.le.f32.partialorder %v774_v9, 0.7853982  ;;  %v1009_v2 = vshrl.u32 %v1005_v11, 16 }
 0x2c5   : > { %v1019_v44 = vadd.s32 %v1017_v14, %v1015_v50  ;;  %v894_v23 = vcvt.s32.f32 %v887_v12  ;;  %v968_v47 = vsel %vm962_vm4, %v965_v40, %v967_v0  ;;  %v6388_v30 = vadd.s32 %v1014_v43, %v1010_v1 }
 0x2c6   : > { %v892_v37 = vand.u32 2147483647, %v891_v55  ;;  %v901_v6 = vsel %vm6382_vm1, 0, %v899_v15  ;;  %v1011_v56 = vshrl.u32 %v1006_v57, 16  ;;  %v1105_v9 = vshrl.u32 %v7100_v39, %v6338_v45 }
 0x2c7   : > { %v1020_v52 = vadd.s32 %v1019_v44, %v1009_v2  ;;  %vm1024_vm2 = vc.u32 %v6373_v49, %v6388_v30  ;;  %v1091_v20 = vand.u32 8388607, %v1084_v48  ;;  %v1108_v46 = vshrl.u32 %v7101_v53, %v6338_v45 }
 0x2c8   : > { %v895_v21 = vmul.f32 %v894_v23, %v892_v37  ;;  %v1104_v11 = vshll.u32 %v7098_v7, %v6288_v28  ;;  %v1107_v16 = vshll.u32 %v7100_v39, %v6288_v28  ;;  %v1111_v59 = vshrl.u32 %v7102_v61, %v6338_v45 }
 0x2c9   : > { %v1021_v42 = vadd.s32 %v1020_v52, %v1011_v56  ;;  %v1102_v51 = vshrl.u32 %v7098_v7, %v6338_v45  ;;  %v1113_v22 = vshll.u32 %v7102_v61, %v6288_v28  ;;  %v1114_v57 = vshrl.u32 %v7103_v8, %v6338_v45 }
 0x2ca   : > { %v896_v25 = vxor.u32 2147483648, %v895_v21  ;;  %v6412_v18 = vor.u32 %v1105_v9, %v1104_v11  ;;  %v6414_v24 = vor.u32 %v1108_v46, %v1107_v16  ;;  %v1110_v39 = vshll.u32 %v7101_v53, %v6288_v28 }
 0x2cb   : > { %v1025_v62 = vadd.s32 1, %v1021_v42  ;;  %v1022_v26 = vmul.u32 %v6313_v4, %v968_v47  ;;  %v1101_v7 = vshll.u32 %v7096_v58, %v6288_v28  ;;  %v1115_v61 = vor.u32 %v1114_v57, %v1113_v22 }
 0x2cc   : > { %v897_v5 = vsel %vm776_vm12, %v896_v25, %v895_v21  ;;  %v1092_v13 = vor.u32 8388608, %v1091_v20  ;;  %v1112_v10 = vor.u32 %v1111_v59, %v1110_v39  ;;  %vm1116_vm3 = vcmp.lt.s32.totalorder %v6378_v19, 1 }
 0x2cd   : > { %v900_v8 = vsel %vm6382_vm1, %v7154_v36, %v897_v5  ;;  %v1026_v29 = vsel %vm1024_vm2, %v1025_v62, %v1021_v42  ;;  %vm1119_vm4 = vcmp.lt.s32.totalorder %v6378_v19, 4  ;;  %v918_v4 = vadd.s32 3, %v901_v6 }
 0x2ce   : > { %v902_v53 = vmul.f32 %v900_v8, %v900_v8  ;;  %v1027_v54 = vadd.s32 %v1026_v29, %v1022_v26  ;;  %v6431_v32 = vor.u32 %v1102_v51, %v1101_v7  ;;  %v1128_v28 = vsel %vm1116_vm3, %v6412_v18, %v6414_v24 }
 0x2cf   : > { %v1129_v35 = vsel %vm1119_vm4, %v1115_v61, 1326507024  ;;  %vm1118_vm5 = vcmp.lt.s32.totalorder %v6378_v19, 3  ;;  %vm1117_vm6 = vcmp.lt.s32.totalorder %v6378_v19, 2  ;;  %v1125_v41 = vsel %vm1119_vm4, %v1112_v10, 920167782 }
 0x2d0   : > { %v903_v33 = vmul.f32 -0.001358992, %v902_v53  ;;  %v910_v38 = vmul.f32 -0.00019511016, %v902_v53  ;;  %v1028_v1 = vadd.s32 536870912, %v1027_v54  ;;  %v1130_v43 = vsel %vm1118_vm5, %v1112_v10, %v1129_v35 }
 0x2d1   : > { %v6445_v12 = vshll.u32 %v1092_v13, 8  ;;  %v1131_v15 = vsel %vm1117_vm6, %v1128_v28, %v1130_v43  ;;  %v1124_v37 = vsel %vm1116_vm3, %v6431_v32, %v6412_v18  ;;  %v1126_v9 = vsel %vm1118_vm5, %v6414_v24, %v1125_v41 }
 0x2d2   : > { %v904_v27 = vadd.f32 0.041655596, %v903_v33  ;;  %v911_v31 = vadd.f32 0.008332121, %v910_v38  ;;  %v6447_v50 = vshrl.u32 %v1028_v1, 30  ;;  %v1135_v55 = vand.u32 65535, %v1131_v15 }
 0x2d3   : > { %v1133_v40 = vand.u32 65535, %v6445_v12  ;;  %v1134_v0 = vshrl.u32 %v6445_v12, 16  ;;  %v1136_v14 = vshrl.u32 %v1131_v15, 16  ;;  %v919_v21 = vand.u32 3, %v918_v4 }
 0x2d4   : > { %v905_v63 = vmul.f32 %v904_v27, %v902_v53  ;;  %v912_v2 = vmul.f32 %v911_v31, %v902_v53  ;;  %v1030_v44 = vshll.u32 %v6447_v50, 30  ;;  %v1127_v59 = vsel %vm1117_vm6, %v1124_v37, %v1126_v9 }
 0x2d5   : > { %v1138_v23 = vmul.u32 %v1136_v14, %v1133_v40  ;;  %v6458_v47 = vmul.u32 %v1135_v55, %v1134_v0  ;;  %v1137_v20 = vmul.u32 %v1135_v55, %v1133_v40  ;;  %v1140_v26 = vmul.u32 %v1136_v14, %v1134_v0 }
 0x2d6   : > { %v906_v6 = vadd.f32 -0.4999988, %v905_v63  ;;  %v913_v56 = vadd.f32 -0.16666654, %v912_v2  ;;  %v1031_v52 = vsub.s32 %v1027_v54, %v1030_v44  ;;  %v1157_v29 = vand.u32 65535, %v1127_v59 }
 0x2d7   : > { %v1141_v46 = vshll.u32 %v1138_v23, 16  ;;  %v1143_v25 = vshll.u32 %v6458_v47, 16  ;;  %vm917_vm10 = vweird.f32 %v7154_v36  ;;  %vm920_vm11 = vcmp.lt.s32.totalorder %v919_v21, 2 }
 0x2d8   : > { %v907_v42 = vmul.f32 %v906_v6, %v902_v53  ;;  %v914_v11 = vmul.f32 %v913_v56, %v902_v53  ;;  %vm1032_vm7 = vcmp.lt.s32.totalorder %v1031_v52, 0  ;;  %v1033_v16 = vsub.s32 0, %v1031_v52 }
 0x2d9   : > { %vm1145_vm8 = vc.u32 %v1137_v20, %v1141_v46  ;;  %v1147_v51 = vadd.s32 %v1141_v46, %v1137_v20  ;;  %vm924_vm12 = vcmp.eq.s32.totalorder %v919_v21, 2  ;;  %v1158_v4 = vshrl.u32 %v1127_v59, 16 }
 0x2da   : > { %v908_v22 = vadd.f32 1.0, %v907_v42  ;;  %v915_v57 = vadd.f32 1.0, %v914_v11  ;;  %v1034_v62 = vsel %vm1032_vm7, %v1033_v16, %v1031_v52  ;;  %v1146_v39 = vsel %vm1145_vm8, 1, %v7094_v34 }
 0x2db   : > { %v1035_v5 = vclz %v1034_v62  ;;  %vm1149_vm9 = vc.u32 %v1147_v51, %v1143_v25  ;;  %v1148_v10 = vadd.s32 %v1146_v39, %v1140_v26  ;;  %vm921_vm13 = vcmp.eq.s32.totalorder %v919_v21, 0  ;;  %v3101_v39 = vld [vmem:[%s6971_s2 + $0x10] sm:$0xff] }
 0x2dc   : > { %v916_v7 = vmul.f32 %v915_v57, %v900_v8  ;;  %v925_v61 = vxor.u32 2147483648, %v908_v22  ;;  %v1150_v54 = vsel %vm1149_vm9, 1, %v7094_v34  ;;  %v1023_v35 = vadd.s32 %v6388_v30, %v6373_v49 }
 0x2dd   : > { %v3620_v13 = vadd.s32 4294967294, %v1035_v5  ;;  %v1160_v38 = vmul.u32 %v1158_v4, %v1133_v40  ;;  %v1161_v1 = vmul.u32 %v1157_v29, %v1134_v0  ;;  %v1152_v31 = vadd.s32 %v1150_v54, %v1148_v10 }
 0x2de   : > { %v922_v53 = vxor.u32 2147483648, %v916_v7  ;;  %v926_v28 = vsel %vm924_vm12, %v925_v61, %v916_v7  ;;  %v1159_v55 = vmul.u32 %v1157_v29, %v1133_v40  ;;  %v1142_v37 = vshrl.u32 %v1138_v23, 16 }
 0x2df   : > { %vm3621_vm14 = vcmp.lt.s32.totalorder %v3620_v13, 0  ;;  %v1163_v14 = vshll.u32 %v1160_v38, 16  ;;  %v1162_v49 = vmul.u32 %v1158_v4, %v1134_v0  ;;  %v1165_v30 = vshll.u32 %v1161_v1, 16 }
 0x2e0   : > { %v923_v33 = vsel %vm921_vm13, %v908_v22, %v922_v53  ;;  %v1038_v8 = vsel %vm3621_vm14, 0, %v3620_v13  ;;  %v1153_v21 = vadd.s32 %v1152_v31, %v1142_v37  ;;  %v1100_v36 = vshrl.u32 %v7096_v58, %v6338_v45 }
 0x2e1   : > { %v927_v41 = vsel %vm920_vm11, %v923_v33, %v926_v28  ;;  %v1039_v43 = vsub.s32 32, %v1038_v8  ;;  %v1043_v27 = vsub.s32 4294967266, %v1038_v8  ;;  %v1040_v63 = vshll.u32 %v1031_v52, %v1038_v8 }
 0x2e2   : > { %v928_v15 = vsel %vm917_vm10, nan, %v927_v41  ;;  %vm1167_vm15 = vc.u32 %v1159_v55, %v1163_v14  ;;  %v1169_v6 = vadd.s32 %v1163_v14, %v1159_v55  ;;  %v1121_v40 = vsel %vm1119_vm4, %v6414_v24, 2102212464 }
 0x2e3   : > { %3160 = vmatpush.msra.mxu1 %v928_v15  ;;  %v1041_v2 = vshrl.u32 %v1023_v35, %v1039_v43  ;;  %v1044_v44 = vadd.s32 127, %v1043_v27  ;;  %v1168_v20 = vsel %vm1167_vm15, 1, %v7094_v34  ;;  %v1144_v0 = vshrl.u32 %v6458_v47, 16 }
 0x2e4   : > { %v1170_v52 = vadd.s32 %v1168_v20, %v1162_v49  ;;  %vm1171_vm0 = vc.u32 %v1169_v6, %v1165_v30  ;;  %v1120_v42 = vsel %vm1116_vm3, %v1100_v36, %v6431_v32  ;;  %v1164_v11 = vshrl.u32 %v1160_v38, 16 }
 0x2e5   : > { %v1042_v56 = vor.u32 %v1041_v2, %v1040_v63  ;;  %v1045_v9 = vshll.u32 %v1044_v44, 23  ;;  %v1172_v23 = vsel %vm1171_vm0, 1, %v7094_v34  ;;  %v1122_v58 = vsel %vm1118_vm5, %v6412_v18, %v1121_v40 }
 0x2e6   : > { %v1174_v16 = vadd.s32 %v1172_v23, %v1170_v52  ;;  %v1154_v45 = vadd.s32 %v1153_v21, %v1144_v0  ;;  %v1166_v24 = vshrl.u32 %v1161_v1, 16  ;;  %v1173_v57 = vadd.s32 %v1169_v6, %v1165_v30 }
 0x2e7   : > { %v1046_v46 = vor.u32 4788187, %v1045_v9  ;;  %v1049_v25 = vcvt.s32.f32 %v1042_v56  ;;  %v1123_v34 = vsel %vm1117_vm6, %v1120_v42, %v1122_v58  ;;  %vm931_vm2 = vcmp.lt.s32.totalorder %v7155_v60, 0 }
 0x2e8   : > { %v1175_v51 = vadd.s32 %v1174_v16, %v1164_v11  ;;  %vm1179_vm1 = vc.u32 %v1154_v45, %v1173_v57  ;;  %vm6492_vm3 = vcmp.le.f32.partialorder %v929_v3, 0.7853982  ;;  %v1177_v5 = vmul.u32 %v6445_v12, %v1123_v34 }
 0x2e9   : > { %v1047_v59 = vand.u32 2147483647, %v1046_v46  ;;  %v1053_v26 = vsub.s32 4, %v6447_v50  ;;  %vm1072_vm5 = vweird.f32 %v7155_v60  ;;  %v1178_v20 = vadd.s32 %v1173_v57, %v1154_v45  ;;  %v3100_v45 = vld [vmem:[%s6971_s2 + $0x8] sm:$0xff] }
 0x2ea   : > { %v1176_v47 = vadd.s32 %v1175_v51, %v1166_v24  ;;  %vm3103_vm10 = vcmask 261120   ;;  %vm1086_vm11 = vcmp.lt.s32.totalorder %v7158_v17, 0  ;;  %vm6525_vm12 = vcmp.le.f32.partialorder %v1084_v48, 0.7853982  ;;  %v7172_v51 = vld [vmem:[#allocation6_spill] sm:$0xff] }
 0x2eb   : > { %v1050_v22 = vmul.f32 %v1049_v25, %v1047_v59  ;;  %v1054_v3 = vsel %vm931_vm2, %v1053_v26, %v6447_v50  ;;  %vm1227_vm0 = vweird.f32 %v7158_v17 }
 0x2ec   : > { %v1180_v32 = vadd.s32 1, %v1176_v47  ;;  %v1056_v12 = vsel %vm6492_vm3, 0, %v1054_v3 }
 0x2ed   : > { %v1051_v62 = vxor.u32 2147483648, %v1050_v22  ;;  %v1073_v43 = vadd.s32 3, %v1056_v12 }
 0x2ee   : > { %v1181_v7 = vsel %vm1179_vm1, %v1180_v32, %v1176_v47 }
 0x2ef   : > { %v1052_v18 = vsel %vm931_vm2, %v1051_v62, %v1050_v22  ;;  %v1182_v29 = vadd.s32 %v1181_v7, %v1177_v5  ;;  %v1074_v63 = vand.u32 3, %v1073_v43 }
 0x2f0   : > { %v1055_v19 = vsel %vm6492_vm3, %v7155_v60, %v1052_v18  ;;  %v6511_v60 = vld [vmem:[%s6971_s2] sm:$0xff] }
 0x2f1   : > { %v1057_v61 = vmul.f32 %v1055_v19, %v1055_v19  ;;  %v1183_v53 = vadd.s32 536870912, %v1182_v29  ;;  %vm1076_vm6 = vcmp.eq.s32.totalorder %v1074_v63, 0  ;;  %vm1079_vm7 = vcmp.eq.s32.totalorder %v1074_v63, 2  ;;  %3661 = vmatmul.msk.f32.vlgmr.msra.gmra.mxu0 %vm3103_vm10, %v6511_v60  ;;  %3665 = vmatmul.msk.f32.vlgmr.msra.gmra.mxu1 %vm3103_vm10, %v6511_v60 }
 0x2f2   : > { %vm1075_vm9 = vcmp.lt.s32.totalorder %v1074_v63, 2 }
 0x2f3   : > { %v1058_v13 = vmul.f32 -0.001358992, %v1057_v61  ;;  %v1065_v10 = vmul.f32 -0.00019511016, %v1057_v61  ;;  %v6502_v28 = vshrl.u32 %v1183_v53, 30 }
 0x2f5   : > { %v1059_v54 = vadd.f32 0.041655596, %v1058_v13  ;;  %v1066_v4 = vadd.f32 0.008332121, %v1065_v10  ;;  %v1185_v8 = vshll.u32 %v6502_v28, 30  ;;  %v1208_v57 = vsub.s32 4, %v6502_v28 }
 0x2f7   : > { %v1060_v35 = vmul.f32 %v1059_v54, %v1057_v61  ;;  %v1067_v33 = vmul.f32 %v1066_v4, %v1057_v61  ;;  %v1186_v41 = vsub.s32 %v1182_v29, %v1185_v8  ;;  %v1209_v48 = vsel %vm1086_vm11, %v1208_v57, %v6502_v28  ;;  %v3102_v54 = vld [vmem:[%s6971_s2 + $0x18] sm:$0xff]  ;;  %v3250_v8 = vld [vmem:[%s6972_s3 + $0x10] sm:$0xff] }
 0x2f8   : > { %v1211_v26 = vsel %vm6525_vm12, 0, %v1209_v48  ;;  %3264 = vperm.xlu1 %3762, %v3250_v8   ;;  %v7173_v57 = vld [vmem:[#allocation7_spill] sm:$0xff] }
 0x2f9   : > { %v1061_v38 = vadd.f32 -0.4999988, %v1060_v35  ;;  %v1068_v1 = vadd.f32 -0.16666654, %v1067_v33  ;;  %vm1187_vm4 = vcmp.lt.s32.totalorder %v1186_v41, 0  ;;  %v1188_v15 = vsub.s32 0, %v1186_v41  ;;  %3662 = vmatmul.msk.f32.gmra.mxu0 %vm3103_vm10, %v3100_v45  ;;  %3666 = vmatmul.msk.f32.gmra.mxu1 %vm3103_vm10, %v3100_v45 }
 0x2fa   : > { %v1228_v10 = vadd.s32 3, %v1211_v26  ;;  %v7176_v26 = vld [vmem:[#allocation8_spill] sm:$0xff] }
 0x2fb   : > { %v1062_v27 = vmul.f32 %v1061_v38, %v1057_v61  ;;  %v1069_v31 = vmul.f32 %v1068_v1, %v1057_v61  ;;  %v1189_v14 = vsel %vm1187_vm4, %v1188_v15, %v1186_v41  ;;  %v3249_v61 = vld [vmem:[%s6972_s3 + $0x8] sm:$0xff]  ;;  %v3248_v38 = vld [vmem:[%s6972_s3] sm:$0xff]  ;;  %v3251_v15 = vld [vmem:[%s6972_s3 + $0x18] sm:$0xff] }
 0x2fc   : > { %v1190_v2 = vclz %v1189_v14  ;;  %3259 = vperm.xlu0 %3761, %v3249_v61   ;;  %v1229_v12 = vand.u32 3, %v1228_v10  ;;  %3254 = vperm.xlu2 %3760, %v3248_v38  }
 0x2fd   : > { %v1063_v50 = vadd.f32 1.0, %v1062_v27  ;;  %v1070_v55 = vadd.f32 1.0, %v1069_v31 }
 0x2fe   : > { %v3623_v49 = vadd.s32 4294967294, %v1190_v2  ;;  %vm1231_vm13 = vcmp.eq.s32.totalorder %v1229_v12, 0  ;;  %vm1234_vm14 = vcmp.eq.s32.totalorder %v1229_v12, 2  ;;  %vm1230_vm15 = vcmp.lt.s32.totalorder %v1229_v12, 2  ;;  %v6579_v2 = vpop.permute.xlu0 %221 }
 0x2ff   : > { %v1071_v44 = vmul.f32 %v1070_v55, %v1055_v19  ;;  %v1080_v37 = vxor.u32 2147483648, %v1063_v50  ;;  %v6573_v55 = vpop.permute.xlu1 %211 }
 0x300   : > { %vm3624_vm8 = vcmp.lt.s32.totalorder %v3623_v49, 0 }
 0x301   : > { %v1077_v30 = vxor.u32 2147483648, %v1071_v44  ;;  %v1081_v56 = vsel %vm1079_vm7, %v1080_v37, %v1071_v44  ;;  %v1193_v9 = vsel %vm3624_vm8, 0, %v3623_v49  ;;  %3663 = vmatmul.msk.f32.gmra.mxu0 %vm3103_vm10, %v3101_v39  ;;  %3667 = vmatmul.msk.f32.gmra.mxu1 %vm3103_vm10, %v3101_v39 }
 0x302   : > { %v1194_v36 = vsub.s32 32, %v1193_v9  ;;  %v1198_v40 = vsub.s32 4294967266, %v1193_v9  ;;  %v1195_v46 = vshll.u32 %v1186_v41, %v1193_v9  ;;  %v7166_v9 = vld [vmem:[#allocation16_spill] sm:$0xff] }
 0x303   : > { %v1078_v6 = vsel %vm1076_vm6, %v1063_v50, %v1077_v30  ;;  %v6569_v50 = vpop.permute.xlu2 %216 }
 0x304   : > { %v1082_v21 = vsel %vm1075_vm9, %v1078_v6, %v1081_v56  ;;  %v1196_v0 = vshrl.u32 %v1178_v20, %v1194_v36  ;;  %v1199_v23 = vadd.s32 127, %v1198_v40  ;;  %3269 = vperm.xlu2 %3760, %v3251_v15   ;;  %v7165_v6 = vld [vmem:[#allocation15_spill] sm:$0xff]  ;;  %v7167_v20 = vld [vmem:[#allocation13_spill] sm:$0xff]  ;;  %v7168_v40 = vld [vmem:[#allocation14_spill] sm:$0xff] }
 0x305   : > { %v1083_v52 = vsel %vm1072_vm5, nan, %v1082_v21  ;;  %v263_v56 = vmul.f32 %v7165_v6, %v6573_v55  ;;  %v264_v21 = vmul.f32 %v7166_v9, %v6573_v55 }
 0x306   : > { %3189 = vmatpush.msra.mxu2 %v1083_v52  ;;  %v1197_v42 = vor.u32 %v1196_v0, %v1195_v46  ;;  %v1200_v11 = vshll.u32 %v1199_v23, 23  ;;  %v6585_v49 = vpop.permute.xlu0 %308  ;;  %v7169_v0 = vld [vmem:[#allocation19_spill] sm:$0xff] }
 0x307   : > { %3669 = vmatmul.msk.f32.vlgmr.msra.gmra.mxu2 %vm3103_vm10, %v6511_v60  ;;  %v6577_v63 = vpop.permute.xlu1 %226  ;;  %v352_v61 = vmul.f32 %v7168_v40, %v6585_v49 }
 0x308   : > { %v1201_v16 = vor.u32 4788187, %v1200_v11  ;;  %v1204_v25 = vcvt.s32.f32 %v1197_v42  ;;  %v7170_v42 = vld [vmem:[#allocation20_spill] sm:$0xff] }
 0x309   : > { %3664 = vmatmul.msk.f32.gmra.mxu0 %vm3103_vm10, %v3102_v54  ;;  %3668 = vmatmul.msk.f32.gmra.mxu1 %vm3103_vm10, %v3102_v54 }
 0x30a   : > { %v1202_v59 = vand.u32 2147483647, %v1201_v16 }
 0x30c   : > { %v1205_v58 = vmul.f32 %v1204_v25, %v1202_v59 }
 0x30e   : > { %v1206_v24 = vxor.u32 2147483648, %v1205_v58  ;;  %v6605_v25 = vpop.permute.xlu0 %512 }
 0x30f   : > { %3670 = vmatmul.msk.f32.gmra.mxu2 %vm3103_vm10, %v3100_v45  ;;  %v6583_v37 = vpop.permute.xlu1 %300 }
 0x310   : > { %v1207_v22 = vsel %vm1086_vm11, %v1206_v24, %v1205_v58  ;;  %v7171_v58 = vld [vmem:[#allocation5_spill] sm:$0xff]  ;;  %v275_v24 = vmul.f32 %v7165_v6, %v6577_v63 }
 0x311   : > { %v1210_v34 = vsel %vm6525_vm12, %v7158_v17, %v1207_v22  ;;  %v6571_v17 = vpop.permute.xlu2 %296  ;;  %v270_v22 = vmul.f32 %v7172_v51, %v6569_v50 }
 0x312   : > { %v1212_v47 = vmul.f32 %v1210_v34, %v1210_v34  ;;  %v339_v36 = vmul.f32 %v7167_v20, %v6571_v17  ;;  %v340_v52 = vmul.f32 %v7168_v40, %v6571_v17 }
 0x314   : > { %v1213_v62 = vmul.f32 -0.001358992, %v1212_v47  ;;  %v1220_v32 = vmul.f32 -0.00019511016, %v1212_v47  ;;  %v371_v16 = vadd.f32 %v339_v36, %v263_v56  ;;  %v372_v59 = vadd.f32 %v340_v52, %v264_v21 }
 0x315   : > { %v273_v52 = vmul.f32 %v7171_v58, %v6579_v2 }
 0x316   : > { %v1214_v18 = vadd.f32 0.041655596, %v1213_v62  ;;  %v1221_v5 = vadd.f32 0.008332121, %v1220_v32  ;;  %v7174_v62 = vld [vmem:[#allocation21_spill] sm:$0xff] }
 0x317   : > { %3671 = vmatmul.msk.f32.gmra.mxu2 %vm3103_vm10, %v3101_v39  ;;  %v6597_v46 = vpop.permute.xlu1 %404  ;;  %v555_v32 = vmul.f32 %v7174_v62, %v6605_v25 }
 0x318   : > { %v1215_v19 = vmul.f32 %v1214_v18, %v1212_v47  ;;  %v1222_v7 = vmul.f32 %v1221_v5, %v1212_v47  ;;  %v447_v23 = vmul.f32 %v7169_v0, %v6597_v46  ;;  %v448_v11 = vmul.f32 %v7170_v42, %v6597_v46 }
 0x319   : > { %v6575_v14 = vpop.permute.xlu2 %304  ;;  %v276_v5 = vmul.f32 %v7166_v9, %v6577_v63 }
 0x31a   : > { %v1216_v29 = vadd.f32 -0.4999988, %v1215_v19  ;;  %v1223_v13 = vadd.f32 -0.16666654, %v1222_v7  ;;  %v480_v48 = vadd.f32 %v448_v11, %v372_v59  ;;  %v346_v19 = vmul.f32 %v7176_v26, %v6583_v37 }
 0x31b   : > { %v351_v7 = vmul.f32 %v7167_v20, %v6585_v49  ;;  %v384_v38 = vadd.f32 %v352_v61, %v276_v5  ;;  %v350_v59 = vmul.f32 %v7176_v26, %v6575_v14  ;;  %v277_v5 = vmul.f32 %v7171_v58, %v6577_v63 }
 0x31c   : > { %v1217_v53 = vmul.f32 %v1216_v29, %v1212_v47  ;;  %v1224_v3 = vmul.f32 %v1223_v13, %v1212_v47  ;;  %v479_v47 = vadd.f32 %v447_v23, %v371_v16  ;;  %v7177_v29 = vld [vmem:[#allocation9_spill] sm:$0xff]  ;;  %v274_v23 = vmul.f32 %v7172_v51, %v6579_v2 }
 0x31d   : > { %v449_v13 = vmul.f32 %v7177_v29, %v6597_v46  ;;  %v383_v8 = vadd.f32 %v351_v7, %v275_v24  ;;  %v349_v16 = vmul.f32 %v7173_v57, %v6575_v14  ;;  %v278_v7 = vmul.f32 %v7172_v51, %v6577_v63 }
 0x31e   : > { %v1218_v4 = vadd.f32 1.0, %v1217_v53  ;;  %v1225_v28 = vadd.f32 1.0, %v1224_v3  ;;  %v587_v53 = vadd.f32 %v555_v32, %v479_v47 }
 0x31f   : > { %3672 = vmatmul.msk.f32.gmra.mxu2 %vm3103_vm10, %v3102_v54  ;;  %v6665_v61 = vadd.f32 %v349_v16, %v273_v52 }
 0x320   : > { %v1226_v35 = vmul.f32 %v1225_v28, %v1210_v34  ;;  %v1235_v33 = vxor.u32 2147483648, %v1218_v4  ;;  %v341_v34 = vmul.f32 %v7173_v57, %v6571_v17 }
 0x321   : > { %v6581_v44 = vpop.permute.xlu2 %408 }
 0x322   : > { %v1232_v1 = vxor.u32 2147483648, %v1226_v35  ;;  %v1236_v43 = vsel %vm1234_vm14, %v1235_v33, %v1226_v35  ;;  %v378_v33 = vadd.f32 %v346_v19, %v270_v22 }
 0x324   : > { %v1233_v41 = vsel %vm1231_vm13, %v1218_v4, %v1232_v1  ;;  %v7178_v4 = vld [vmem:[#allocation10_spill] sm:$0xff] }
 0x325   : > { %v1237_v27 = vsel %vm1230_vm15, %v1233_v41, %v1236_v43  ;;  %v454_v28 = vmul.f32 %v7178_v4, %v6581_v44 }
 0x326   : > { %v1238_v31 = vsel %vm1227_vm0, nan, %v1237_v27 }
 0x327   : > { %3218 = vmatpush.msra.mxu3 %v1238_v31  ;;  %v7179_v31 = vld [vmem:[#allocation11_spill] sm:$0xff]  ;;  %v6649_v11 = vadd.f32 %v454_v28, %v378_v33 }
 0x328   : > { %3673 = vmatmul.msk.f32.vlgmr.msra.gmra.mxu3 %vm3103_vm10, %v6511_v60  ;;  %v557_v15 = vmul.f32 %v7179_v31, %v6605_v25 }
 0x329   : > { %v6587_v30 = vpop.permute.xlu2 %416 }
 0x32a   : > { %v459_v43 = vmul.f32 %v7169_v0, %v6587_v30  ;;  %v460_v56 = vmul.f32 %v7170_v42, %v6587_v30  ;;  %v461_v63 = vmul.f32 %v7177_v29, %v6587_v30 }
 0x330   : > { %3674 = vmatmul.msk.f32.gmra.mxu3 %vm3103_vm10, %v3100_v45  ;;  %v265_v45 = vmul.f32 %v7171_v58, %v6573_v55 }
 0x331   : > { %v6603_v60 = vpop.permute.xlu2 %520 }
 0x332   : > { %v373_v10 = vadd.f32 %v341_v34, %v265_v45  ;;  %v6657_v34 = vadd.f32 %v459_v43, %v383_v8 }
 0x334   : > { %v481_v27 = vadd.f32 %v449_v13, %v373_v10  ;;  %v6667_v13 = vadd.f32 %v350_v59, %v274_v23  ;;  %v353_v10 = vmul.f32 %v7173_v57, %v6585_v49  ;;  %v345_v59 = vmul.f32 %v7173_v57, %v6583_v37 }
 0x336   : > { %v589_v22 = vadd.f32 %v557_v15, %v481_v27  ;;  %v385_v8 = vadd.f32 %v353_v10, %v277_v5  ;;  %v343_v27 = vmul.f32 %v7167_v20, %v6583_v37  ;;  %v344_v15 = vmul.f32 %v7168_v40, %v6583_v37 }
 0x337   : > { %v452_v37 = vmul.f32 %v7170_v42, %v6581_v44  ;;  %v450_v10 = vmul.f32 %v7178_v4, %v6597_v46 }
 0x338   : > { %3675 = vmatmul.msk.f32.gmra.mxu3 %vm3103_vm10, %v3101_v39  ;;  %v7175_v39 = vld [vmem:[#allocation22_spill] sm:$0xff]  ;;  %v6693_v16 = vadd.f32 %v461_v63, %v385_v8 }
 0x339   : > { %v556_v18 = vmul.f32 %v7175_v39, %v6605_v25 }
 0x33b   : > { %v588_v3 = vadd.f32 %v556_v18, %v480_v48  ;;  %v6659_v18 = vadd.f32 %v460_v56, %v384_v38 }
 0x340   : > { %3676 = vmatmul.msk.f32.gmra.mxu3 %vm3103_vm10, %v3102_v54 }
 0x356   : > { %v6629_v54 = vpop.permute.xlu2 %3254 }
 0x36e   : > { %v3133_v12 = vpop.f32.mrf.mxu0  ;;  %v3162_v35 = vpop.f32.mrf.mxu1 }
 0x36f   : > { %v3232_v1 = vadd.f32 %v3133_v12, %v587_v53  ;;  %v3233_v41 = vadd.f32 %v3162_v35, %v588_v3  ;;  %v354_v53 = vmul.f32 %v7176_v26, %v6585_v49  ;;  %v6677_v12 = vpop.permute.xlu1 %412  ;;  %v462_v35 = vmul.f32 %v7178_v4, %v6587_v30 }
 0x370   : > { %v267_v49 = vmul.f32 %v7165_v6, %v6569_v50  ;;  %v269_v30 = vmul.f32 %v7171_v58, %v6569_v50  ;;  %v451_v58 = vmul.f32 %v7169_v0, %v6581_v44 }
 0x371   : > { %v6640_v21 = vadd.f32 %v6629_v54, %v3232_v1  ;;  %v6643_v36 = vadd.f32 %v6629_v54, %v3233_v41  ;;  %v386_v38 = vadd.f32 %v354_v53, %v278_v7  ;;  %v268_v41 = vmul.f32 %v7166_v9, %v6569_v50 }
 0x372   : > { %v271_v50 = vmul.f32 %v7165_v6, %v6579_v2  ;;  %v375_v57 = vadd.f32 %v343_v27, %v267_v49  ;;  %v272_v6 = vmul.f32 %v7166_v9, %v6579_v2  ;;  %v377_v7 = vadd.f32 %v345_v59, %v269_v30 }
 0x373   : > { %v3304_v45 = vmin.f32 %v6640_v21, 20.0  ;;  %v3305_v24 = vmin.f32 %v6643_v36, 20.0  ;;  %vm3288_vm2 = vcmp.gt.f32.partialorder %v6640_v21, 20.0  ;;  %vm3289_vm4 = vcmp.gt.f32.partialorder %v6643_v36, 20.0 }
 0x374   : > { %v483_v9 = vadd.f32 %v451_v58, %v375_v57 }
 0x375   : > { %v3320_v47 = vmul.f32 1.442695, %v3304_v45  ;;  %v3322_v32 = vmul.f32 1.442695, %v3305_v24  ;;  %v6697_v24 = vadd.f32 %v462_v35, %v386_v38 }
 0x377   : > { %3763 = vpow2.f32 %v3320_v47  ;;  %v342_v47 = vmul.f32 %v7176_v26, %v6571_v17  ;;  %v348_v17 = vmul.f32 %v7168_v40, %v6575_v14  ;;  %v6720_v53 = vpop.permute.xlu1 %516 }
 0x378   : > { %3765 = vpow2.f32 %v3322_v32  ;;  %v376_v32 = vadd.f32 %v344_v15, %v268_v41  ;;  %v559_v63 = vmul.f32 %v7174_v62, %v6720_v53  ;;  %v560_v46 = vmul.f32 %v7175_v39, %v6720_v53 }
 0x379   : > { %v561_v15 = vmul.f32 %v7179_v31, %v6720_v53 }
 0x37a   : > { %v591_v58 = vadd.f32 %v559_v63, %v483_v9 }
 0x37d   : > { %v3764_v1 = vpop.eup %3763 }
 0x37e   : > { %v3766_v43 = vpop.eup %3765  ;;  %v3352_v56 = vadd.f32 1.0, %v3764_v1  ;;  %v3355_v52 = vmul.f32 -0.5, %v3764_v1  ;;  %v3358_v5 = vand.u32 2147483647, %v3764_v1 }
 0x37f   : > { %v3361_v23 = vadd.f32 1.0, %v3766_v43  ;;  %v3364_v45 = vmul.f32 -0.5, %v3766_v43 }
 0x380   : > { %vm3359_vm1 = vcmp.lt.f32.partialorder %v3358_v5, 0.0004427343 }
 0x38a   : > { %v3191_v48 = vpop.f32.mrf.mxu2 }
 0x38b   : > { %v3234_v19 = vadd.f32 %v3191_v48, %v589_v22  ;;  %v266_v22 = vmul.f32 %v7172_v51, %v6573_v55  ;;  %v347_v55 = vmul.f32 %v7167_v20, %v6575_v14  ;;  %v3356_v51 = vadd.f32 1.0, %v3355_v52 }
 0x38c   : > { %v453_v48 = vmul.f32 %v7177_v29, %v6581_v44  ;;  %v3367_v20 = vand.u32 2147483647, %v3766_v43  ;;  %v484_v44 = vadd.f32 %v452_v37, %v376_v32  ;;  %v455_v52 = vmul.f32 %v7169_v0, %v6677_v12 }
 0x38d   : > { %v6674_v3 = vadd.f32 %v6629_v54, %v3234_v19  ;;  %v3365_v19 = vadd.f32 1.0, %v3364_v45  ;;  %v374_v40 = vadd.f32 %v342_v47, %v266_v22  ;;  %v3357_v8 = vmul.f32 %v3764_v1, %v3356_v51  ;;  %v3136_v51 = vpop.f32.mrf.mxu0 }
 0x38e   : > { %v485_v41 = vadd.f32 %v453_v48, %v377_v7  ;;  %vm3368_vm3 = vcmp.lt.f32.partialorder %v3367_v20, 0.0004427343  ;;  %v379_v59 = vadd.f32 %v347_v55, %v271_v50  ;;  %v456_v45 = vmul.f32 %v7170_v42, %v6677_v12  ;;  %v3165_v48 = vpop.f32.mrf.mxu1  ;;  %v6744_v42 = vpop.permute.xlu1 %524 }
 0x38f   : > { %v3306_v28 = vmin.f32 %v6674_v3, 20.0  ;;  %v3366_v49 = vmul.f32 %v3766_v43, %v3365_v19  ;;  %v380_v22 = vadd.f32 %v348_v17, %v272_v6  ;;  %v592_v37 = vadd.f32 %v560_v46, %v484_v44  ;;  %v6747_v6 = vpop.permute.xlu0 %3259 }
 0x390   : > { %v593_v5 = vadd.f32 %v561_v15, %v485_v41  ;;  %v3236_v50 = vadd.f32 %v3136_v51, %v591_v58  ;;  %v487_v19 = vadd.f32 %v455_v52, %v379_v59  ;;  %vm3290_vm6 = vcmp.gt.f32.partialorder %v6674_v3, 20.0 }
 0x391   : > { %v3324_v33 = vmul.f32 1.442695, %v3306_v28  ;;  %v3237_v55 = vadd.f32 %v3165_v48, %v592_v37  ;;  %v488_v7 = vadd.f32 %v456_v45, %v380_v22  ;;  %v458_v44 = vmul.f32 %v7178_v4, %v6677_v12 }
 0x392   : > { %v565_v4 = vmul.f32 %v7179_v31, %v6603_v60  ;;  %v568_v22 = vmul.f32 %v7175_v39, %v6744_v42 }
 0x393   : > { %3767 = vpow2.f32 %v3324_v33  ;;  %v6756_v20 = vadd.f32 %v6747_v6, %v3237_v55  ;;  %v490_v45 = vadd.f32 %v458_v44, %v6667_v13 }
 0x394   : > { %3769 = vlog2.f32 %v3352_v56  ;;  %v6803_v55 = vadd.f32 %v568_v22, %v6659_v18 }
 0x395   : > { %3771 = vlog2.f32 %v3361_v23  ;;  %v3139_v15 = vpop.f32.mrf.mxu0  ;;  %vm3293_vm8 = vcmp.gt.f32.partialorder %v6756_v20, 20.0 }
 0x399   : > { %v3768_v26 = vpop.eup %3767 }
 0x39a   : > { %v3370_v14 = vadd.f32 1.0, %v3768_v26  ;;  %v3770_v28 = vpop.eup %3769  ;;  %v3373_v2 = vmul.f32 -0.5, %v3768_v26  ;;  %v3376_v43 = vand.u32 2147483647, %v3768_v26 }
 0x39b   : > { %v3772_v35 = vpop.eup %3771  ;;  %v3354_v33 = vmul.f32 0.6931472, %v3770_v28  ;;  %v457_v28 = vmul.f32 %v7177_v29, %v6677_v12 }
 0x39c   : > { %3773 = vlog2.f32 %v3370_v14  ;;  %v3363_v38 = vmul.f32 0.6931472, %v3772_v35  ;;  %v3374_v30 = vadd.f32 1.0, %v3373_v2  ;;  %vm3377_vm5 = vcmp.lt.f32.partialorder %v3376_v43, 0.0004427343  ;;  %v3194_v14 = vpop.f32.mrf.mxu2  ;;  %v6779_v43 = vpop.permute.xlu1 %3264 }
 0x39d   : > { %v3360_v27 = vsel %vm3359_vm1, %v3357_v8, %v3354_v33  ;;  %v3238_v2 = vadd.f32 %v3194_v14, %v593_v5 }
 0x39e   : > { %v3369_v56 = vsel %vm3368_vm3, %v3366_v49, %v3363_v38  ;;  %v3496_v1 = vsel %vm3288_vm2, %v6640_v21, %v3360_v27  ;;  %v482_v21 = vadd.f32 %v450_v10, %v374_v40  ;;  %v3375_v0 = vmul.f32 %v3768_v26, %v3374_v30 }
 0x39f   : > { %v3497_v23 = vsel %vm3289_vm4, %v6643_v36, %v3369_v56  ;;  %3512 = vst [vmem:[%s6736_s6] sm:$0xff] %v3496_v1  ;;  %v7180_v36 = vld [vmem:[#allocation12_spill] sm:$0xff]  ;;  %v563_v26 = vmul.f32 %v7174_v62, %v6603_v60  ;;  %v6753_v10 = vadd.f32 %v6747_v6, %v3236_v50  ;;  %v564_v40 = vmul.f32 %v7175_v39, %v6603_v60  ;;  %v3168_v56 = vpop.f32.mrf.mxu1 }
 0x3a0   : > { %3513 = vst [vmem:[%s6736_s6 + $0x8] sm:$0xff] %v3497_v23  ;;  %v558_v32 = vmul.f32 %v7180_v36, %v6605_v25  ;;  %v6768_v33 = vadd.f32 %v6747_v6, %v3238_v2  ;;  %v562_v27 = vmul.f32 %v7180_v36, %v6720_v53  ;;  %v489_v1 = vadd.f32 %v457_v28, %v6665_v61 }
 0x3a1   : > { %v3308_v63 = vmin.f32 %v6753_v10, 20.0  ;;  %v595_v8 = vadd.f32 %v563_v26, %v487_v19  ;;  %v596_v41 = vadd.f32 %v564_v40, %v488_v7  ;;  %v567_v53 = vmul.f32 %v7174_v62, %v6744_v42 }
 0x3a2   : > { %v3774_v47 = vpop.eup %3773  ;;  %v590_v9 = vadd.f32 %v558_v32, %v482_v21  ;;  %v3310_v29 = vmin.f32 %v6768_v33, 20.0  ;;  %v594_v21 = vadd.f32 %v562_v27, %v6649_v11  ;;  %v597_v62 = vadd.f32 %v565_v4, %v489_v1  ;;  %v3142_v1 = vpop.f32.mrf.mxu0 }
 0x3a3   : > { %v3372_v57 = vmul.f32 0.6931472, %v3774_v47  ;;  %v3328_v38 = vmul.f32 1.442695, %v3308_v63  ;;  %v3240_v30 = vadd.f32 %v3139_v15, %v595_v8  ;;  %v3241_v52 = vadd.f32 %v3168_v56, %v596_v41 }
 0x3a4   : > { %v3332_v23 = vmul.f32 1.442695, %v3310_v29  ;;  %v6798_v13 = vadd.f32 %v567_v53, %v6657_v34  ;;  %v6807_v19 = vmul.f32 %v7180_v36, %v6744_v42  ;;  %vm3292_vm7 = vcmp.gt.f32.partialorder %v6753_v10, 20.0 }
 0x3a5   : > { %v3378_v17 = vsel %vm3377_vm5, %v3375_v0, %v3372_v57  ;;  %3775 = vpow2.f32 %v3328_v38  ;;  %v6785_v61 = vadd.f32 %v6779_v43, %v3240_v30  ;;  %v6794_v58 = vadd.f32 %v6779_v43, %v3241_v52  ;;  %v3197_v0 = vpop.f32.mrf.mxu2 }
 0x3a6   : > { %v3498_v25 = vsel %vm3290_vm6, %v6674_v3, %v3378_v17  ;;  %v3309_v3 = vmin.f32 %v6756_v20, 20.0  ;;  %v3242_v51 = vadd.f32 %v3197_v0, %v597_v62  ;;  %vm3294_vm11 = vcmp.gt.f32.partialorder %v6768_v33, 20.0 }
 0x3a7   : > { %3514 = vst [vmem:[%s6736_s6 + $0x10] sm:$0xff] %v3498_v25  ;;  %v3312_v57 = vmin.f32 %v6785_v61, 20.0  ;;  %vm3296_vm0 = vcmp.gt.f32.partialorder %v6785_v61, 20.0  ;;  %vm3297_vm4 = vcmp.gt.f32.partialorder %v6794_v58, 20.0 }
 0x3a8   : > { %v3330_v49 = vmul.f32 1.442695, %v3309_v3  ;;  %v6814_v2 = vadd.f32 %v6779_v43, %v3242_v51 }
 0x3a9   : > { %v3336_v40 = vmul.f32 1.442695, %v3312_v57 }
 0x3aa   : > { %3777 = vpow2.f32 %v3330_v49  ;;  %v3314_v41 = vmin.f32 %v6814_v2, 20.0  ;;  %vm3298_vm6 = vcmp.gt.f32.partialorder %v6814_v2, 20.0 }
 0x3ab   : > { %v3220_v35 = vpop.f32.mrf.mxu3  ;;  %3779 = vpow2.f32 %v3332_v23  ;;  %v3776_v32 = vpop.eup %3775 }
 0x3ac   : > { %v3235_v46 = vadd.f32 %v3220_v35, %v590_v9  ;;  %v3388_v5 = vadd.f32 1.0, %v3776_v32  ;;  %v3391_v50 = vmul.f32 -0.5, %v3776_v32  ;;  %v3394_v34 = vand.u32 2147483647, %v3776_v32 }
 0x3ad   : > { %v3340_v52 = vmul.f32 1.442695, %v3314_v41 }
 0x3ae   : > { %v6777_v12 = vadd.f32 %v6629_v54, %v3235_v46  ;;  %v566_v54 = vmul.f32 %v7180_v36, %v6603_v60  ;;  %v569_v60 = vmul.f32 %v7179_v31, %v6744_v42  ;;  %v3313_v31 = vmin.f32 %v6794_v58, 20.0 }
 0x3af   : > { %v3392_v28 = vadd.f32 1.0, %v3391_v50  ;;  %vm6821_vm9 = vcmp.lt.f32.partialorder %v3394_v34, 0.0004427343  ;;  %v6854_v50 = vpop.permute.xlu2 %3269 }
 0x3b0   : > { %v3307_v59 = vmin.f32 %v6777_v12, 20.0  ;;  %v598_v48 = vadd.f32 %v566_v54, %v490_v45  ;;  %v3778_v11 = vpop.eup %3777  ;;  %v6819_v42 = vadd.f32 %v569_v60, %v6693_v16  ;;  %v3338_v3 = vmul.f32 1.442695, %v3313_v31  ;;  %v3171_v60 = vpop.f32.mrf.mxu1 }
 0x3b1   : > { %v3397_v17 = vadd.f32 1.0, %v3778_v11  ;;  %v3780_v7 = vpop.eup %3779  ;;  %v3400_v25 = vmul.f32 -0.5, %v3778_v11  ;;  %v3403_v14 = vand.u32 2147483647, %v3778_v11  ;;  %v3393_v38 = vmul.f32 %v3776_v32, %v3392_v28 }
 0x3b2   : > { %v3326_v47 = vmul.f32 1.442695, %v3307_v59  ;;  %v3406_v18 = vadd.f32 1.0, %v3780_v7  ;;  %v3409_v36 = vmul.f32 -0.5, %v3780_v7  ;;  %v3412_v56 = vand.u32 2147483647, %v3780_v7 }
 0x3b3   : > { %v3223_v37 = vpop.f32.mrf.mxu3  ;;  %v3401_v8 = vadd.f32 1.0, %v3400_v25  ;;  %vm6826_vm10 = vcmp.lt.f32.partialorder %v3403_v14, 0.0004427343  ;;  %vm3291_vm12 = vcmp.gt.f32.partialorder %v6777_v12, 20.0 }
 0x3b4   : > { %3781 = vpow2.f32 %v3326_v47  ;;  %v3239_v39 = vadd.f32 %v3223_v37, %v594_v21  ;;  %v3410_v15 = vadd.f32 1.0, %v3409_v36  ;;  %v3244_v21 = vadd.f32 %v3142_v1, %v6798_v13 }
 0x3b5   : > { %3783 = vlog2.f32 %v3388_v5  ;;  %v3402_v45 = vmul.f32 %v3778_v11, %v3401_v8  ;;  %vm3413_vm14 = vcmp.lt.f32.partialorder %v3412_v56, 0.0004427343 }
 0x3b6   : > { %v6810_v26 = vadd.f32 %v6747_v6, %v3239_v39  ;;  %3785 = vlog2.f32 %v3397_v17  ;;  %v3411_v0 = vmul.f32 %v3780_v7, %v3410_v15  ;;  %v3245_v7 = vadd.f32 %v3171_v60, %v6803_v55 }
 0x3b7   : > { %3787 = vlog2.f32 %v3406_v18 }
 0x3b8   : > { %v3311_v63 = vmin.f32 %v6810_v26, 20.0  ;;  %3789 = vpow2.f32 %v3336_v40  ;;  %v6875_v8 = vadd.f32 %v6854_v50, %v3245_v7  ;;  %vm3295_vm15 = vcmp.gt.f32.partialorder %v6810_v26, 20.0 }
 0x3ba   : > { %v3782_v6 = vpop.eup %3781  ;;  %v3334_v49 = vmul.f32 1.442695, %v3311_v63 }
 0x3bb   : > { %v3379_v44 = vadd.f32 1.0, %v3782_v6  ;;  %v3382_v35 = vmul.f32 -0.5, %v3782_v6  ;;  %v3226_v16 = vpop.f32.mrf.mxu3  ;;  %v3784_v29 = vpop.eup %3783  ;;  %v3385_v27 = vand.u32 2147483647, %v3782_v6 }
 0x3bc   : > { %v3786_v4 = vpop.eup %3785  ;;  %v3390_v30 = vmul.f32 0.6931472, %v3784_v29  ;;  %v3243_v23 = vadd.f32 %v3226_v16, %v598_v48 }
 0x3bd   : > { %3791 = vlog2.f32 %v3379_v44  ;;  %v3383_v53 = vadd.f32 1.0, %v3382_v35  ;;  %v3399_v59 = vmul.f32 0.6931472, %v3786_v4  ;;  %v3788_v54 = vpop.eup %3787  ;;  %vm6844_vm13 = vcmp.lt.f32.partialorder %v3385_v27, 0.0004427343 }
 0x3be   : > { %3793 = vpow2.f32 %v3334_v49  ;;  %v3396_v22 = vsel %vm6821_vm9, %v3393_v38, %v3390_v30  ;;  %v6836_v47 = vadd.f32 %v6779_v43, %v3243_v23  ;;  %v3408_v57 = vmul.f32 0.6931472, %v3788_v54  ;;  %v3790_v32 = vpop.eup %3789  ;;  %v3200_v38 = vpop.f32.mrf.mxu2 }
 0x3bf   : > { %3795 = vpow2.f32 %v3338_v3  ;;  %v3405_v62 = vsel %vm6826_vm10, %v3402_v45, %v3399_v59  ;;  %v3500_v37 = vsel %vm3292_vm7, %v6753_v10, %v3396_v22  ;;  %v3384_v48 = vmul.f32 %v3782_v6, %v3383_v53 }
 0x3c0   : > { %3797 = vpow2.f32 %v3340_v52  ;;  %v3501_v43 = vsel %vm3293_vm8, %v6756_v20, %v3405_v62  ;;  %3516 = vst [vmem:[%s6736_s6 + $0x20] sm:$0xff] %v3500_v37  ;;  %v3315_v13 = vmin.f32 %v6836_v47, 20.0  ;;  %v3414_v10 = vsel %vm3413_vm14, %v3411_v0, %v3408_v57 }
 0x3c1   : > { %3517 = vst [vmem:[%s6736_s6 + $0x28] sm:$0xff] %v3501_v43  ;;  %v3424_v11 = vadd.f32 1.0, %v3790_v32  ;;  %v3427_v5 = vmul.f32 -0.5, %v3790_v32  ;;  %v3502_v31 = vsel %vm3294_vm11, %v6768_v33, %v3414_v10  ;;  %v6860_v20 = vadd.f32 %v6854_v50, %v3244_v21 }
 0x3c2   : > { %3518 = vst [vmem:[%s6736_s6 + $0x30] sm:$0xff] %v3502_v31  ;;  %v3430_v28 = vand.u32 2147483647, %v3790_v32  ;;  %v3342_v33 = vmul.f32 1.442695, %v3315_v13  ;;  %v602_v3 = vadd.f32 %v6807_v19, %v6697_v24  ;;  %v3317_v30 = vmin.f32 %v6875_v8, 20.0 }
 0x3c3   : > { %v3792_v51 = vpop.eup %3791  ;;  %3799 = vlog2.f32 %v3424_v11  ;;  %v3428_v55 = vadd.f32 1.0, %v3427_v5  ;;  %v3316_v19 = vmin.f32 %v6860_v20, 20.0  ;;  %v3229_v49 = vpop.f32.mrf.mxu3  ;;  %v3246_v59 = vadd.f32 %v3200_v38, %v6819_v42 }
 0x3c4   : > { %v3794_v34 = vpop.eup %3793  ;;  %v3381_v17 = vmul.f32 0.6931472, %v3792_v51  ;;  %vm6885_vm2 = vcmp.lt.f32.partialorder %v3430_v28, 0.0004427343  ;;  %v3247_v45 = vadd.f32 %v3229_v49, %v602_v3  ;;  %v3346_v62 = vmul.f32 1.442695, %v3317_v30 }
 0x3c5   : > { %v3796_v25 = vpop.eup %3795  ;;  %v3415_v14 = vadd.f32 1.0, %v3794_v34  ;;  %v3418_v40 = vmul.f32 -0.5, %v3794_v34  ;;  %v3421_v6 = vand.u32 2147483647, %v3794_v34  ;;  %v3429_v29 = vmul.f32 %v3790_v32, %v3428_v55 }
 0x3c6   : > { %v6864_v18 = vpop.eup %3797  ;;  %v3387_v36 = vsel %vm6844_vm13, %v3384_v48, %v3381_v17  ;;  %v3433_v9 = vadd.f32 1.0, %v3796_v25  ;;  %v3436_v35 = vmul.f32 -0.5, %v3796_v25  ;;  %v3439_v15 = vand.u32 2147483647, %v3796_v25 }
 0x3c7   : > { %v3499_v63 = vsel %vm3291_vm12, %v6777_v12, %v3387_v36  ;;  %3801 = vlog2.f32 %v3415_v14  ;;  %v3419_v44 = vadd.f32 1.0, %v3418_v40  ;;  %v3442_v46 = vadd.f32 1.0, %v6864_v18 }
 0x3c8   : > { %3515 = vst [vmem:[%s6736_s6 + $0x18] sm:$0xff] %v3499_v63  ;;  %3803 = vlog2.f32 %v3433_v9  ;;  %v3445_v12 = vmul.f32 -0.5, %v6864_v18  ;;  %vm6881_vm1 = vcmp.lt.f32.partialorder %v3421_v6, 0.0004427343  ;;  %v3437_v27 = vadd.f32 1.0, %v3436_v35 }
 0x3c9   : > { %3805 = vpow2.f32 %v3342_v33  ;;  %v3800_v41 = vpop.eup %3799  ;;  %v3420_v56 = vmul.f32 %v3794_v34, %v3419_v44  ;;  %v3344_v4 = vmul.f32 1.442695, %v3316_v19  ;;  %v3448_v53 = vand.u32 2147483647, %v6864_v18 }
 0x3ca   : > { %3807 = vlog2.f32 %v3442_v46  ;;  %v3426_v1 = vmul.f32 0.6931472, %v3800_v41  ;;  %v3446_v23 = vadd.f32 1.0, %v3445_v12  ;;  %v3438_v57 = vmul.f32 %v3796_v25, %v3437_v27 }
 0x3cb   : > { %3809 = vpow2.f32 %v3344_v4  ;;  %v6899_v60 = vadd.f32 %v6854_v50, %v3246_v59  ;;  %vm3440_vm3 = vcmp.lt.f32.partialorder %v3439_v15, 0.0004427343  ;;  %v6905_v39 = vadd.f32 %v6854_v50, %v3247_v45 }
 0x3cc   : > { %v3432_v21 = vsel %vm6885_vm2, %v3429_v29, %v3426_v1  ;;  %3811 = vpow2.f32 %v3346_v62  ;;  %v3447_v11 = vmul.f32 %v6864_v18, %v3446_v23  ;;  %vm3449_vm5 = vcmp.lt.f32.partialorder %v3448_v53, 0.0004427343 }
 0x3cd   : > { %v3802_v52 = vpop.eup %3801  ;;  %v3504_v0 = vsel %vm3296_vm0, %v6785_v61, %v3432_v21  ;;  %v3318_v50 = vmin.f32 %v6899_v60, 20.0  ;;  %v3319_v17 = vmin.f32 %v6905_v39, 20.0  ;;  %vm3299_vm8 = vcmp.gt.f32.partialorder %v6836_v47, 20.0 }
 0x3ce   : > { %v3804_v54 = vpop.eup %3803  ;;  %v3417_v22 = vmul.f32 0.6931472, %v3802_v52  ;;  %3520 = vst [vmem:[%s6736_s6 + $0x40] sm:$0xff] %v3504_v0  ;;  %vm3300_vm9 = vcmp.gt.f32.partialorder %v6860_v20, 20.0  ;;  %vm3301_vm12 = vcmp.gt.f32.partialorder %v6875_v8, 20.0  ;;  %vm3302_vm14 = vcmp.gt.f32.partialorder %v6899_v60, 20.0 }
 0x3cf   : > { %v3435_v37 = vmul.f32 0.6931472, %v3804_v54  ;;  %v3806_v32 = vpop.eup %3805  ;;  %v3348_v40 = vmul.f32 1.442695, %v3318_v50  ;;  %v3350_v6 = vmul.f32 1.442695, %v3319_v17 }
 0x3d0   : > { %v3423_v42 = vsel %vm6881_vm1, %v3420_v56, %v3417_v22  ;;  %v3808_v43 = vpop.eup %3807  ;;  %v3451_v51 = vadd.f32 1.0, %v3806_v32  ;;  %v3454_v5 = vmul.f32 -0.5, %v3806_v32  ;;  %v3457_v28 = vand.u32 2147483647, %v3806_v32 }
 0x3d1   : > { %v3503_v13 = vsel %vm3295_vm15, %v6810_v26, %v3423_v42  ;;  %v3441_v61 = vsel %vm3440_vm3, %v3438_v57, %v3435_v37  ;;  %v3444_v10 = vmul.f32 0.6931472, %v3808_v43  ;;  %v3810_v34 = vpop.eup %3809  ;;  %vm3303_vm0 = vcmp.gt.f32.partialorder %v6905_v39, 20.0 }
 0x3d2   : > { %3519 = vst [vmem:[%s6736_s6 + $0x38] sm:$0xff] %v3503_v13  ;;  %v3505_v48 = vsel %vm3297_vm4, %v6794_v58, %v3441_v61  ;;  %3813 = vlog2.f32 %v3451_v51  ;;  %v3460_v7 = vadd.f32 1.0, %v3810_v34  ;;  %v3812_v25 = vpop.eup %3811  ;;  %v3455_v58 = vadd.f32 1.0, %v3454_v5 }
 0x3d3   : > { %3521 = vst [vmem:[%s6736_s6 + $0x48] sm:$0xff] %v3505_v48  ;;  %v3450_v26 = vsel %vm3449_vm5, %v3447_v11, %v3444_v10  ;;  %v3463_v14 = vmul.f32 -0.5, %v3810_v34  ;;  %v3469_v18 = vadd.f32 1.0, %v3812_v25  ;;  %v3472_v36 = vmul.f32 -0.5, %v3812_v25 }
 0x3d4   : > { %v3506_v31 = vsel %vm3298_vm6, %v6814_v2, %v3450_v26  ;;  %3815 = vlog2.f32 %v3460_v7  ;;  %v3456_v63 = vmul.f32 %v3806_v32, %v3455_v58  ;;  %vm3458_vm7 = vcmp.lt.f32.partialorder %v3457_v28, 0.0004427343 }
 0x3d5   : > { %3522 = vst [vmem:[%s6736_s6 + $0x50] sm:$0xff] %v3506_v31  ;;  %3817 = vpow2.f32 %v3348_v40  ;;  %v3464_v55 = vadd.f32 1.0, %v3463_v14  ;;  %v3466_v2 = vand.u32 2147483647, %v3810_v34  ;;  %v3473_v44 = vadd.f32 1.0, %v3472_v36 }
 0x3d6   : > { %3819 = vlog2.f32 %v3469_v18  ;;  %v3475_v12 = vand.u32 2147483647, %v3812_v25 }
 0x3d7   : > { %3821 = vpow2.f32 %v3350_v6  ;;  %v3465_v19 = vmul.f32 %v3810_v34, %v3464_v55  ;;  %vm3467_vm10 = vcmp.lt.f32.partialorder %v3466_v2, 0.0004427343  ;;  %v3474_v15 = vmul.f32 %v3812_v25, %v3473_v44 }
 0x3d8   : > { %v3814_v9 = vpop.eup %3813  ;;  %vm3476_vm11 = vcmp.lt.f32.partialorder %v3475_v12, 0.0004427343 }
 0x3d9   : > { %v3453_v33 = vmul.f32 0.6931472, %v3814_v9 }
 0x3da   : > { %v3816_v35 = vpop.eup %3815 }
 0x3db   : > { %v3459_v3 = vsel %vm3458_vm7, %v3456_v63, %v3453_v33  ;;  %v3818_v16 = vpop.eup %3817  ;;  %v3462_v24 = vmul.f32 0.6931472, %v3816_v35 }
 0x3dc   : > { %v3507_v46 = vsel %vm3299_vm8, %v6836_v47, %v3459_v3  ;;  %v3820_v38 = vpop.eup %3819  ;;  %v3478_v49 = vadd.f32 1.0, %v3818_v16  ;;  %v3481_v56 = vmul.f32 -0.5, %v3818_v16  ;;  %v3484_v53 = vand.u32 2147483647, %v3818_v16 }
 0x3dd   : > { %3523 = vst [vmem:[%s6736_s6 + $0x58] sm:$0xff] %v3507_v46  ;;  %v3822_v41 = vpop.eup %3821  ;;  %v3468_v29 = vsel %vm3467_vm10, %v3465_v19, %v3462_v24  ;;  %v3471_v27 = vmul.f32 0.6931472, %v3820_v38 }
 0x3de   : > { %v3508_v47 = vsel %vm3300_vm9, %v6860_v20, %v3468_v29  ;;  %3823 = vlog2.f32 %v3478_v49  ;;  %v3487_v4 = vadd.f32 1.0, %v3822_v41  ;;  %v3490_v52 = vmul.f32 -0.5, %v3822_v41 }
 0x3df   : > { %3524 = vst [vmem:[%s6736_s6 + $0x60] sm:$0xff] %v3508_v47  ;;  %v3477_v1 = vsel %vm3476_vm11, %v3474_v15, %v3471_v27  ;;  %v3482_v23 = vadd.f32 1.0, %v3481_v56  ;;  %v3493_v22 = vand.u32 2147483647, %v3822_v41  ;;  %vm3485_vm13 = vcmp.lt.f32.partialorder %v3484_v53, 0.0004427343 }
 0x3e0   : > { %v3509_v30 = vsel %vm3301_vm12, %v6875_v8, %v3477_v1  ;;  %3825 = vlog2.f32 %v3487_v4  ;;  %v3491_v59 = vadd.f32 1.0, %v3490_v52 }
 0x3e1   : > { %3525 = vst [vmem:[%s6736_s6 + $0x68] sm:$0xff] %v3509_v30  ;;  %v3483_v54 = vmul.f32 %v3818_v16, %v3482_v23  ;;  %vm3494_vm15 = vcmp.lt.f32.partialorder %v3493_v22, 0.0004427343 }
 0x3e2   : > { %v3492_v57 = vmul.f32 %v3822_v41, %v3491_v59 }
 0x3e4   : > { %v3824_v20 = vpop.eup %3823 }
 0x3e5   : > { %v3480_v45 = vmul.f32 0.6931472, %v3824_v20 }
 0x3e6   : > { %v3826_v8 = vpop.eup %3825 }
 0x3e7   : > { %v3486_v21 = vsel %vm3485_vm13, %v3483_v54, %v3480_v45  ;;  %v3489_v37 = vmul.f32 0.6931472, %v3826_v8 }
 0x3e8   : > { %v3510_v62 = vsel %vm3302_vm14, %v6899_v60, %v3486_v21 }
 0x3e9   : > { %3526 = vst [vmem:[%s6736_s6 + $0x70] sm:$0xff] %v3510_v62  ;;  %v3495_v0 = vsel %vm3494_vm15, %v3492_v57, %v3489_v37 }
 0x3ea   : > { %v3511_v32 = vsel %vm3303_vm0, %v6905_v39, %v3495_v0 }
 0x3eb   : > { %3527 = vst [vmem:[%s6736_s6 + $0x78] sm:$0xff] %v3511_v32 }
 0x3ec   : > { %3854 = shalt.err (!%p3851_p3)
}
 0x3ed   : > { %s3901_s29 = smov 512   ;;  %s3902_s30 = smov 1024  }
 0x3ee   : > { %s3903_s5 = smov 32  }
 0x3ef   : > { %3683 = dma.vmem_to_hbm [thread:$0]  (%p3967_p5), %s3542_s11, 2048, %s3544_s12, %s3529_s19, %s3901_s29, %s3902_s30, %s3903_s5  }
 0x3f0 PF: > { %p3689_p4 = scmp.ge.s32.totalorder %s3889_s18, 2  ;;  %s3558_s6 = sand.u32 1, %s3877_s15  }
 0x3f1   : > { %s3559_s7 = scalar_lea.sflag [#allocation3], %s3558_s6 }
 0x3f2   : > { %p3686_p7 = pnand %p3689_p4, %p3971_p6 }
 0x3f4   : > { %p3687_p8 = pneg %p3686_p7 }
 0x3f6   : > { %3872 = dma.done.wait (%p3687_p8), %s3559_s7, 2048  }
 0x3f7   : > { %3874 = vsyncadd (%p3687_p8), %s3559_s7, 4294965248  ;;  %p14_p9 = scmp.ge.s32.totalorder %s3954_s21, 4   ;;  %s7191_s15 = smov %s3881_s16 }
 0x3f8   : > { %s7192_s16 = smov %s3885_s17  ;;  %s7193_s17 = smov %s3965_s24 }
 0x3f9   : > { %s7194_s18 = smov %s3954_s21  ;;  %16 = sbr.rel (!%p14_p9) target bundleno = 3 (0x3), region = 71 }
 0x3fe   :  { %3565 = vsyncpa [#allocation3], 1 }
 0x3ff   :  { %3567 = vsyncpa [#allocation3 + $0x1], 1 }

</bundles_post_ra>
